<compile_context>
chip_gen: v7x
topology: tpu7x:2x2x1
jax: 0.10.0
libtpu: 0.0.40
codegen_flags: <defaults>
</compile_context>

<pallas_src>
import functools

import jax
import jax.numpy as jnp
from jax.experimental import pallas as pl
from jax.experimental.pallas import tpu as pltpu


def _round_up(x, m):
    return (x + m - 1) // m * m


def _cdiv(a, b):
    return -(-a // b)


# ----------------------------- kernels ---------------------------------------


def _matmul_kernel_full_k(w_ref, x_ref, o_ref):
    """Full-K tiles: one MXU pass per output block, no reduction axis."""
    o_ref[...] = jnp.dot(
        w_ref[...], x_ref[...], preferred_element_type=jnp.float32
    ).astype(o_ref.dtype)


def _matmul_kernel_ktiled_f32(w_ref, x_ref, o_ref):
    """K-tiled, f32 output: accumulate straight into the resident output
    block. k==0 writes the partial product directly (no zero-init pass)."""
    p = jnp.dot(w_ref[...], x_ref[...], preferred_element_type=jnp.float32)
    k = pl.program_id(2)

    @pl.when(k == 0)
    def _():
        o_ref[...] = p

    @pl.when(k > 0)
    def _():
        o_ref[...] += p


def _matmul_kernel_ktiled_acc(w_ref, x_ref, o_ref, acc_ref):
    """K-tiled, non-f32 output: f32 VMEM accumulator, cast on the last step."""
    p = jnp.dot(w_ref[...], x_ref[...], preferred_element_type=jnp.float32)
    k = pl.program_id(2)

    @pl.when(k == 0)
    def _():
        acc_ref[...] = p

    @pl.when(k > 0)
    def _():
        acc_ref[...] += p

    @pl.when(k == pl.num_programs(2) - 1)
    def _():
        o_ref[...] = acc_ref[...].astype(o_ref.dtype)


# --------------------------- hardware / tiling --------------------------------

_TK_TARGET = 512          # K tile target for the (rare) tiled-K fallback
_TINY_FLOPS = 1 << 24     # below this, pallas_call overhead > the matmul


def _tpu_profile():
    """Return (vmem_capacity_bytes, assumed TensorCores per chip)."""
    vmem = 64 << 20
    try:
        info = pltpu.get_tpu_info()
        v = int(getattr(info, "vmem_capacity_bytes", 0) or 0)
        if v > 0:
            vmem = v
    except Exception:
        pass
    # 128-MiB-VMEM chips (v5e/v6e) have one TensorCore; smaller-VMEM chips
    # (v7x: 64 MiB/TC) have two. Unknown -> assume 2 (the occupancy split is
    # essentially free on a single-core chip).
    cores = 1 if vmem >= (120 << 20) else 2
    return vmem, cores


def _pick_tile(dim, target, align):
    """Pick a tile size for one dimension.

    * dim <= target: use the full dim (full-dim blocks are exempt from the
      (8,128) alignment rule, so no padding at all).
    * otherwise: prefer an aligned exact divisor of round_up(dim, align) in
      [balanced, target] (zero/near-zero padding); else a balanced aligned
      tile t = round_up(cdiv(dim, cdiv(dim, target)), align), which limits
      padding to well under one tile (no near-2x blow-up).
    """
    if dim <= target:
        return dim
    dim_a = _round_up(dim, align)
    n = _cdiv(dim_a, target)
    t_bal = _round_up(_cdiv(dim_a, n), align)
    t_hi = target - (target % align)
    for t in range(t_hi, t_bal - 1, -align):
        if dim_a % t == 0:
            return t
    return t_bal


# ------------------------------ wrapper ----------------------------------------


@functools.partial(
    jax.jit, static_argnames=("tm", "tn", "tk", "use_pallas", "cast_to_bf16")
)
def matrix_forward(lin_mat, x, *, tm=None, tn=None, tk=None,
                   use_pallas=None, cast_to_bf16=False):
    """Pallas equivalent of Matrix.forward: lin_mat @ x."""
    M, K = lin_mat.shape
    K2, N = x.shape
    if K != K2:
        raise ValueError(f"inner dims mismatch: {K} vs {K2}")

    out_dtype = jnp.result_type(lin_mat.dtype, x.dtype)

    # Tiny problems: the fastest "kernel" is no kernel.
    if use_pallas is None:
        use_pallas = (2 * M * N * K) >= _TINY_FLOPS
    if not use_pallas:
        return jnp.dot(lin_mat, x).astype(out_dtype)

    w = lin_mat
    xx = x
    if cast_to_bf16:
        # bf16 inputs, f32 accumulation (engages the full MXU rate on
        # v6e/v7x; on v5e the VPU has no bf16 so all non-MXU math stays f32).
        w = w.astype(jnp.bfloat16)
        xx = xx.astype(jnp.bfloat16)

    in_dtype = w.dtype
    in_isz = jnp.dtype(in_dtype).itemsize
    out_isz = jnp.dtype(out_dtype).itemsize
    # bf16 min tile is (16,128); f32 is (8,128). (fp8/int8 would need 32.)
    align_m = 16 if in_isz == 2 else 8

    # Generation-aware budgets / targets.
    vmem_cap, n_cores = _tpu_profile()
    big_vmem = vmem_cap >= (120 << 20)          # v5e / v6e (128 MiB VMEM)
    vmem_budget = (96 << 20) if big_vmem else (44 << 20)
    mn_target = 1024 if big_vmem else 512

    tm = tm or _pick_tile(M, mn_target, align_m)
    tn = tn or _pick_tile(N, mn_target, 128)

    # Megacore occupancy: on 2-TC chips a 1x1 parallel grid idles one core.
    if n_cores >= 2 and _cdiv(M, tm) * _cdiv(N, tn) < 2:
        if M >= 2 * align_m:
            tm = _round_up(_cdiv(M, 2), align_m)
        elif N >= 256:
            tn = _round_up(_cdiv(N, 2), 128)

    # Full-K (2-D grid, no reduction axis) vs tiled-K (3-D grid).
    if tk is not None:
        use_full_k = tk >= K
        tk_eff = K if use_full_k else tk
    else:
        full_k_bytes = 2 * (tm * K + K * tn) * in_isz + 2 * tm * tn * out_isz
        use_full_k = full_k_bytes <= vmem_budget
        tk_eff = K if use_full_k else _pick_tile(K, _TK_TARGET, 128)

    # Padding (thin edges only; K never padded on the full-K path; zeros
    # along K are exact for matmul, extra M/N rows/cols are sliced off).
    Mp = _round_up(M, tm)
    Np = _round_up(N, tn)
    Kp = K if use_full_k else _round_up(K, tk_eff)
    if (Mp, Kp) != (M, K):
        w = jnp.pad(w, ((0, Mp - M), (0, Kp - K)))
    if (Kp, Np) != (K, N):
        xx = jnp.pad(xx, ((0, Kp - K), (0, Np - N)))

    gi, gj = Mp // tm, Np // tn
    use_inplace = out_dtype == jnp.float32

    if use_full_k:
        grid = (gi, gj)
        kernel = _matmul_kernel_full_k
        in_specs = [
            pl.BlockSpec((tm, Kp), lambda i, j: (i, 0)),
            pl.BlockSpec((Kp, tn), lambda i, j: (0, j)),
        ]
        out_spec = pl.BlockSpec((tm, tn), lambda i, j: (i, j))
        scratch = []
        dims = ("parallel", "parallel")
        working = 2 * (tm * Kp + Kp * tn) * in_isz + 2 * tm * tn * out_isz
    else:
        grid = (gi, gj, Kp // tk_eff)
        kernel = _matmul_kernel_ktiled_f32 if use_inplace else _matmul_kernel_ktiled_acc
        in_specs = [
            pl.BlockSpec((tm, tk_eff), lambda i, j, k: (i, k)),
            pl.BlockSpec((tk_eff, tn), lambda i, j, k: (k, j)),
        ]
        out_spec = pl.BlockSpec((tm, tn), lambda i, j, k: (i, j))
        scratch = [] if use_inplace else [pltpu.VMEM((tm, tn), jnp.float32)]
        dims = ("parallel", "parallel", "arbitrary")
        working = (2 * (tm * tk_eff + tk_eff * tn) * in_isz
                   + 2 * tm * tn * out_isz
                   + (0 if use_inplace else tm * tn * 4))

    vmem_limit = int(min(vmem_budget, max(32 << 20, (working * 3) // 2)))

    # Advisory cost estimate with actual re-streamed HBM traffic:
    # A is re-read once per N-tile column, B once per M-tile row.
    cost = pl.CostEstimate(
        flops=2 * M * N * K,
        transcendentals=0,
        bytes_accessed=int(in_isz * (M * K * gj + K * N * gi) + out_isz * M * N),
    )

    out = pl.pallas_call(
        kernel,
        out_shape=jax.ShapeDtypeStruct((Mp, Np), out_dtype),
        grid_spec=pltpu.PrefetchScalarGridSpec(
            num_scalar_prefetch=0,
            grid=grid,
            in_specs=in_specs,
            out_specs=out_spec,
            scratch_shapes=scratch,
        ),
        compiler_params=pltpu.CompilerParams(
            dimension_semantics=dims,
            vmem_limit_bytes=vmem_limit,
        ),
        cost_estimate=cost,
    )(w, xx)

    if (Mp, Np) != (M, N):
        out = out[:M, :N]
    return out


# ------------------------------- demo ------------------------------------------

if __name__ == "__main__":
    rto = 0.01  # matches Matrix.__init__ default
    key = jax.random.PRNGKey(0)
    k1, k2, k3, k4, key = jax.random.split(key, 5)

    # Case 1: default path — full-K tiles, 2-D fully parallel grid.
    row_d, col_d, n_cols = 1024, 768, 1024
    lin_mat = rto * jax.random.normal(k1, (row_d, col_d), dtype=jnp.float32)
    x = jax.random.normal(k2, (col_d, n_cols), dtype=jnp.float32)
    out = matrix_forward(lin_mat, x, use_pallas=True)
    jax.block_until_ready(out)
    ref = lin_mat @ x
    assert out.shape == (row_d, n_cols)
    assert jnp.allclose(out, ref, atol=1e-4, rtol=1e-4)

    # Case 2: non-divisible, unaligned shapes -> full-dim blocks (plus at most
    # a thin M pad if the megacore-occupancy split triggers), sliced outside.
    row_d, col_d, n_cols = 200, 300, 260
    lin_mat2 = rto * jax.random.normal(k3, (row_d, col_d), dtype=jnp.float32)
    x2 = jax.random.normal(k4, (col_d, n_cols), dtype=jnp.float32)
    out2 = matrix_forward(lin_mat2, x2, use_pallas=True)
    jax.block_until_ready(out2)
    ref2 = lin_mat2 @ x2
    assert out2.shape == (row_d, n_cols)
    assert jnp.allclose(out2, ref2, atol=1e-4, rtol=1e-4)

    # Case 3: tiny shape -> dispatches to plain jnp.dot (call overhead > matmul).
    km, kx = jax.random.split(key)
    lin_mat3 = rto * jax.random.normal(km, (32, 64), dtype=jnp.float32)
    x3 = jax.random.normal(kx, (64, 128), dtype=jnp.float32)
    out3 = matrix_forward(lin_mat3, x3)
    jax.block_until_ready(out3)
    assert jnp.allclose(out3, lin_mat3 @ x3, atol=1e-5, rtol=1e-5)

    # Case 4: force the tiled-K (3-D grid) path via an explicit tk override,
    # exercising the write-then-accumulate reduction kernel.
    out4 = matrix_forward(lin_mat, x, tk=256, use_pallas=True)
    jax.block_until_ready(out4)
    assert jnp.allclose(out4, ref, atol=1e-4, rtol=1e-4)

    # Case 5: opt-in bf16 fast path (f32 accumulation) — looser tolerance.
    out5 = matrix_forward(lin_mat, x, use_pallas=True, cast_to_bf16=True)
    jax.block_until_ready(out5)
    assert jnp.allclose(out5, ref, atol=2e-2, rtol=2e-2)

    print("KERNEL_OK")
</pallas_src>

<mosaic_0001>
module attributes {stable_mosaic.version = 11 : i64} {
  func.func @_matmul_kernel_full_k(%arg0: i32, %arg1: i32, %arg2: memref<512x768xf32, #tpu.memory_space<vmem>>, %arg3: memref<768x512xf32, #tpu.memory_space<vmem>>, %arg4: memref<512x512xf32, #tpu.memory_space<vmem>>) attributes {dimension_semantics = [#tpu.dimension_semantics<parallel>, #tpu.dimension_semantics<parallel>], iteration_bounds = array<i64: 2, 2>, scalar_prefetch = 0 : i64, scratch_operands = 0 : i64, tpu.core_type = #tpu.core_type<tc>, window_params = [{transform_indices = @transform_0, window_bounds = array<i64: 512, 768>}, {transform_indices = @transform_1, window_bounds = array<i64: 768, 512>}, {transform_indices = @transform_2, window_bounds = array<i64: 512, 512>}]} {
    %c0 = arith.constant 0 : index
    %c0_0 = arith.constant 0 : index
    %0 = vector.load %arg2[%c0, %c0_0] : memref<512x768xf32, #tpu.memory_space<vmem>>, vector<512x768xf32>
    %c0_1 = arith.constant 0 : index
    %c0_2 = arith.constant 0 : index
    %1 = vector.load %arg3[%c0_1, %c0_2] : memref<768x512xf32, #tpu.memory_space<vmem>>, vector<768x512xf32>
    %cst = arith.constant dense<0.000000e+00> : vector<512x512xf32>
    %2 = tpu.matmul %0, %1, %cst {dimension_numbers = #tpu.dot_dimension_numbers<[1], [0], [0], [1], [0, 0, 1, 1], [], []>} : vector<512x768xf32>, vector<768x512xf32>, vector<512x512xf32> -> vector<512x512xf32>
    %c0_3 = arith.constant 0 : index
    %c0_4 = arith.constant 0 : index
    %3 = vector.load %arg4[%c0_3, %c0_4] : memref<512x512xf32, #tpu.memory_space<vmem>>, vector<512x512xf32>
    tpu.vector_store %arg4[%c0_3, %c0_4], %2 {strides = array<i32>} : memref<512x512xf32, #tpu.memory_space<vmem>>, vector<512x512xf32>,
    return
  }
  func.func @transform_0(%arg0: i32, %arg1: i32) -> (i32, i32) {
    %c0_i32 = arith.constant 0 : i32
    %c0_i32_0 = arith.constant 0 : i32
    return %arg0, %c0_i32 : i32, i32
  }
  func.func @transform_1(%arg0: i32, %arg1: i32) -> (i32, i32) {
    %c0_i32 = arith.constant 0 : i32
    %c0_i32_0 = arith.constant 0 : i32
    return %c0_i32, %arg1 : i32, i32
  }
  func.func @transform_2(%arg0: i32, %arg1: i32) -> (i32, i32) {
    %c0_i32 = arith.constant 0 : i32
    return %arg0, %arg1 : i32, i32
  }
}

</mosaic_0001>

<bundles_post_ra>
// kernel: matrix_forward.1
= control target key start
LH: loop header
LB: loop body
LE: loop exit
PB: predicated region body
PF: predicated region fallthrough
CT: control target
= control target key end

     0   :  { %s6739_s0 = inlined_call_operand.hbm [shape: f32[1024,768], index: 0, kind: input, shape index: {}]   ;;  %s6740_s1 = inlined_call_operand.hbm [shape: f32[768,1024], index: 1, kind: input, shape index: {}]   ;;  %s6741_s2 = inlined_call_operand.hbm [shape: f32[1024,1024], index: 2, kind: output, shape index: {}]  }
   0x1   :  { %6753 = sst [smem:[#allocation16_spill]] %s6739_s0 }
   0x2   :  { %6754 = sst [smem:[#allocation17_spill]] %s6741_s2 }
   0x3   :  { %7 = vsyncpa [#allocation3], 0 }
   0x4   :  { %9 = vsyncpa [#allocation3 + $0x1], 0 }
   0x5   :  { %10 = vsyncpa [#allocation6], 0 }
   0x6   :  { %12 = vsyncpa [#allocation6 + $0x1], 0 }
   0x7   :  { %13 = vsyncpa [#allocation4], 0 }
   0x8   :  { %15 = vsyncpa [#allocation4 + $0x1], 0  ;;  %s5364_s9 = smov 0   ;;  %s5366_s10 = smov 0  }
   0x9   :  { %s5368_s11 = smov 0   ;;  %s5370_s12 = smov 0  }
   0xa   :  { %s5372_s13 = smov 0   ;;  %s5374_s14 = smov 0  }
   0xb   :  { %s5376_s15 = smov 0   ;;  %s5378_s16 = smov 0  }
   0xc   :  { %s5380_s17 = smov 0   ;;  %s5382_s18 = smov 0  }
   0xd   :  { %s5384_s19 = smov 0   ;;  %s5386_s20 = smov 0  }
   0xe   :  { %s5388_s21 = smov 0   ;;  %s5390_s22 = smov 0  }
   0xf LB: > { %6755 = sst [smem:[#allocation11_spill]] %s5332_s21  ;;  %s4066_s23 = sadd.s32 4294967295, %s5336_s22   ;;  %s5336_s22 = sphi %s5390_s22, %s21_s22   ;;  %s5332_s21 = sphi %s5388_s21, %s6786_s21   ;;  %s5328_s20 = sphi %s5386_s20, %s6797_s20   ;;  %s5324_s19 = sphi %s5384_s19, %s6784_s19   ;;  %s5320_s18 = sphi %s5382_s18, %s6796_s18   ;;  %s5316_s17 = sphi %s5380_s17, %s6795_s17   ;;  %s5312_s16 = sphi %s5378_s16, %s6794_s16   ;;  %s5308_s15 = sphi %s5376_s15, %s6793_s15   ;;  %s5304_s14 = sphi %s5374_s14, %s6792_s14   ;;  %s5300_s13 = sphi %s5372_s13, %s6791_s13   ;;  %s5296_s12 = sphi %s5370_s12, %s6790_s12   ;;  %s5292_s11 = sphi %s5368_s11, %s6789_s11   ;;  %s5288_s10 = sphi %s5366_s10, %s6788_s10   ;;  %s5284_s9 = sphi %s5364_s9, %s6787_s9  }
  0x10   : > { %p47_p0 = scmp.ne.s32.totalorder %s5316_s17, %s5312_s16  ;;  %p6744_p1 = scmp.eq.s32.totalorder %s5336_s22, 0 }
  0x11   : > { %p53_p2 = scmp.ne.s32.totalorder %s5312_s16, %s5308_s15  ;;  %p5439_p3 = scmp.eq.s32.totalorder %s4066_s23, 0 }
  0x12   : > { %p5443_p4 = scmp.eq.s32.totalorder %s4066_s23, 3  ;;  %p49_p5 = por %p6744_p1, %p47_p0 }
  0x13   : > { %p5451_p6 = por %p5439_p3, %p53_p2  ;;  %p6743_p7 = scmp.lt.s32.totalorder %s5336_s22, 4 }
  0x14   : > { %s6757_s27 = scalar_select %p5443_p4, 1, 0 }
  0x15   : > { %s6758_s28 = scalar_select %p5451_p6, 1, 0 }
  0x16   : > { %s131_s29 = sand.u32 1, %s5316_s17   ;;  %s4983_s30 = smul.u32 49152, %s5332_s21 }
  0x17   : > { %s4982_s3 = smul.u32 3072, %s131_s29  ;;  %s6759_s0 = sld [smem:[#allocation16_spill]] }
  0x18   : > { %p5465_p8 = pnand %p6743_p7, %p49_p5  ;;  %s5471_s23 = scalar_lea.sflag [#allocation3], %s131_s29 }
  0x19   : > { %s135_s8 = scalar_lea.vmem [#allocation2], %s4982_s3 }
  0x1a   : > { %s143_s15 = sshll.u32 %s135_s8, 4  ;;  %p5128_p10 = pneg %p5465_p8  ;;  %s5469_s15 = int_to_ptr.vmem [resolvable:$true] %s143_s15 }
  0x1d   : > { %s5461_s6 = scalar_lea.hbm %s6759_s0, %s4983_s30  ;;  %s5131_s25 = scalar_lea.hbm %s6759_s0, 98304 }
  0x1e   : > { %s5126_s4 = scalar_lea.hbm %s5461_s6, 49152  ;;  %p5132_p13 = scmp.lt.u32.totalorder %s5461_s6, %s6759_s0 }
  0x1f   : > { %p5127_p9 = scmp.ne.s32.totalorder %s5461_s6, %s5126_s4  ;;  %p5133_p0 = scmp.lt.u32.totalorder %s5131_s25, %s5126_s4 }
  0x20   : > { %p5135_p5 = scmp.lt.u32.totalorder %s5126_s4, %s5461_s6 }
  0x21   : > { %p5129_p11 = pnand %p5128_p10, %p5127_p9  ;;  %p5134_p2 = por %p5133_p0, %p5132_p13 }
  0x23   : > { %p5130_p12 = pneg %p5129_p11  ;;  %p5136_p7 = por %p5135_p5, %p5134_p2 }
  0x25   : > { %p5137_p1 = pnand %p5136_p7, %p5130_p12 }
  0x27   : > { %5140 = shalt.err (!%p5137_p1)
}
  0x28   : > { %s5141_s29 = scalar_lea.vmem %s5469_s15, 49152  ;;  %s5338_s3 = smov [#allocation2]  }
  0x29   : > { %p5142_p9 = scmp.ne.s32.totalorder %s5469_s15, %s5141_s29  ;;  %s5146_s8 = sshll.u32 %s5338_s3, 4  ;;  %s5147_s8 = int_to_ptr.vmem [resolvable:$false] %s5146_s8 }
  0x2a   : > { %s5148_s2 = scalar_lea.vmem %s5147_s8, 98304  ;;  %p5149_p4 = scmp.lt.s32.totalorder %s5469_s15, %s5147_s8 }
  0x2b   : > { %p5144_p11 = pnand %p5142_p9, %p5128_p10  ;;  %p5150_p13 = scmp.lt.s32.totalorder %s5148_s2, %s5141_s29 }
  0x2d   : > { %p5145_p6 = pneg %p5144_p11  ;;  %p5151_p0 = por %p5150_p13, %p5149_p4 }
  0x2f   : > { %p5152_p2 = pnand %p5151_p0, %p5145_p6 }
  0x31   : > { %5155 = shalt.err (!%p5152_p2)
}
  0x32   : > { %s5339_s24 = smov 768   ;;  %s5340_s25 = smov 48  }
  0x33   : > { %4996 = dma.hbm_to_vmem [thread:$0]  (!%p5465_p8), %s5461_s6, 49152, %s5469_s15, %s5471_s23, %s5339_s24, %s5339_s24, %s5340_s25  }
  0x34   : > { %p4075_p1 = scmp.ge.s32.totalorder %s5336_s22, 1  ;;  %p172_p4 = scmp.lt.s32.totalorder %s5336_s22, 5 }
  0x35   : > { %s4067_s30 = sadd.s32 4294967294, %s5336_s22   ;;  %s30_s5 = sadd.s32 1, %s5328_s20 }
  0x36   : > { %p5501_p6 = pnand %p4075_p1, %p172_p4  ;;  %s66_s29 = sadd.s32 1, %s5304_s14 }
  0x37   : > { %p31_p7 = scmp.ge.s32.totalorder %s30_s5, 2  ;;  %p73_p10 = scmp.ne.s32.totalorder %s5304_s14, %s5300_s13 }
  0x38   : > { %p79_p12 = scmp.ne.s32.totalorder %s5300_s13, %s5296_s12  ;;  %s94_s7 = sadd.s32 1, %s5292_s11 }
  0x39   : > { %s6799_s5 = smov (%p31_p7, %s30_s5), 0  ;;  %s6763_s6 = sadd.s32 1, %s5332_s21 }
  0x3a   : > { %6762 = sst [smem:[#allocation12_spill]] %s6799_s5  ;;  %s6801_s6 = smov (!%p31_p7, %s6763_s6), %s5332_s21 }
  0x3b   : > { %s63_s15 = ssub.s32 %s5328_s20, %s6799_s5  ;;  %p6764_p8 = scmp.eq.s32.totalorder %s5336_s22, 0 }
  0x3c   : > { %p35_p9 = scmp.ge.s32.totalorder %s6801_s6, 2  ;;  %p64_p11 = scmp.eq.s32.totalorder %s63_s15, 0 }
  0x3d   : > { %p5522_p5 = por %p73_p10, %p6764_p8  ;;  %p5528_p13 = por %p79_p12, %p5439_p3 }
  0x3e   : > { %p104_p0 = scmp.ne.s32.totalorder %s5292_s11, %s5288_s10  ;;  %s6803_s6 = smov (%p35_p9, %s6801_s6), 0 }
  0x3f   : > { %s6766_s12 = scalar_select %p5528_p13, 1, 0 }
  0x40   : > { %6767 = sst [smem:[#allocation13_spill]] %s6803_s6  ;;  %s37_s8 = ssub.s32 %s5332_s21, %s6803_s6 }
  0x41   : > { %s5537_s3 = scalar_select %p64_p11, %s5304_s14, %s66_s29  }
  0x42   : > { %p6769_p2 = scmp.ne.s32.totalorder %s6757_s27, 0  ;;  %p38_p4 = scmp.eq.s32.totalorder %s37_s8, 0 }
  0x43   : > { %6768 = sst [smem:[#allocation14_spill]] %s5537_s3  ;;  %s91_s26 = sor.u32 %s63_s15, %s37_s8 }
  0x44   : > { %p5543_p1 = por %p6769_p2, %p104_p0  ;;  %p92_p3 = scmp.eq.s32.totalorder %s91_s26, 0 }
  0x45   : > { %p110_p7 = scmp.ne.s32.totalorder %s5288_s10, %s5284_s9  ;;  %s6772_s24 = sadd.s32 1, %s5316_s17 }
  0x46   : > { %s6770_s2 = scalar_select %p5543_p1, 1, 0 }
  0x47   : > { %s5552_s25 = scalar_select %p38_p4, %s5316_s17, %s6772_s24  }
  0x48   : > { %6771 = sst [smem:[#allocation15_spill]] %s6770_s2  ;;  %p111_p10 = scmp.eq.s32.totalorder %s4067_s30, 3 }
  0x49   : > { %s5555_s0 = scalar_select %p92_p3, %s5292_s11, %s94_s7  }
  0x4a   : > { %s153_s29 = sand.u32 1, %s5304_s14   ;;  %p5558_p12 = por %p111_p10, %p110_p7 }
  0x4b   : > { %s4984_s5 = smul.u32 3072, %s153_s29  ;;  %s4084_s6 = sshll.u32 %s5328_s20, 9 }
  0x4c   : > { %s6773_s27 = scalar_select %p5558_p12, 1, 0 }
  0x4d   : > { %s5566_s2 = scalar_lea.hbm %s6740_s1, %s4084_s6  ;;  %s157_s15 = scalar_lea.vmem [#allocation5], %s4984_s5 }
  0x4e   : > { %s164_s7 = sshll.u32 %s157_s15, 4  ;;  %p6774_p8 = scmp.lt.s32.totalorder %s5336_s22, 4  ;;  %s5576_s7 = int_to_ptr.vmem [resolvable:$true] %s164_s7 }
  0x4f   : > { %s5578_s8 = scalar_lea.sflag [#allocation6], %s153_s29  ;;  %s5156_s21 = scalar_lea.hbm %s5566_s2, 49152 }
  0x50   : > { %p5572_p9 = pnand %p6774_p8, %p5522_p5  ;;  %p5157_p11 = scmp.ne.s32.totalorder %s5566_s2, %s5156_s21 }
  0x51   : > { %s5161_s23 = scalar_lea.hbm %s6740_s1, 98304  ;;  %p5162_p5 = scmp.lt.u32.totalorder %s5566_s2, %s6740_s1 }
  0x52   : > { %p5158_p0 = pneg %p5572_p9  ;;  %p5163_p3 = scmp.lt.u32.totalorder %s5161_s23, %s5156_s21 }
  0x53   : > { %p5165_p10 = scmp.lt.u32.totalorder %s5156_s21, %s5566_s2 }
  0x54   : > { %p5159_p2 = pnand %p5158_p0, %p5157_p11  ;;  %p5164_p7 = por %p5163_p3, %p5162_p5 }
  0x56   : > { %p5160_p4 = pneg %p5159_p2  ;;  %p5166_p8 = por %p5165_p10, %p5164_p7 }
  0x58   : > { %p5167_p12 = pnand %p5166_p8, %p5160_p4 }
  0x5a   : > { %5170 = shalt.err (!%p5167_p12)
}
  0x5b   : > { %s5171_s24 = scalar_lea.vmem %s5576_s7, 49152  ;;  %s5341_s29 = smov [#allocation5]  }
  0x5c   : > { %p5172_p11 = scmp.ne.s32.totalorder %s5576_s7, %s5171_s24  ;;  %s5176_s15 = sshll.u32 %s5341_s29, 4  ;;  %s5177_s15 = int_to_ptr.vmem [resolvable:$false] %s5176_s15 }
  0x5d   : > { %s5178_s5 = scalar_lea.vmem %s5177_s15, 98304  ;;  %p5179_p13 = scmp.lt.s32.totalorder %s5576_s7, %s5177_s15 }
  0x5e   : > { %p5174_p2 = pnand %p5172_p11, %p5158_p0  ;;  %p5180_p5 = scmp.lt.s32.totalorder %s5178_s5, %s5171_s24 }
  0x60   : > { %p5175_p1 = pneg %p5174_p2  ;;  %p5181_p3 = por %p5180_p5, %p5179_p13 }
  0x62   : > { %p5182_p7 = pnand %p5181_p3, %p5175_p1 }
  0x64   : > { %5185 = shalt.err (!%p5182_p7)
}
  0x65   : > { %s5342_s21 = smov 1024   ;;  %s5343_s6 = smov 512  }
  0x66   : > { %s5344_s23 = smov 32   ;;  %176 = sbr.rel (%p5501_p6) target bundleno = 1177 (0x499), region = 28 }
  0x67   : > { %4999 = dma.hbm_to_vmem [thread:$0]  (!%p5572_p9), %s5566_s2, 49152, %s5576_s7, %s5578_s8, %s5342_s21, %s5343_s6, %s5344_s23  }
  0x68   : > { %s178_s3 = sand.u32 (!%p5501_p6), 1, %s5312_s16   ;;  %p6776_p13 = scmp.ne.s32.totalorder (!%p5501_p6), %s6758_s28, 0 }
  0x69   : > { %s4985_s26 = smul.u32 (!%p5501_p6), 3072, %s178_s3  ;;  %s179_s24 = scalar_lea.sflag (!%p5501_p6), [#allocation3], %s178_s3 }
  0x6b   : > { %s5609_s29 = scalar_lea.vmem (!%p5501_p6), [#allocation2], %s4985_s26 }
  0x6d   : > { %5271 = dma.done.wait (%p6776_p13), %s179_s24, 49152  }
  0x6e   : > { %5273 = vsyncadd (%p6776_p13), %s179_s24, 4294918144  ;;  %s187_s15 = sand.u32 1, %s5300_s13   ;;  %p6777_p6 = scmp.ne.s32.totalorder %s6766_s12, 0 }
  0x6f   : > { %s4986_s30 = smul.u32 3072, %s187_s15  ;;  %s188_s2 = scalar_lea.sflag [#allocation6], %s187_s15 }
  0x71   : > { %s5616_s7 = scalar_lea.vmem [#allocation5], %s4986_s30 }
  0x72   : > { %5275 = dma.done.wait (%p6777_p6), %s188_s2, 49152  }
  0x73   : > { %5277 = vsyncadd (%p6777_p6), %s188_s2, 4294918144  ;;  %v606_v0 = vld [vmem:[%s5616_s7 + $0x8] sm:$0xff]  ;;  %v608_v2 = vld [vmem:[%s5616_s7 + $0x18] sm:$0xff]  ;;  %s214_s28 = sand.u32 1, %s5288_s10   ;;  %s4079_s8 = sshll.u32 %s5320_s18, 2 }
  0x74   : > { %v610_v1 = vld [vmem:[%s5616_s7 + $0x28] sm:$0xff]  ;;  %v612_v4 = vld [vmem:[%s5616_s7 + $0x38] sm:$0xff]  ;;  %v605_v5 = vld [vmem:[%s5616_s7] sm:$0xff]  ;;  %s4076_s4 = sshll.u32 %s214_s28, 11  ;;  %s4085_s5 = sshll.u32 %s5324_s19, 9 }
  0x75   : > { %v4086_v3 = vpack.c.bf16 %v610_v1, %v606_v0  ;;  %v609_v6 = vld [vmem:[%s5616_s7 + $0x20] sm:$0xff]  ;;  %v4278_v7 = vpack.c.bf16 %v612_v4, %v608_v2  ;;  %v607_v9 = vld [vmem:[%s5616_s7 + $0x10] sm:$0xff]  ;;  %v614_v11 = vld [vmem:[%s5616_s7 + $0x48] sm:$0xff]  ;;  %s6374_s12 = scalar_lea.vmem [#allocation7], %s4076_s4  ;;  %s3953_s21 = sadd.s32 %s4085_s5, %s4079_s8 }
  0x76   : > { %v4088_v8 = vpack.c.bf16 %v609_v6, %v605_v5  ;;  %v611_v10 = vld [vmem:[%s5616_s7 + $0x30] sm:$0xff]  ;;  %v618_v13 = vld [vmem:[%s5616_s7 + $0x68] sm:$0xff]  ;;  %v616_v14 = vld [vmem:[%s5616_s7 + $0x58] sm:$0xff]  ;;  %s4081_s6 = sshll.u32 %s3953_s21, 7  ;;  %s3956_s18 = sshll.u32 %s6374_s12, 4  ;;  %s6655_s18 = int_to_ptr.vmem [resolvable:$true] %s3956_s18 }
  0x77   : > { %4087 = vmatprep.subr.bf16.mxu0 %v4086_v3  ;;  %v4280_v12 = vpack.c.bf16 %v611_v10, %v607_v9  ;;  %v620_v15 = vld [vmem:[%s5616_s7 + $0x78] sm:$0xff]  ;;  %4279 = vmatprep.subr.bf16.mxu1 %v4278_v7  ;;  %v4090_v16 = vpack.c.bf16 %v618_v13, %v614_v11  ;;  %v613_v18 = vld [vmem:[%s5616_s7 + $0x40] sm:$0xff]  ;;  %v615_v20 = vld [vmem:[%s5616_s7 + $0x50] sm:$0xff]  ;;  %s6778_s19 = sld [smem:[#allocation15_spill]]  ;;  %s6779_s26 = sld [smem:[#allocation17_spill]] }
  0x78   : > { %4089 = vmatpush1.bf16.msra.mxu0 %v4088_v8  ;;  %v4282_v17 = vpack.c.bf16 %v620_v15, %v616_v14  ;;  %v617_v19 = vld [vmem:[%s5616_s7 + $0x60] sm:$0xff]  ;;  %v619_v22 = vld [vmem:[%s5616_s7 + $0x70] sm:$0xff]  ;;  %v622_v23 = vld [vmem:[%s5616_s7 + $0x88] sm:$0xff]  ;;  %s5186_s15 = scalar_lea.vmem %s6655_s18, 32768  ;;  %s5345_s30 = smov [#allocation7]  }
  0x79   : > { %4281 = vmatpush1.bf16.msra.mxu1 %v4280_v12  ;;  %v4092_v21 = vpack.c.bf16 %v617_v19, %v613_v18  ;;  %v626_v24 = vld [vmem:[%s5616_s7 + $0xa8] sm:$0xff]  ;;  %4091 = vmatprep.subr.bf16.mxu0 %v4090_v16  ;;  %v4284_v25 = vpack.c.bf16 %v619_v22, %v615_v20  ;;  %v624_v27 = vld [vmem:[%s5616_s7 + $0x98] sm:$0xff]  ;;  %v621_v29 = vld [vmem:[%s5616_s7 + $0x80] sm:$0xff]  ;;  %p5187_p1 = scmp.ne.s32.totalorder %s6655_s18, %s5186_s15  ;;  %s5190_s2 = sshll.u32 %s5345_s30, 4  ;;  %s5191_s2 = int_to_ptr.vmem [resolvable:$false] %s5190_s2 }
  0x7a   : > { %4283 = vmatprep.subr.bf16.mxu1 %v4282_v17  ;;  %v4094_v26 = vpack.c.bf16 %v626_v24, %v622_v23  ;;  %v628_v28 = vld [vmem:[%s5616_s7 + $0xb8] sm:$0xff]  ;;  %v625_v31 = vld [vmem:[%s5616_s7 + $0xa0] sm:$0xff]  ;;  %v623_v32 = vld [vmem:[%s5616_s7 + $0x90] sm:$0xff]  ;;  %p5193_p4 = scmp.lt.s32.totalorder %s6655_s18, %s5191_s2 }
  0x7b   : > { %v4286_v30 = vpack.c.bf16 %v628_v28, %v624_v27  ;;  %v627_v33 = vld [vmem:[%s5616_s7 + $0xb0] sm:$0xff]  ;;  %v4096_v34 = vpack.c.bf16 %v625_v31, %v621_v29  ;;  %v630_v35 = vld [vmem:[%s5616_s7 + $0xc8] sm:$0xff]  ;;  %v632_v37 = vld [vmem:[%s5616_s7 + $0xd8] sm:$0xff] }
  0x7c   : > { %4093 = vmatpush1.bf16.msra.mxu0 %v4092_v21  ;;  %v634_v36 = vld [vmem:[%s5616_s7 + $0xe8] sm:$0xff]  ;;  %v4288_v38 = vpack.c.bf16 %v627_v33, %v623_v32  ;;  %v636_v40 = vld [vmem:[%s5616_s7 + $0xf8] sm:$0xff]  ;;  %v629_v41 = vld [vmem:[%s5616_s7 + $0xc0] sm:$0xff] }
  0x7d   : > { %4285 = vmatpush1.bf16.msra.mxu1 %v4284_v25  ;;  %4095 = vmatprep.subr.bf16.mxu0 %v4094_v26  ;;  %v4098_v39 = vpack.c.bf16 %v634_v36, %v630_v35  ;;  %v633_v42 = vld [vmem:[%s5616_s7 + $0xe0] sm:$0xff]  ;;  %v4290_v43 = vpack.c.bf16 %v636_v40, %v632_v37  ;;  %v631_v44 = vld [vmem:[%s5616_s7 + $0xd0] sm:$0xff]  ;;  %v638_v46 = vld [vmem:[%s5616_s7 + $0x108] sm:$0xff]  ;;  %s6653_s24 = scalar_lea.hbm %s6779_s26, %s4081_s6  ;;  %p6780_p12 = scmp.ne.s32.totalorder %s6778_s19, 0 }
  0x7e   : > { %4287 = vmatprep.subr.bf16.mxu1 %v4286_v30  ;;  %v635_v45 = vld [vmem:[%s5616_s7 + $0xf0] sm:$0xff]  ;;  %v642_v47 = vld [vmem:[%s5616_s7 + $0x128] sm:$0xff]  ;;  %v640_v48 = vld [vmem:[%s5616_s7 + $0x118] sm:$0xff]  ;;  %v4100_v50 = vpack.c.bf16 %v633_v42, %v629_v41 }
  0x7f   : > { %v644_v49 = vld [vmem:[%s5616_s7 + $0x138] sm:$0xff]  ;;  %v4292_v51 = vpack.c.bf16 %v635_v45, %v631_v44  ;;  %v4102_v52 = vpack.c.bf16 %v642_v47, %v638_v46  ;;  %v637_v53 = vld [vmem:[%s5616_s7 + $0x100] sm:$0xff]  ;;  %v639_v55 = vld [vmem:[%s5616_s7 + $0x110] sm:$0xff]  ;;  %p5188_p9 = pnand %p5187_p1, %p6780_p12 }
  0x80   : > { %4097 = vmatpush1.bf16.msra.mxu0 %v4096_v34  ;;  %v641_v54 = vld [vmem:[%s5616_s7 + $0x120] sm:$0xff]  ;;  %v4294_v56 = vpack.c.bf16 %v644_v49, %v640_v48  ;;  %v643_v57 = vld [vmem:[%s5616_s7 + $0x130] sm:$0xff]  ;;  %v646_v58 = vld [vmem:[%s5616_s7 + $0x148] sm:$0xff] }
  0x81   : > { %4289 = vmatpush1.bf16.msra.mxu1 %v4288_v38  ;;  %4099 = vmatprep.subr.bf16.mxu0 %v4098_v39  ;;  %v650_v59 = vld [vmem:[%s5616_s7 + $0x168] sm:$0xff]  ;;  %v648_v60 = vld [vmem:[%s5616_s7 + $0x158] sm:$0xff]  ;;  %v4104_v62 = vpack.c.bf16 %v641_v54, %v637_v53  ;;  %v4296_v63 = vpack.c.bf16 %v643_v57, %v639_v55  ;;  %v645_v1 = vld [vmem:[%s5616_s7 + $0x140] sm:$0xff]  ;;  %p5189_p0 = pneg %p5188_p9 }
  0x82   : > { %4291 = vmatprep.subr.bf16.mxu1 %v4290_v43  ;;  %v652_v61 = vld [vmem:[%s5616_s7 + $0x178] sm:$0xff]  ;;  %v4106_v0 = vpack.c.bf16 %v650_v59, %v646_v58  ;;  %v649_v2 = vld [vmem:[%s5616_s7 + $0x160] sm:$0xff]  ;;  %v647_v3 = vld [vmem:[%s5616_s7 + $0x150] sm:$0xff] }
  0x83   : > { %v4298_v4 = vpack.c.bf16 %v652_v61, %v648_v60  ;;  %v651_v5 = vld [vmem:[%s5616_s7 + $0x170] sm:$0xff]  ;;  %v654_v6 = vld [vmem:[%s5616_s7 + $0x188] sm:$0xff]  ;;  %v656_v8 = vld [vmem:[%s5616_s7 + $0x198] sm:$0xff]  ;;  %v4108_v10 = vpack.c.bf16 %v649_v2, %v645_v1 }
  0x84   : > { %4101 = vmatpush1.bf16.msra.mxu0 %v4100_v50  ;;  %v658_v7 = vld [vmem:[%s5616_s7 + $0x1a8] sm:$0xff]  ;;  %v660_v9 = vld [vmem:[%s5616_s7 + $0x1b8] sm:$0xff]  ;;  %v4300_v11 = vpack.c.bf16 %v651_v5, %v647_v3  ;;  %v653_v13 = vld [vmem:[%s5616_s7 + $0x180] sm:$0xff] }
  0x85   : > { %4293 = vmatpush1.bf16.msra.mxu1 %v4292_v51  ;;  %4103 = vmatprep.subr.bf16.mxu0 %v4102_v52  ;;  %v4110_v12 = vpack.c.bf16 %v658_v7, %v654_v6  ;;  %v657_v14 = vld [vmem:[%s5616_s7 + $0x1a0] sm:$0xff]  ;;  %v655_v15 = vld [vmem:[%s5616_s7 + $0x190] sm:$0xff]  ;;  %v4302_v16 = vpack.c.bf16 %v660_v9, %v656_v8  ;;  %v662_v18 = vld [vmem:[%s5616_s7 + $0x1c8] sm:$0xff] }
  0x86   : > { %4295 = vmatprep.subr.bf16.mxu1 %v4294_v56  ;;  %v659_v17 = vld [vmem:[%s5616_s7 + $0x1b0] sm:$0xff]  ;;  %v666_v19 = vld [vmem:[%s5616_s7 + $0x1e8] sm:$0xff]  ;;  %v664_v20 = vld [vmem:[%s5616_s7 + $0x1d8] sm:$0xff]  ;;  %v4112_v22 = vpack.c.bf16 %v657_v14, %v653_v13 }
  0x87   : > { %v668_v21 = vld [vmem:[%s5616_s7 + $0x1f8] sm:$0xff]  ;;  %v4304_v23 = vpack.c.bf16 %v659_v17, %v655_v15  ;;  %v4114_v24 = vpack.c.bf16 %v666_v19, %v662_v18  ;;  %v661_v25 = vld [vmem:[%s5616_s7 + $0x1c0] sm:$0xff]  ;;  %v663_v27 = vld [vmem:[%s5616_s7 + $0x1d0] sm:$0xff] }
  0x88   : > { %4105 = vmatpush1.bf16.msra.mxu0 %v4104_v62  ;;  %v665_v26 = vld [vmem:[%s5616_s7 + $0x1e0] sm:$0xff]  ;;  %v4306_v28 = vpack.c.bf16 %v668_v21, %v664_v20  ;;  %v667_v29 = vld [vmem:[%s5616_s7 + $0x1f0] sm:$0xff]  ;;  %v670_v30 = vld [vmem:[%s5616_s7 + $0x208] sm:$0xff] }
  0x89   : > { %4297 = vmatpush1.bf16.msra.mxu1 %v4296_v63  ;;  %4107 = vmatprep.subr.bf16.mxu0 %v4106_v0  ;;  %v674_v31 = vld [vmem:[%s5616_s7 + $0x228] sm:$0xff]  ;;  %v672_v32 = vld [vmem:[%s5616_s7 + $0x218] sm:$0xff]  ;;  %v4116_v34 = vpack.c.bf16 %v665_v26, %v661_v25  ;;  %v4308_v35 = vpack.c.bf16 %v667_v29, %v663_v27  ;;  %v669_v37 = vld [vmem:[%s5616_s7 + $0x200] sm:$0xff] }
  0x8a   : > { %4299 = vmatprep.subr.bf16.mxu1 %v4298_v4  ;;  %v676_v33 = vld [vmem:[%s5616_s7 + $0x238] sm:$0xff]  ;;  %v4118_v36 = vpack.c.bf16 %v674_v31, %v670_v30  ;;  %v673_v38 = vld [vmem:[%s5616_s7 + $0x220] sm:$0xff]  ;;  %v671_v39 = vld [vmem:[%s5616_s7 + $0x210] sm:$0xff] }
  0x8b   : > { %v4310_v40 = vpack.c.bf16 %v676_v33, %v672_v32  ;;  %v675_v41 = vld [vmem:[%s5616_s7 + $0x230] sm:$0xff]  ;;  %v678_v42 = vld [vmem:[%s5616_s7 + $0x248] sm:$0xff]  ;;  %v680_v44 = vld [vmem:[%s5616_s7 + $0x258] sm:$0xff]  ;;  %v4120_v46 = vpack.c.bf16 %v673_v38, %v669_v37 }
  0x8c   : > { %4109 = vmatpush1.bf16.msra.mxu0 %v4108_v10  ;;  %v682_v43 = vld [vmem:[%s5616_s7 + $0x268] sm:$0xff]  ;;  %v684_v45 = vld [vmem:[%s5616_s7 + $0x278] sm:$0xff]  ;;  %v4312_v47 = vpack.c.bf16 %v675_v41, %v671_v39  ;;  %v677_v49 = vld [vmem:[%s5616_s7 + $0x240] sm:$0xff] }
  0x8d   : > { %4301 = vmatpush1.bf16.msra.mxu1 %v4300_v11  ;;  %4111 = vmatprep.subr.bf16.mxu0 %v4110_v12  ;;  %v4122_v48 = vpack.c.bf16 %v682_v43, %v678_v42  ;;  %v681_v50 = vld [vmem:[%s5616_s7 + $0x260] sm:$0xff]  ;;  %v679_v51 = vld [vmem:[%s5616_s7 + $0x250] sm:$0xff]  ;;  %v4314_v52 = vpack.c.bf16 %v684_v45, %v680_v44  ;;  %v686_v54 = vld [vmem:[%s5616_s7 + $0x288] sm:$0xff] }
  0x8e   : > { %4303 = vmatprep.subr.bf16.mxu1 %v4302_v16  ;;  %v683_v53 = vld [vmem:[%s5616_s7 + $0x270] sm:$0xff]  ;;  %v690_v55 = vld [vmem:[%s5616_s7 + $0x2a8] sm:$0xff]  ;;  %v688_v56 = vld [vmem:[%s5616_s7 + $0x298] sm:$0xff]  ;;  %v4124_v58 = vpack.c.bf16 %v681_v50, %v677_v49 }
  0x8f   : > { %v692_v57 = vld [vmem:[%s5616_s7 + $0x2b8] sm:$0xff]  ;;  %v4316_v59 = vpack.c.bf16 %v683_v53, %v679_v51  ;;  %v4126_v60 = vpack.c.bf16 %v690_v55, %v686_v54  ;;  %v685_v61 = vld [vmem:[%s5616_s7 + $0x280] sm:$0xff]  ;;  %v687_v63 = vld [vmem:[%s5616_s7 + $0x290] sm:$0xff] }
  0x90   : > { %4113 = vmatpush1.bf16.msra.mxu0 %v4112_v22  ;;  %v689_v62 = vld [vmem:[%s5616_s7 + $0x2a0] sm:$0xff]  ;;  %v4318_v0 = vpack.c.bf16 %v692_v57, %v688_v56  ;;  %v691_v1 = vld [vmem:[%s5616_s7 + $0x2b0] sm:$0xff]  ;;  %v694_v2 = vld [vmem:[%s5616_s7 + $0x2c8] sm:$0xff] }
  0x91   : > { %4305 = vmatpush1.bf16.msra.mxu1 %v4304_v23  ;;  %4115 = vmatprep.subr.bf16.mxu0 %v4114_v24  ;;  %v698_v3 = vld [vmem:[%s5616_s7 + $0x2e8] sm:$0xff]  ;;  %v696_v4 = vld [vmem:[%s5616_s7 + $0x2d8] sm:$0xff]  ;;  %v4128_v6 = vpack.c.bf16 %v689_v62, %v685_v61  ;;  %v693_v7 = vld [vmem:[%s5616_s7 + $0x2c0] sm:$0xff]  ;;  %v4320_v8 = vpack.c.bf16 %v691_v1, %v687_v63 }
  0x92   : > { %4307 = vmatprep.subr.bf16.mxu1 %v4306_v28  ;;  %v700_v5 = vld [vmem:[%s5616_s7 + $0x2f8] sm:$0xff]  ;;  %v4130_v9 = vpack.c.bf16 %v698_v3, %v694_v2  ;;  %v697_v10 = vld [vmem:[%s5616_s7 + $0x2e0] sm:$0xff]  ;;  %v695_v11 = vld [vmem:[%s5616_s7 + $0x2d0] sm:$0xff] }
  0x93   : > { %v699_v12 = vld [vmem:[%s5616_s7 + $0x2f0] sm:$0xff]  ;;  %v4322_v13 = vpack.c.bf16 %v700_v5, %v696_v4  ;;  %v702_v14 = vld [vmem:[%s5616_s7 + $0x308] sm:$0xff]  ;;  %v704_v17 = vld [vmem:[%s5616_s7 + $0x318] sm:$0xff]  ;;  %v4132_v19 = vpack.c.bf16 %v697_v10, %v693_v7 }
  0x94   : > { %4117 = vmatpush1.bf16.msra.mxu0 %v4116_v34  ;;  %v706_v15 = vld [vmem:[%s5616_s7 + $0x328] sm:$0xff]  ;;  %v708_v18 = vld [vmem:[%s5616_s7 + $0x338] sm:$0xff]  ;;  %v4324_v20 = vpack.c.bf16 %v699_v12, %v695_v11  ;;  %v701_v22 = vld [vmem:[%s5616_s7 + $0x300] sm:$0xff] }
  0x95   : > { %4309 = vmatpush1.bf16.msra.mxu1 %v4308_v35  ;;  %4119 = vmatprep.subr.bf16.mxu0 %v4118_v36  ;;  %v222_v16 = vld [vmem:[%s5609_s29 + $0x8] sm:$0xff]  ;;  %v4134_v21 = vpack.c.bf16 %v706_v15, %v702_v14  ;;  %v705_v23 = vld [vmem:[%s5616_s7 + $0x320] sm:$0xff]  ;;  %v703_v24 = vld [vmem:[%s5616_s7 + $0x310] sm:$0xff]  ;;  %v4326_v25 = vpack.c.bf16 %v708_v18, %v704_v17 }
  0x96   : > { %4311 = vmatprep.subr.bf16.mxu1 %v4310_v40  ;;  %1053 = vmatprep.mubr.f32.mxu0 %v222_v16  ;;  %v707_v26 = vld [vmem:[%s5616_s7 + $0x330] sm:$0xff]  ;;  %v710_v27 = vld [vmem:[%s5616_s7 + $0x348] sm:$0xff]  ;;  %v712_v29 = vld [vmem:[%s5616_s7 + $0x358] sm:$0xff]  ;;  %v4136_v31 = vpack.c.bf16 %v705_v23, %v701_v22 }
  0x97   : > { %2400 = vmatprep.mubr.f32.mxu1 %v222_v16  ;;  %v714_v28 = vld [vmem:[%s5616_s7 + $0x368] sm:$0xff]  ;;  %v716_v30 = vld [vmem:[%s5616_s7 + $0x378] sm:$0xff]  ;;  %v4328_v32 = vpack.c.bf16 %v707_v26, %v703_v24  ;;  %v709_v34 = vld [vmem:[%s5616_s7 + $0x340] sm:$0xff] }
  0x98   : > { %4121 = vmatpush1.bf16.msra.mxu0 %v4120_v46  ;;  %v4138_v33 = vpack.c.bf16 %v714_v28, %v710_v27  ;;  %v713_v35 = vld [vmem:[%s5616_s7 + $0x360] sm:$0xff]  ;;  %v711_v36 = vld [vmem:[%s5616_s7 + $0x350] sm:$0xff]  ;;  %v4330_v37 = vpack.c.bf16 %v716_v30, %v712_v29  ;;  %v718_v39 = vld [vmem:[%s5616_s7 + $0x388] sm:$0xff] }
  0x99   : > { %4313 = vmatpush1.bf16.msra.mxu1 %v4312_v47  ;;  %4123 = vmatprep.subr.bf16.mxu0 %v4122_v48  ;;  %v715_v38 = vld [vmem:[%s5616_s7 + $0x370] sm:$0xff]  ;;  %v722_v40 = vld [vmem:[%s5616_s7 + $0x3a8] sm:$0xff]  ;;  %v720_v41 = vld [vmem:[%s5616_s7 + $0x398] sm:$0xff]  ;;  %v4140_v43 = vpack.c.bf16 %v713_v35, %v709_v34 }
  0x9a   : > { %4315 = vmatprep.subr.bf16.mxu1 %v4314_v52  ;;  %v724_v42 = vld [vmem:[%s5616_s7 + $0x3b8] sm:$0xff]  ;;  %v4332_v44 = vpack.c.bf16 %v715_v38, %v711_v36  ;;  %v4142_v45 = vpack.c.bf16 %v722_v40, %v718_v39  ;;  %v717_v46 = vld [vmem:[%s5616_s7 + $0x380] sm:$0xff]  ;;  %v719_v48 = vld [vmem:[%s5616_s7 + $0x390] sm:$0xff] }
  0x9b   : > { %v721_v47 = vld [vmem:[%s5616_s7 + $0x3a0] sm:$0xff]  ;;  %v4334_v49 = vpack.c.bf16 %v724_v42, %v720_v41  ;;  %v723_v50 = vld [vmem:[%s5616_s7 + $0x3b0] sm:$0xff]  ;;  %v726_v51 = vld [vmem:[%s5616_s7 + $0x3c8] sm:$0xff] }
  0x9c   : > { %4125 = vmatpush1.bf16.msra.mxu0 %v4124_v58  ;;  %v730_v52 = vld [vmem:[%s5616_s7 + $0x3e8] sm:$0xff]  ;;  %v728_v53 = vld [vmem:[%s5616_s7 + $0x3d8] sm:$0xff]  ;;  %v4144_v55 = vpack.c.bf16 %v721_v47, %v717_v46  ;;  %v4336_v56 = vpack.c.bf16 %v723_v50, %v719_v48  ;;  %v725_v58 = vld [vmem:[%s5616_s7 + $0x3c0] sm:$0xff] }
  0x9d   : > { %4317 = vmatpush1.bf16.msra.mxu1 %v4316_v59  ;;  %4127 = vmatprep.subr.bf16.mxu0 %v4126_v60  ;;  %v732_v54 = vld [vmem:[%s5616_s7 + $0x3f8] sm:$0xff]  ;;  %v4146_v57 = vpack.c.bf16 %v730_v52, %v726_v51  ;;  %v729_v59 = vld [vmem:[%s5616_s7 + $0x3e0] sm:$0xff]  ;;  %v727_v60 = vld [vmem:[%s5616_s7 + $0x3d0] sm:$0xff] }
  0x9e   : > { %4319 = vmatprep.subr.bf16.mxu1 %v4318_v0  ;;  %v4338_v61 = vpack.c.bf16 %v732_v54, %v728_v53  ;;  %v731_v62 = vld [vmem:[%s5616_s7 + $0x3f0] sm:$0xff]  ;;  %v734_v63 = vld [vmem:[%s5616_s7 + $0x408] sm:$0xff]  ;;  %v736_v1 = vld [vmem:[%s5616_s7 + $0x418] sm:$0xff]  ;;  %v4148_v3 = vpack.c.bf16 %v729_v59, %v725_v58 }
  0x9f   : > { %v738_v0 = vld [vmem:[%s5616_s7 + $0x428] sm:$0xff]  ;;  %v740_v2 = vld [vmem:[%s5616_s7 + $0x438] sm:$0xff]  ;;  %v4340_v4 = vpack.c.bf16 %v731_v62, %v727_v60  ;;  %v737_v7 = vld [vmem:[%s5616_s7 + $0x420] sm:$0xff] }
  0xa0   : > { %4129 = vmatpush1.bf16.msra.mxu0 %v4128_v6  ;;  %v4150_v5 = vpack.c.bf16 %v738_v0, %v734_v63  ;;  %v733_v6 = vld [vmem:[%s5616_s7 + $0x400] sm:$0xff]  ;;  %v739_v10 = vld [vmem:[%s5616_s7 + $0x430] sm:$0xff]  ;;  %v742_v11 = vld [vmem:[%s5616_s7 + $0x448] sm:$0xff] }
  0xa1   : > { %4321 = vmatpush1.bf16.msra.mxu1 %v4320_v8  ;;  %4131 = vmatprep.subr.bf16.mxu0 %v4130_v9  ;;  %v4342_v8 = vpack.c.bf16 %v740_v2, %v736_v1  ;;  %v735_v9 = vld [vmem:[%s5616_s7 + $0x410] sm:$0xff]  ;;  %v746_v12 = vld [vmem:[%s5616_s7 + $0x468] sm:$0xff]  ;;  %v4152_v14 = vpack.c.bf16 %v737_v7, %v733_v6  ;;  %v744_v15 = vld [vmem:[%s5616_s7 + $0x458] sm:$0xff] }
  0xa2   : > { %4323 = vmatprep.subr.bf16.mxu1 %v4322_v13  ;;  %v221_v13 = vld [vmem:[%s5609_s29] sm:$0xff]  ;;  %v748_v16 = vld [vmem:[%s5616_s7 + $0x478] sm:$0xff]  ;;  %v4344_v17 = vpack.c.bf16 %v739_v10, %v735_v9  ;;  %v743_v22 = vld [vmem:[%s5616_s7 + $0x450] sm:$0xff] }
  0xa3   : > { %v228_v18 = vld [vmem:[%s5609_s29 + $0x38] sm:$0xff]  ;;  %v4346_v23 = vpack.c.bf16 %v748_v16, %v744_v15  ;;  %v747_v24 = vld [vmem:[%s5616_s7 + $0x470] sm:$0xff]  ;;  %v754_v26 = vld [vmem:[%s5616_s7 + $0x4a8] sm:$0xff] }
  0xa4   : > { %4133 = vmatpush1.bf16.msra.mxu0 %v4132_v19  ;;  %v4154_v19 = vpack.c.bf16 %v746_v12, %v742_v11  ;;  %v227_v27 = vld [vmem:[%s5609_s29 + $0x30] sm:$0xff]  ;;  %v752_v28 = vld [vmem:[%s5616_s7 + $0x498] sm:$0xff]  ;;  %v234_v30 = vld [vmem:[%s5609_s29 + $0x68] sm:$0xff] }
  0xa5   : > { %4325 = vmatpush1.bf16.msra.mxu1 %v4324_v20  ;;  %4135 = vmatprep.subr.bf16.mxu0 %v4134_v21  ;;  %v741_v20 = vld [vmem:[%s5616_s7 + $0x440] sm:$0xff]  ;;  %v756_v29 = vld [vmem:[%s5616_s7 + $0x4b8] sm:$0xff]  ;;  %v751_v36 = vld [vmem:[%s5616_s7 + $0x490] sm:$0xff] }
  0xa6   : > { %4327 = vmatprep.subr.bf16.mxu1 %v4326_v25  ;;  %v745_v21 = vld [vmem:[%s5616_s7 + $0x460] sm:$0xff]  ;;  %v750_v25 = vld [vmem:[%s5616_s7 + $0x488] sm:$0xff]  ;;  %v755_v38 = vld [vmem:[%s5616_s7 + $0x4b0] sm:$0xff] }
  0xa7   : > { %v749_v34 = vld [vmem:[%s5616_s7 + $0x480] sm:$0xff]  ;;  %v758_v39 = vld [vmem:[%s5616_s7 + $0x4c8] sm:$0xff]  ;;  %v760_v42 = vld [vmem:[%s5616_s7 + $0x4d8] sm:$0xff]  ;;  %v4352_v46 = vpack.c.bf16 %v755_v38, %v751_v36 }
  0xa8   : > { %4137 = vmatpush1.bf16.msra.mxu0 %v4136_v31  ;;  %v4156_v31 = vpack.c.bf16 %v745_v21, %v741_v20  ;;  %v753_v35 = vld [vmem:[%s5616_s7 + $0x4a0] sm:$0xff]  ;;  %v762_v40 = vld [vmem:[%s5616_s7 + $0x4e8] sm:$0xff]  ;;  %v759_v50 = vld [vmem:[%s5616_s7 + $0x4d0] sm:$0xff] }
  0xa9   : > { %4329 = vmatpush1.bf16.msra.mxu1 %v4328_v32  ;;  %4139 = vmatprep.subr.bf16.mxu0 %v4138_v33  ;;  %v4348_v32 = vpack.c.bf16 %v747_v24, %v743_v22  ;;  %v4158_v33 = vpack.c.bf16 %v754_v26, %v750_v25  ;;  %v233_v41 = vld [vmem:[%s5609_s29 + $0x60] sm:$0xff]  ;;  %v4162_v47 = vpack.c.bf16 %v762_v40, %v758_v39  ;;  %v763_v52 = vld [vmem:[%s5616_s7 + $0x4f0] sm:$0xff]  ;;  %v766_v53 = vld [vmem:[%s5616_s7 + $0x508] sm:$0xff] }
  0xaa   : > { %4331 = vmatprep.subr.bf16.mxu1 %v4330_v37  ;;  %v4350_v37 = vpack.c.bf16 %v756_v29, %v752_v28  ;;  %v757_v48 = vld [vmem:[%s5616_s7 + $0x4c0] sm:$0xff]  ;;  %v770_v54 = vld [vmem:[%s5616_s7 + $0x528] sm:$0xff]  ;;  %v4356_v60 = vpack.c.bf16 %v763_v52, %v759_v50  ;;  %v767_v0 = vld [vmem:[%s5616_s7 + $0x510] sm:$0xff] }
  0xab   : > { %v246_v58 = vld [vmem:[%s5609_s29 + $0xc8] sm:$0xff]  ;;  %v765_v62 = vld [vmem:[%s5616_s7 + $0x500] sm:$0xff]  ;;  %v771_v2 = vld [vmem:[%s5616_s7 + $0x530] sm:$0xff] }
  0xac   : > { %4141 = vmatpush1.bf16.msra.mxu0 %v4140_v43  ;;  %v764_v43 = vld [vmem:[%s5616_s7 + $0x4f8] sm:$0xff]  ;;  %v769_v63 = vld [vmem:[%s5616_s7 + $0x520] sm:$0xff]  ;;  %v4360_v10 = vpack.c.bf16 %v771_v2, %v767_v0  ;;  %v779_v16 = vld [vmem:[%s5616_s7 + $0x570] sm:$0xff] }
  0xad   : > { %4333 = vmatpush1.bf16.msra.mxu1 %v4332_v44  ;;  %4143 = vmatprep.subr.bf16.mxu0 %v4142_v45  ;;  %v240_v44 = vld [vmem:[%s5609_s29 + $0x98] sm:$0xff]  ;;  %v4160_v45 = vpack.c.bf16 %v753_v35, %v749_v34  ;;  %v4354_v51 = vpack.c.bf16 %v764_v43, %v760_v42  ;;  %v4168_v9 = vpack.c.bf16 %v769_v63, %v765_v62  ;;  %v773_v12 = vld [vmem:[%s5616_s7 + $0x540] sm:$0xff]  ;;  %v258_v22 = vld [vmem:[%s5609_s29 + $0x128] sm:$0xff] }
  0xae   : > { %4335 = vmatprep.subr.bf16.mxu1 %v4334_v49  ;;  %v761_v49 = vld [vmem:[%s5616_s7 + $0x4e0] sm:$0xff]  ;;  %v776_v6 = vld [vmem:[%s5616_s7 + $0x558] sm:$0xff]  ;;  %v783_v28 = vld [vmem:[%s5616_s7 + $0x590] sm:$0xff] }
  0xaf   : > { %v4164_v59 = vpack.c.bf16 %v761_v49, %v757_v48  ;;  %v780_v7 = vld [vmem:[%s5616_s7 + $0x578] sm:$0xff]  ;;  %v781_v26 = vld [vmem:[%s5616_s7 + $0x580] sm:$0xff]  ;;  %v791_v42 = vld [vmem:[%s5616_s7 + $0x5d0] sm:$0xff] }
  0xb0   : > { %4145 = vmatpush1.bf16.msra.mxu0 %v4144_v55  ;;  %v239_v55 = vld [vmem:[%s5609_s29 + $0x90] sm:$0xff]  ;;  %v4362_v15 = vpack.c.bf16 %v780_v7, %v776_v6  ;;  %v784_v20 = vld [vmem:[%s5616_s7 + $0x598] sm:$0xff]  ;;  %v789_v40 = vld [vmem:[%s5616_s7 + $0x5c0] sm:$0xff] }
  0xb1   : > { %4337 = vmatpush1.bf16.msra.mxu1 %v4336_v56  ;;  %4147 = vmatprep.subr.bf16.mxu0 %v4146_v57  ;;  %v768_v56 = vld [vmem:[%s5616_s7 + $0x518] sm:$0xff]  ;;  %v270_v50 = vld [vmem:[%s5609_s29 + $0x188] sm:$0xff]  ;;  %v807_v6 = vld [vmem:[%s5616_s7 + $0x650] sm:$0xff] }
  0xb2   : > { %4339 = vmatprep.subr.bf16.mxu1 %v4338_v61  ;;  %v772_v57 = vld [vmem:[%s5616_s7 + $0x538] sm:$0xff]  ;;  %v4166_v61 = vpack.c.bf16 %v770_v54, %v766_v53  ;;  %v797_v54 = vld [vmem:[%s5616_s7 + $0x600] sm:$0xff] }
  0xb3   : > { %v4358_v1 = vpack.c.bf16 %v772_v57, %v768_v56  ;;  %v788_v21 = vld [vmem:[%s5616_s7 + $0x5b8] sm:$0xff]  ;;  %v799_v56 = vld [vmem:[%s5616_s7 + $0x610] sm:$0xff] }
  0xb4   : > { %4149 = vmatpush1.bf16.msra.mxu0 %v4148_v3  ;;  %v774_v3 = vld [vmem:[%s5616_s7 + $0x548] sm:$0xff]  ;;  %v4366_v29 = vpack.c.bf16 %v788_v21, %v784_v20  ;;  %v792_v34 = vld [vmem:[%s5616_s7 + $0x5d8] sm:$0xff]  ;;  %v815_v21 = vld [vmem:[%s5616_s7 + $0x690] sm:$0xff] }
  0xb5   : > { %4341 = vmatpush1.bf16.msra.mxu1 %v4340_v4  ;;  %4151 = vmatprep.subr.bf16.mxu0 %v4150_v5  ;;  %v778_v4 = vld [vmem:[%s5616_s7 + $0x568] sm:$0xff]  ;;  %v245_v5 = vld [vmem:[%s5609_s29 + $0xc0] sm:$0xff]  ;;  %v796_v35 = vld [vmem:[%s5616_s7 + $0x5f8] sm:$0xff] }
  0xb6   : > { %4343 = vmatprep.subr.bf16.mxu1 %v4342_v8  ;;  %v252_v8 = vld [vmem:[%s5609_s29 + $0xf8] sm:$0xff]  ;;  %v4170_v11 = vpack.c.bf16 %v778_v4, %v774_v3  ;;  %v4370_v43 = vpack.c.bf16 %v796_v35, %v792_v34  ;;  %v805_v4 = vld [vmem:[%s5616_s7 + $0x640] sm:$0xff]  ;;  %v826_v34 = vld [vmem:[%s5616_s7 + $0x6e8] sm:$0xff] }
  0xb7   : > { %1054 = vmatmul.mubr.f32.vlgmr.msra.gmra.mrb[0].mxu0 %v221_v13  ;;  %v264_v36 = vld [vmem:[%s5609_s29 + $0x158] sm:$0xff] }
  0xb8   : > { %2401 = vmatmul.mubr.f32.vlgmr.msra.gmra.mrb[0].mxu1 %v221_v13  ;;  %4153 = vmatpush1.bf16.msra.mxu0 %v4152_v14  ;;  %v777_v13 = vld [vmem:[%s5616_s7 + $0x560] sm:$0xff]  ;;  %v775_v14 = vld [vmem:[%s5616_s7 + $0x550] sm:$0xff]  ;;  %v800_v48 = vld [vmem:[%s5616_s7 + $0x618] sm:$0xff] }
  0xb9   : > { %4345 = vmatpush1.bf16.msra.mxu1 %v4344_v17  ;;  %1059 = vmatprep.mubr.f32.mxu0 %v228_v18  ;;  %v782_v17 = vld [vmem:[%s5616_s7 + $0x588] sm:$0xff]  ;;  %v4364_v24 = vpack.c.bf16 %v779_v16, %v775_v14  ;;  %v804_v49 = vld [vmem:[%s5616_s7 + $0x638] sm:$0xff] }
  0xba   : > { %2406 = vmatprep.mubr.f32.mxu1 %v228_v18  ;;  %4155 = vmatprep.subr.bf16.mxu0 %v4154_v19  ;;  %v786_v18 = vld [vmem:[%s5616_s7 + $0x5a8] sm:$0xff]  ;;  %v251_v19 = vld [vmem:[%s5609_s29 + $0xf0] sm:$0xff]  ;;  %v4374_v57 = vpack.c.bf16 %v804_v49, %v800_v48  ;;  %v808_v62 = vld [vmem:[%s5616_s7 + $0x658] sm:$0xff] }
  0xbb   : > { %1060 = vmatmul.mubr.f32.gmra.mrb[2].mxu0 %v227_v27  ;;  %4347 = vmatprep.subr.bf16.mxu1 %v4346_v23  ;;  %v4172_v23 = vpack.c.bf16 %v777_v13, %v773_v12  ;;  %v4174_v25 = vpack.c.bf16 %v786_v18, %v782_v17  ;;  %v812_v63 = vld [vmem:[%s5616_s7 + $0x678] sm:$0xff]  ;;  %v282_v14 = vld [vmem:[%s5609_s29 + $0x1e8] sm:$0xff]  ;;  %v813_v18 = vld [vmem:[%s5616_s7 + $0x680] sm:$0xff] }
  0xbc   : > { %2407 = vmatmul.mubr.f32.gmra.mrb[2].mxu1 %v227_v27  ;;  %1065 = vmatprep.mubr.f32.mxu0 %v234_v30  ;;  %v785_v27 = vld [vmem:[%s5616_s7 + $0x5a0] sm:$0xff]  ;;  %v276_v0 = vld [vmem:[%s5609_s29 + $0x1b8] sm:$0xff]  ;;  %v4378_v7 = vpack.c.bf16 %v812_v63, %v808_v62  ;;  %v318_v48 = vld [vmem:[%s5609_s29 + $0x308] sm:$0xff] }
  0xbd   : > { %2412 = vmatprep.mubr.f32.mxu1 %v234_v30  ;;  %4157 = vmatpush1.bf16.msra.mxu0 %v4156_v31  ;;  %v787_v30 = vld [vmem:[%s5616_s7 + $0x5b0] sm:$0xff]  ;;  %v790_v31 = vld [vmem:[%s5616_s7 + $0x5c8] sm:$0xff]  ;;  %v816_v12 = vld [vmem:[%s5616_s7 + $0x698] sm:$0xff] }
  0xbe   : > { %4349 = vmatpush1.bf16.msra.mxu1 %v4348_v32  ;;  %4159 = vmatprep.subr.bf16.mxu0 %v4158_v33  ;;  %v794_v32 = vld [vmem:[%s5616_s7 + $0x5e8] sm:$0xff]  ;;  %v257_v33 = vld [vmem:[%s5609_s29 + $0x120] sm:$0xff]  ;;  %v4368_v38 = vpack.c.bf16 %v787_v30, %v783_v28  ;;  %v820_v13 = vld [vmem:[%s5616_s7 + $0x6b8] sm:$0xff] }
  0xbf   : > { %1066 = vmatmul.mubr.f32.gmra.mrb[4].mxu0 %v233_v41  ;;  %4351 = vmatprep.subr.bf16.mxu1 %v4350_v37  ;;  %v4176_v37 = vpack.c.bf16 %v785_v27, %v781_v26  ;;  %v4178_v39 = vpack.c.bf16 %v794_v32, %v790_v31  ;;  %v4382_v20 = vpack.c.bf16 %v820_v13, %v816_v12  ;;  %v287_v27 = vld [vmem:[%s5609_s29 + $0x210] sm:$0xff]  ;;  %v294_v28 = vld [vmem:[%s5609_s29 + $0x248] sm:$0xff]  ;;  %v300_v30 = vld [vmem:[%s5609_s29 + $0x278] sm:$0xff] }
  0xc0   : > { %2413 = vmatmul.mubr.f32.gmra.mrb[4].mxu1 %v233_v41  ;;  %1071 = vmatprep.mubr.f32.mxu0 %v240_v44  ;;  %v793_v41 = vld [vmem:[%s5616_s7 + $0x5e0] sm:$0xff]  ;;  %v299_v31 = vld [vmem:[%s5609_s29 + $0x270] sm:$0xff]  ;;  %v306_v32 = vld [vmem:[%s5609_s29 + $0x2a8] sm:$0xff] }
  0xc1   : > { %2418 = vmatprep.mubr.f32.mxu1 %v240_v44  ;;  %4161 = vmatpush1.bf16.msra.mxu0 %v4160_v45  ;;  %v795_v44 = vld [vmem:[%s5616_s7 + $0x5f0] sm:$0xff]  ;;  %v798_v45 = vld [vmem:[%s5616_s7 + $0x608] sm:$0xff]  ;;  %v317_v49 = vld [vmem:[%s5609_s29 + $0x300] sm:$0xff] }
  0xc2   : > { %4353 = vmatpush1.bf16.msra.mxu1 %v4352_v46  ;;  %4163 = vmatprep.subr.bf16.mxu0 %v4162_v47  ;;  %v802_v46 = vld [vmem:[%s5616_s7 + $0x628] sm:$0xff]  ;;  %v263_v47 = vld [vmem:[%s5609_s29 + $0x150] sm:$0xff]  ;;  %v4372_v52 = vpack.c.bf16 %v795_v44, %v791_v42  ;;  %v840_v12 = vld [vmem:[%s5616_s7 + $0x758] sm:$0xff] }
  0xc3   : > { %1072 = vmatmul.mubr.f32.gmra.mrb[6].mxu0 %v239_v55  ;;  %4355 = vmatprep.subr.bf16.mxu1 %v4354_v51  ;;  %v4180_v51 = vpack.c.bf16 %v793_v41, %v789_v40  ;;  %v4182_v53 = vpack.c.bf16 %v802_v46, %v798_v45  ;;  %v825_v40 = vld [vmem:[%s5616_s7 + $0x6e0] sm:$0xff]  ;;  %v823_v41 = vld [vmem:[%s5616_s7 + $0x6d0] sm:$0xff]  ;;  %v312_v46 = vld [vmem:[%s5609_s29 + $0x2d8] sm:$0xff] }
  0xc4   : > { %2419 = vmatmul.mubr.f32.gmra.mrb[6].mxu1 %v239_v55  ;;  %1077 = vmatprep.mubr.f32.mxu0 %v246_v58  ;;  %v801_v55 = vld [vmem:[%s5616_s7 + $0x620] sm:$0xff]  ;;  %v827_v42 = vld [vmem:[%s5616_s7 + $0x6f0] sm:$0xff]  ;;  %v844_v13 = vld [vmem:[%s5616_s7 + $0x778] sm:$0xff] }
  0xc5   : > { %2424 = vmatprep.mubr.f32.mxu1 %v246_v58  ;;  %4165 = vmatpush1.bf16.msra.mxu0 %v4164_v59  ;;  %v803_v58 = vld [vmem:[%s5616_s7 + $0x630] sm:$0xff]  ;;  %v806_v59 = vld [vmem:[%s5616_s7 + $0x648] sm:$0xff]  ;;  %v4388_v44 = vpack.c.bf16 %v827_v42, %v823_v41  ;;  %v305_v45 = vld [vmem:[%s5609_s29 + $0x2a0] sm:$0xff] }
  0xc6   : > { %4357 = vmatpush1.bf16.msra.mxu1 %v4356_v60  ;;  %4167 = vmatprep.subr.bf16.mxu0 %v4166_v61  ;;  %v810_v60 = vld [vmem:[%s5616_s7 + $0x668] sm:$0xff]  ;;  %v269_v61 = vld [vmem:[%s5609_s29 + $0x180] sm:$0xff]  ;;  %v4376_v2 = vpack.c.bf16 %v803_v58, %v799_v56  ;;  %v832_v56 = vld [vmem:[%s5616_s7 + $0x718] sm:$0xff] }
  0xc7   : > { %1078 = vmatmul.mubr.f32.gmra.mrb[8].mxu0 %v245_v5  ;;  %4359 = vmatprep.subr.bf16.mxu1 %v4358_v1  ;;  %v4184_v1 = vpack.c.bf16 %v801_v55, %v797_v54  ;;  %v4186_v3 = vpack.c.bf16 %v810_v60, %v806_v59  ;;  %v834_v54 = vld [vmem:[%s5616_s7 + $0x728] sm:$0xff]  ;;  %v829_v58 = vld [vmem:[%s5616_s7 + $0x700] sm:$0xff]  ;;  %v835_v62 = vld [vmem:[%s5616_s7 + $0x730] sm:$0xff] }
  0xc8   : > { %2425 = vmatmul.mubr.f32.gmra.mrb[8].mxu1 %v245_v5  ;;  %1083 = vmatprep.mubr.f32.mxu0 %v252_v8  ;;  %v809_v5 = vld [vmem:[%s5616_s7 + $0x660] sm:$0xff]  ;;  %v384_v42 = vld [vmem:[%s5609_s29 + $0x518] sm:$0xff] }
  0xc9   : > { %2430 = vmatprep.mubr.f32.mxu1 %v252_v8  ;;  %4169 = vmatpush1.bf16.msra.mxu0 %v4168_v9  ;;  %v811_v8 = vld [vmem:[%s5616_s7 + $0x670] sm:$0xff]  ;;  %v814_v9 = vld [vmem:[%s5616_s7 + $0x688] sm:$0xff]  ;;  %v833_v60 = vld [vmem:[%s5616_s7 + $0x720] sm:$0xff] }
  0xca   : > { %4361 = vmatpush1.bf16.msra.mxu1 %v4360_v10  ;;  %4171 = vmatprep.subr.bf16.mxu0 %v4170_v11  ;;  %v818_v10 = vld [vmem:[%s5616_s7 + $0x6a8] sm:$0xff]  ;;  %v275_v11 = vld [vmem:[%s5609_s29 + $0x1b0] sm:$0xff]  ;;  %v4380_v16 = vpack.c.bf16 %v811_v8, %v807_v6  ;;  %v4200_v63 = vpack.c.bf16 %v833_v60, %v829_v58  ;;  %v348_v6 = vld [vmem:[%s5609_s29 + $0x3f8] sm:$0xff] }
  0xcb   : > { %1084 = vmatmul.mubr.f32.gmra.mrb[10].mxu0 %v251_v19  ;;  %4363 = vmatprep.subr.bf16.mxu1 %v4362_v15  ;;  %v4188_v15 = vpack.c.bf16 %v809_v5, %v805_v4  ;;  %v4190_v17 = vpack.c.bf16 %v818_v10, %v814_v9  ;;  %v342_v4 = vld [vmem:[%s5609_s29 + $0x3c8] sm:$0xff]  ;;  %v341_v5 = vld [vmem:[%s5609_s29 + $0x3c0] sm:$0xff]  ;;  %v859_v58 = vld [vmem:[%s5616_s7 + $0x7f0] sm:$0xff] }
  0xcc   : > { %2431 = vmatmul.mubr.f32.gmra.mrb[10].mxu1 %v251_v19  ;;  %1089 = vmatprep.mubr.f32.mxu0 %v258_v22  ;;  %v817_v19 = vld [vmem:[%s5616_s7 + $0x6a0] sm:$0xff]  ;;  %v354_v8 = vld [vmem:[%s5609_s29 + $0x428] sm:$0xff] }
  0xcd   : > { %2436 = vmatprep.mubr.f32.mxu1 %v258_v22  ;;  %4173 = vmatpush1.bf16.msra.mxu0 %v4172_v23  ;;  %v819_v22 = vld [vmem:[%s5616_s7 + $0x6b0] sm:$0xff]  ;;  %v281_v23 = vld [vmem:[%s5609_s29 + $0x1e0] sm:$0xff]  ;;  %v838_v9 = vld [vmem:[%s5616_s7 + $0x748] sm:$0xff] }
  0xce   : > { %4365 = vmatpush1.bf16.msra.mxu1 %v4364_v24  ;;  %4175 = vmatprep.subr.bf16.mxu0 %v4174_v25  ;;  %v288_v24 = vld [vmem:[%s5609_s29 + $0x218] sm:$0xff]  ;;  %v4192_v25 = vpack.c.bf16 %v817_v19, %v813_v18  ;;  %v4384_v26 = vpack.c.bf16 %v819_v22, %v815_v21  ;;  %v842_v10 = vld [vmem:[%s5616_s7 + $0x768] sm:$0xff]  ;;  %v843_v18 = vld [vmem:[%s5616_s7 + $0x770] sm:$0xff] }
  0xcf   : > { %1090 = vmatmul.mubr.f32.gmra.mrb[12].mxu0 %v257_v33  ;;  %4367 = vmatprep.subr.bf16.mxu1 %v4366_v29  ;;  %v293_v29 = vld [vmem:[%s5609_s29 + $0x240] sm:$0xff]  ;;  %v360_v22 = vld [vmem:[%s5609_s29 + $0x458] sm:$0xff] }
  0xd0   : > { %2437 = vmatmul.mubr.f32.gmra.mrb[12].mxu1 %v257_v33  ;;  %1095 = vmatprep.mubr.f32.mxu0 %v264_v36  ;;  %v822_v33 = vld [vmem:[%s5616_s7 + $0x6c8] sm:$0xff]  ;;  %v353_v21 = vld [vmem:[%s5609_s29 + $0x420] sm:$0xff] }
  0xd1   : > { %2442 = vmatprep.mubr.f32.mxu1 %v264_v36  ;;  %4177 = vmatpush1.bf16.msra.mxu0 %v4176_v37  ;;  %v4194_v35 = vpack.c.bf16 %v826_v34, %v822_v33  ;;  %v824_v36 = vld [vmem:[%s5616_s7 + $0x6d8] sm:$0xff]  ;;  %v845_v34 = vld [vmem:[%s5616_s7 + $0x780] sm:$0xff] }
  0xd2   : > { %4369 = vmatpush1.bf16.msra.mxu1 %v4368_v38  ;;  %4179 = vmatprep.subr.bf16.mxu0 %v4178_v39  ;;  %v828_v37 = vld [vmem:[%s5616_s7 + $0x6f8] sm:$0xff]  ;;  %v821_v38 = vld [vmem:[%s5616_s7 + $0x6c0] sm:$0xff] }
  0xd3   : > { %1096 = vmatmul.mubr.f32.gmra.mrb[14].mxu0 %v263_v47  ;;  %4371 = vmatprep.subr.bf16.mxu1 %v4370_v43  ;;  %v4386_v39 = vpack.c.bf16 %v828_v37, %v824_v36  ;;  %v4196_v43 = vpack.c.bf16 %v825_v40, %v821_v38  ;;  %v852_v33 = vld [vmem:[%s5616_s7 + $0x7b8] sm:$0xff]  ;;  %v849_v36 = vld [vmem:[%s5616_s7 + $0x7a0] sm:$0xff]  ;;  %v847_v37 = vld [vmem:[%s5616_s7 + $0x790] sm:$0xff] }
  0xd4   : > { %2443 = vmatmul.mubr.f32.gmra.mrb[14].mxu1 %v263_v47  ;;  %1101 = vmatprep.mubr.f32.mxu0 %v270_v50  ;;  %v311_v47 = vld [vmem:[%s5609_s29 + $0x2d0] sm:$0xff]  ;;  %v377_v41 = vld [vmem:[%s5609_s29 + $0x4e0] sm:$0xff] }
  0xd5   : > { %2448 = vmatprep.mubr.f32.mxu1 %v270_v50  ;;  %4181 = vmatpush1.bf16.msra.mxu0 %v4180_v51  ;;  %v324_v50 = vld [vmem:[%s5609_s29 + $0x338] sm:$0xff]  ;;  %v323_v51 = vld [vmem:[%s5609_s29 + $0x330] sm:$0xff] }
  0xd6   : > { %4373 = vmatpush1.bf16.msra.mxu1 %v4372_v52  ;;  %4183 = vmatprep.subr.bf16.mxu0 %v4182_v53  ;;  %v330_v52 = vld [vmem:[%s5609_s29 + $0x368] sm:$0xff]  ;;  %v851_v38 = vld [vmem:[%s5616_s7 + $0x7b0] sm:$0xff] }
  0xd7   : > { %1102 = vmatmul.mubr.f32.gmra.mrb[16].mxu0 %v269_v61  ;;  %4375 = vmatprep.subr.bf16.mxu1 %v4374_v57  ;;  %v830_v53 = vld [vmem:[%s5616_s7 + $0x708] sm:$0xff]  ;;  %v836_v57 = vld [vmem:[%s5616_s7 + $0x738] sm:$0xff]  ;;  %v4400_v40 = vpack.c.bf16 %v851_v38, %v847_v37  ;;  %v503_v37 = vld [vmem:[%s5609_s29 + $0x8d0] sm:$0xff] }
  0xd8   : > { %2449 = vmatmul.mubr.f32.gmra.mrb[16].mxu1 %v269_v61  ;;  %1107 = vmatprep.mubr.f32.mxu0 %v276_v0  ;;  %v4198_v55 = vpack.c.bf16 %v834_v54, %v830_v53  ;;  %v4390_v59 = vpack.c.bf16 %v836_v57, %v832_v56  ;;  %v831_v61 = vld [vmem:[%s5616_s7 + $0x710] sm:$0xff]  ;;  %v860_v53 = vld [vmem:[%s5616_s7 + $0x7f8] sm:$0xff]  ;;  %v853_v54 = vld [vmem:[%s5616_s7 + $0x7c0] sm:$0xff] }
  0xd9   : > { %2454 = vmatprep.mubr.f32.mxu1 %v276_v0  ;;  %4185 = vmatpush1.bf16.msra.mxu0 %v4184_v1  ;;  %v4392_v0 = vpack.c.bf16 %v835_v62, %v831_v61  ;;  %v329_v1 = vld [vmem:[%s5609_s29 + $0x360] sm:$0xff]  ;;  %v855_v57 = vld [vmem:[%s5616_s7 + $0x7d0] sm:$0xff]  ;;  %v408_v62 = vld [vmem:[%s5609_s29 + $0x5d8] sm:$0xff] }
  0xda   : > { %4377 = vmatpush1.bf16.msra.mxu1 %v4376_v2  ;;  %4187 = vmatprep.subr.bf16.mxu0 %v4186_v3  ;;  %v336_v2 = vld [vmem:[%s5609_s29 + $0x398] sm:$0xff]  ;;  %v335_v3 = vld [vmem:[%s5609_s29 + $0x390] sm:$0xff]  ;;  %v857_v56 = vld [vmem:[%s5616_s7 + $0x7e0] sm:$0xff]  ;;  %v4404_v60 = vpack.c.bf16 %v859_v58, %v855_v57 }
  0xdb   : > { %1108 = vmatmul.mubr.f32.gmra.mrb[18].mxu0 %v275_v11  ;;  %4379 = vmatprep.subr.bf16.mxu1 %v4378_v7  ;;  %v347_v7 = vld [vmem:[%s5609_s29 + $0x3f0] sm:$0xff]  ;;  %v401_v61 = vld [vmem:[%s5609_s29 + $0x5a0] sm:$0xff]  ;;  %v510_v38 = vld [vmem:[%s5609_s29 + $0x908] sm:$0xff] }
  0xdc   : > { %2455 = vmatmul.mubr.f32.gmra.mrb[18].mxu1 %v275_v11  ;;  %1113 = vmatprep.mubr.f32.mxu0 %v282_v14  ;;  %v4202_v11 = vpack.c.bf16 %v842_v10, %v838_v9  ;;  %v426_v9 = vld [vmem:[%s5609_s29 + $0x668] sm:$0xff]  ;;  %v563_v57 = vld [vmem:[%s5609_s29 + $0xab0] sm:$0xff] }
  0xdd   : > { %2460 = vmatprep.mubr.f32.mxu1 %v282_v14  ;;  %4189 = vmatpush1.bf16.msra.mxu0 %v4188_v15  ;;  %v837_v14 = vld [vmem:[%s5616_s7 + $0x740] sm:$0xff]  ;;  %v4394_v15 = vpack.c.bf16 %v844_v13, %v840_v12  ;;  %v432_v12 = vld [vmem:[%s5609_s29 + $0x698] sm:$0xff]  ;;  %v431_v13 = vld [vmem:[%s5609_s29 + $0x690] sm:$0xff] }
  0xde   : > { %4381 = vmatpush1.bf16.msra.mxu1 %v4380_v16  ;;  %4191 = vmatprep.subr.bf16.mxu0 %v4190_v17  ;;  %v841_v16 = vld [vmem:[%s5616_s7 + $0x760] sm:$0xff]  ;;  %v839_v17 = vld [vmem:[%s5616_s7 + $0x750] sm:$0xff]  ;;  %v570_v58 = vld [vmem:[%s5609_s29 + $0xae8] sm:$0xff] }
  0xdf   : > { %1114 = vmatmul.mubr.f32.gmra.mrb[20].mxu0 %v281_v23  ;;  %4383 = vmatprep.subr.bf16.mxu1 %v4382_v20  ;;  %v4204_v19 = vpack.c.bf16 %v841_v16, %v837_v14  ;;  %v4396_v20 = vpack.c.bf16 %v843_v18, %v839_v17  ;;  %v438_v14 = vld [vmem:[%s5609_s29 + $0x6c8] sm:$0xff]  ;;  %v444_v16 = vld [vmem:[%s5609_s29 + $0x6f8] sm:$0xff]  ;;  %v443_v17 = vld [vmem:[%s5609_s29 + $0x6f0] sm:$0xff] }
  0xe0   : > { %2461 = vmatmul.mubr.f32.gmra.mrb[20].mxu1 %v281_v23  ;;  %1119 = vmatprep.mubr.f32.mxu0 %v288_v24  ;;  %v359_v23 = vld [vmem:[%s5609_s29 + $0x450] sm:$0xff]  ;;  %v450_v18 = vld [vmem:[%s5609_s29 + $0x728] sm:$0xff] }
  0xe1   : > { %2466 = vmatprep.mubr.f32.mxu1 %v288_v24  ;;  %4193 = vmatpush1.bf16.msra.mxu0 %v4192_v25  ;;  %v366_v24 = vld [vmem:[%s5609_s29 + $0x488] sm:$0xff]  ;;  %v365_v25 = vld [vmem:[%s5609_s29 + $0x480] sm:$0xff] }
  0xe2   : > { %4385 = vmatpush1.bf16.msra.mxu1 %v4384_v26  ;;  %4195 = vmatprep.subr.bf16.mxu0 %v4194_v35  ;;  %v372_v26 = vld [vmem:[%s5609_s29 + $0x4b8] sm:$0xff] }
  0xe3   : > { %1120 = vmatmul.mubr.f32.gmra.mrb[22].mxu0 %v287_v27  ;;  %4387 = vmatprep.subr.bf16.mxu1 %v4386_v39  ;;  %v4208_v39 = vpack.c.bf16 %v849_v36, %v845_v34  ;;  %v498_v34 = vld [vmem:[%s5609_s29 + $0x8a8] sm:$0xff]  ;;  %v504_v36 = vld [vmem:[%s5609_s29 + $0x8d8] sm:$0xff] }
  0xe4   : > { %2467 = vmatmul.mubr.f32.gmra.mrb[22].mxu1 %v287_v27  ;;  %1125 = vmatprep.mubr.f32.mxu0 %v294_v28  ;;  %v371_v27 = vld [vmem:[%s5609_s29 + $0x4b0] sm:$0xff] }
  0xe5   : > { %2472 = vmatprep.mubr.f32.mxu1 %v294_v28  ;;  %4197 = vmatpush1.bf16.msra.mxu0 %v4196_v43  ;;  %v378_v28 = vld [vmem:[%s5609_s29 + $0x4e8] sm:$0xff]  ;;  %v383_v43 = vld [vmem:[%s5609_s29 + $0x510] sm:$0xff] }
  0xe6   : > { %4389 = vmatpush1.bf16.msra.mxu1 %v4388_v44  ;;  %4199 = vmatprep.subr.bf16.mxu0 %v4198_v55  ;;  %v390_v44 = vld [vmem:[%s5609_s29 + $0x548] sm:$0xff] }
  0xe7   : > { %1126 = vmatmul.mubr.f32.gmra.mrb[24].mxu0 %v293_v29  ;;  %4391 = vmatprep.subr.bf16.mxu1 %v4390_v59  ;;  %v4212_v59 = vpack.c.bf16 %v857_v56, %v853_v54  ;;  %v558_v54 = vld [vmem:[%s5609_s29 + $0xa88] sm:$0xff]  ;;  %v564_v56 = vld [vmem:[%s5609_s29 + $0xab8] sm:$0xff] }
  0xe8   : > { %2473 = vmatmul.mubr.f32.gmra.mrb[24].mxu1 %v293_v29  ;;  %1131 = vmatprep.mubr.f32.mxu0 %v300_v30  ;;  %v846_v29 = vld [vmem:[%s5616_s7 + $0x788] sm:$0xff] }
  0xe9   : > { %2478 = vmatprep.mubr.f32.mxu1 %v300_v30  ;;  %4201 = vmatpush1.bf16.msra.mxu0 %v4200_v63  ;;  %v850_v30 = vld [vmem:[%s5616_s7 + $0x7a8] sm:$0xff]  ;;  %v407_v63 = vld [vmem:[%s5609_s29 + $0x5d0] sm:$0xff] }
  0xea   : > { %4393 = vmatpush1.bf16.msra.mxu1 %v4392_v0  ;;  %4203 = vmatprep.subr.bf16.mxu0 %v4202_v11  ;;  %v414_v0 = vld [vmem:[%s5609_s29 + $0x608] sm:$0xff]  ;;  %v425_v11 = vld [vmem:[%s5609_s29 + $0x660] sm:$0xff] }
  0xeb   : > { %1132 = vmatmul.mubr.f32.gmra.mrb[26].mxu0 %v299_v31  ;;  %4395 = vmatprep.subr.bf16.mxu1 %v4394_v15  ;;  %v437_v15 = vld [vmem:[%s5609_s29 + $0x6c0] sm:$0xff] }
  0xec   : > { %2479 = vmatmul.mubr.f32.gmra.mrb[26].mxu1 %v299_v31  ;;  %1137 = vmatprep.mubr.f32.mxu0 %v306_v32  ;;  %v4206_v31 = vpack.c.bf16 %v850_v30, %v846_v29  ;;  %v479_v29 = vld [vmem:[%s5609_s29 + $0x810] sm:$0xff]  ;;  %v486_v30 = vld [vmem:[%s5609_s29 + $0x848] sm:$0xff] }
  0xed   : > { %2484 = vmatprep.mubr.f32.mxu1 %v306_v32  ;;  %4205 = vmatpush1.bf16.msra.mxu0 %v4204_v19  ;;  %v848_v32 = vld [vmem:[%s5616_s7 + $0x798] sm:$0xff]  ;;  %v449_v19 = vld [vmem:[%s5609_s29 + $0x720] sm:$0xff] }
  0xee   : > { %4397 = vmatpush1.bf16.msra.mxu1 %v4396_v20  ;;  %v4398_v35 = vpack.c.bf16 %v852_v33, %v848_v32  ;;  %4207 = vmatprep.subr.bf16.mxu0 %v4206_v31  ;;  %v456_v20 = vld [vmem:[%s5609_s29 + $0x758] sm:$0xff]  ;;  %v485_v31 = vld [vmem:[%s5609_s29 + $0x840] sm:$0xff]  ;;  %v491_v33 = vld [vmem:[%s5609_s29 + $0x870] sm:$0xff] }
  0xef   : > { %1138 = vmatmul.mubr.f32.gmra.mrb[28].mxu0 %v305_v45  ;;  %v492_v32 = vld [vmem:[%s5609_s29 + $0x878] sm:$0xff] }
  0xf0   : > { %2485 = vmatmul.mubr.f32.gmra.mrb[28].mxu1 %v305_v45  ;;  %1143 = vmatprep.mubr.f32.mxu0 %v312_v46  ;;  %v389_v45 = vld [vmem:[%s5609_s29 + $0x540] sm:$0xff] }
  0xf1   : > { %2490 = vmatprep.mubr.f32.mxu1 %v312_v46  ;;  %4399 = vmatprep.subr.bf16.mxu1 %v4398_v35  ;;  %v396_v46 = vld [vmem:[%s5609_s29 + $0x578] sm:$0xff]  ;;  %v497_v35 = vld [vmem:[%s5609_s29 + $0x8a0] sm:$0xff] }
  0xf2   : > { %4209 = vmatpush1.bf16.msra.mxu0 %v4208_v39  ;;  %4401 = vmatpush1.bf16.msra.mxu1 %v4400_v40  ;;  %v509_v39 = vld [vmem:[%s5609_s29 + $0x900] sm:$0xff]  ;;  %v516_v40 = vld [vmem:[%s5609_s29 + $0x938] sm:$0xff] }
  0xf3   : > { %1144 = vmatmul.mubr.f32.gmra.mrb[30].mxu0 %v311_v47 }
  0xf4   : > { %2491 = vmatmul.mubr.f32.gmra.mrb[30].mxu1 %v311_v47  ;;  %1149 = vmatprep.mubr.f32.mxu0 %v318_v48  ;;  %v395_v47 = vld [vmem:[%s5609_s29 + $0x570] sm:$0xff] }
  0xf5   : > { %2496 = vmatprep.mubr.f32.mxu1 %v318_v48  ;;  %v402_v48 = vld [vmem:[%s5609_s29 + $0x5a8] sm:$0xff] }
  0xf7   : > { %1150 = vmatmul.mubr.f32.gmra.mrb[32].mxu0 %v317_v49 }
  0xf8   : > { %2497 = vmatmul.mubr.f32.gmra.mrb[32].mxu1 %v317_v49  ;;  %1155 = vmatprep.mubr.f32.mxu0 %v324_v50  ;;  %v854_v49 = vld [vmem:[%s5616_s7 + $0x7c8] sm:$0xff] }
  0xf9   : > { %2502 = vmatprep.mubr.f32.mxu1 %v324_v50  ;;  %v858_v50 = vld [vmem:[%s5616_s7 + $0x7e8] sm:$0xff] }
  0xfb   : > { %1156 = vmatmul.mubr.f32.gmra.mrb[34].mxu0 %v323_v51 }
  0xfc   : > { %2503 = vmatmul.mubr.f32.gmra.mrb[34].mxu1 %v323_v51  ;;  %1161 = vmatprep.mubr.f32.mxu0 %v330_v52  ;;  %v4210_v51 = vpack.c.bf16 %v858_v50, %v854_v49  ;;  %v539_v49 = vld [vmem:[%s5609_s29 + $0x9f0] sm:$0xff]  ;;  %v546_v50 = vld [vmem:[%s5609_s29 + $0xa28] sm:$0xff] }
  0xfd   : > { %2508 = vmatprep.mubr.f32.mxu1 %v330_v52  ;;  %v856_v52 = vld [vmem:[%s5616_s7 + $0x7d8] sm:$0xff] }
  0xfe   : > { %v4402_v55 = vpack.c.bf16 %v860_v53, %v856_v52  ;;  %4211 = vmatprep.subr.bf16.mxu0 %v4210_v51  ;;  %v545_v51 = vld [vmem:[%s5609_s29 + $0xa20] sm:$0xff]  ;;  %v552_v52 = vld [vmem:[%s5609_s29 + $0xa58] sm:$0xff]  ;;  %v551_v53 = vld [vmem:[%s5609_s29 + $0xa50] sm:$0xff] }
  0xff   : > { %1162 = vmatmul.mubr.f32.gmra.mrb[36].mxu0 %v329_v1 }
 0x100   : > { %2509 = vmatmul.mubr.f32.gmra.mrb[36].mxu1 %v329_v1  ;;  %1167 = vmatprep.mubr.f32.mxu0 %v336_v2  ;;  %v413_v1 = vld [vmem:[%s5609_s29 + $0x600] sm:$0xff] }
 0x101   : > { %2514 = vmatprep.mubr.f32.mxu1 %v336_v2  ;;  %4403 = vmatprep.subr.bf16.mxu1 %v4402_v55  ;;  %v420_v2 = vld [vmem:[%s5609_s29 + $0x638] sm:$0xff]  ;;  %v557_v55 = vld [vmem:[%s5609_s29 + $0xa80] sm:$0xff] }
 0x102   : > { %4213 = vmatpush1.bf16.msra.mxu0 %v4212_v59  ;;  %4405 = vmatpush1.bf16.msra.mxu1 %v4404_v60  ;;  %v569_v59 = vld [vmem:[%s5609_s29 + $0xae0] sm:$0xff]  ;;  %v576_v60 = vld [vmem:[%s5609_s29 + $0xb18] sm:$0xff] }
 0x103   : > { %1168 = vmatmul.mubr.f32.gmra.mrb[38].mxu0 %v335_v3 }
 0x104   : > { %2515 = vmatmul.mubr.f32.gmra.mrb[38].mxu1 %v335_v3  ;;  %1173 = vmatprep.mubr.f32.mxu0 %v342_v4  ;;  %v862_v3 = vld [vmem:[%s5616_s7 + $0x808] sm:$0xff] }
 0x105   : > { %2520 = vmatprep.mubr.f32.mxu1 %v342_v4  ;;  %v866_v4 = vld [vmem:[%s5616_s7 + $0x828] sm:$0xff] }
 0x107   : > { %1174 = vmatmul.mubr.f32.gmra.mrb[40].mxu0 %v341_v5 }
 0x108   : > { %2521 = vmatmul.mubr.f32.gmra.mrb[40].mxu1 %v341_v5  ;;  %1179 = vmatprep.mubr.f32.mxu0 %v348_v6  ;;  %v419_v5 = vld [vmem:[%s5609_s29 + $0x630] sm:$0xff] }
 0x109   : > { %2526 = vmatprep.mubr.f32.mxu1 %v348_v6  ;;  %v4214_v6 = vpack.c.bf16 %v866_v4, %v862_v3  ;;  %v593_v3 = vld [vmem:[%s5609_s29 + $0xba0] sm:$0xff]  ;;  %v600_v4 = vld [vmem:[%s5609_s29 + $0xbd8] sm:$0xff] }
 0x10b   : > { %1180 = vmatmul.mubr.f32.gmra.mrb[42].mxu0 %v347_v7  ;;  %4215 = vmatprep.subr.bf16.mxu0 %v4214_v6  ;;  %v224_v6 = vld [vmem:[%s5609_s29 + $0x18] sm:$0xff] }
 0x10c   : > { %2527 = vmatmul.mubr.f32.gmra.mrb[42].mxu1 %v347_v7  ;;  %1185 = vmatprep.mubr.f32.mxu0 %v354_v8  ;;  %v864_v7 = vld [vmem:[%s5616_s7 + $0x818] sm:$0xff] }
 0x10d   : > { %2532 = vmatprep.mubr.f32.mxu1 %v354_v8  ;;  %v868_v8 = vld [vmem:[%s5616_s7 + $0x838] sm:$0xff] }
 0x10e   : > { %v4406_v10 = vpack.c.bf16 %v868_v8, %v864_v7  ;;  %v861_v7 = vld [vmem:[%s5616_s7 + $0x800] sm:$0xff] }
 0x10f   : > { %1186 = vmatmul.mubr.f32.gmra.mrb[44].mxu0 %v353_v21  ;;  %v865_v8 = vld [vmem:[%s5616_s7 + $0x820] sm:$0xff] }
 0x110   : > { %2533 = vmatmul.mubr.f32.gmra.mrb[44].mxu1 %v353_v21  ;;  %1191 = vmatprep.mubr.f32.mxu0 %v360_v22  ;;  %v455_v21 = vld [vmem:[%s5609_s29 + $0x750] sm:$0xff] }
 0x111   : > { %2538 = vmatprep.mubr.f32.mxu1 %v360_v22  ;;  %4407 = vmatprep.subr.bf16.mxu1 %v4406_v10  ;;  %v462_v22 = vld [vmem:[%s5609_s29 + $0x788] sm:$0xff]  ;;  %v867_v10 = vld [vmem:[%s5616_s7 + $0x830] sm:$0xff] }
 0x113   : > { %1192 = vmatmul.mubr.f32.gmra.mrb[46].mxu0 %v359_v23 }
 0x114   : > { %2539 = vmatmul.mubr.f32.gmra.mrb[46].mxu1 %v359_v23  ;;  %1197 = vmatprep.mubr.f32.mxu0 %v366_v24  ;;  %v461_v23 = vld [vmem:[%s5609_s29 + $0x780] sm:$0xff] }
 0x115   : > { %2544 = vmatprep.mubr.f32.mxu1 %v366_v24  ;;  %v468_v24 = vld [vmem:[%s5609_s29 + $0x7b8] sm:$0xff] }
 0x117   : > { %1198 = vmatmul.mubr.f32.gmra.mrb[48].mxu0 %v365_v25 }
 0x118   : > { %2545 = vmatmul.mubr.f32.gmra.mrb[48].mxu1 %v365_v25  ;;  %1203 = vmatprep.mubr.f32.mxu0 %v372_v26  ;;  %v467_v25 = vld [vmem:[%s5609_s29 + $0x7b0] sm:$0xff] }
 0x119   : > { %2550 = vmatprep.mubr.f32.mxu1 %v372_v26  ;;  %v474_v26 = vld [vmem:[%s5609_s29 + $0x7e8] sm:$0xff] }
 0x11b   : > { %1204 = vmatmul.mubr.f32.gmra.mrb[50].mxu0 %v371_v27 }
 0x11c   : > { %2551 = vmatmul.mubr.f32.gmra.mrb[50].mxu1 %v371_v27  ;;  %1209 = vmatprep.mubr.f32.mxu0 %v378_v28  ;;  %v473_v27 = vld [vmem:[%s5609_s29 + $0x7e0] sm:$0xff] }
 0x11d   : > { %2556 = vmatprep.mubr.f32.mxu1 %v378_v28  ;;  %v480_v28 = vld [vmem:[%s5609_s29 + $0x818] sm:$0xff] }
 0x11f   : > { %1210 = vmatmul.mubr.f32.gmra.mrb[52].mxu0 %v377_v41 }
 0x120   : > { %2557 = vmatmul.mubr.f32.gmra.mrb[52].mxu1 %v377_v41  ;;  %1215 = vmatprep.mubr.f32.mxu0 %v384_v42  ;;  %v515_v41 = vld [vmem:[%s5609_s29 + $0x930] sm:$0xff] }
 0x121   : > { %2562 = vmatprep.mubr.f32.mxu1 %v384_v42  ;;  %v522_v42 = vld [vmem:[%s5609_s29 + $0x968] sm:$0xff] }
 0x123   : > { %1216 = vmatmul.mubr.f32.gmra.mrb[54].mxu0 %v383_v43 }
 0x124   : > { %2563 = vmatmul.mubr.f32.gmra.mrb[54].mxu1 %v383_v43  ;;  %1221 = vmatprep.mubr.f32.mxu0 %v390_v44  ;;  %v521_v43 = vld [vmem:[%s5609_s29 + $0x960] sm:$0xff] }
 0x125   : > { %2568 = vmatprep.mubr.f32.mxu1 %v390_v44  ;;  %v528_v44 = vld [vmem:[%s5609_s29 + $0x998] sm:$0xff] }
 0x127   : > { %1222 = vmatmul.mubr.f32.gmra.mrb[56].mxu0 %v389_v45 }
 0x128   : > { %2569 = vmatmul.mubr.f32.gmra.mrb[56].mxu1 %v389_v45  ;;  %1227 = vmatprep.mubr.f32.mxu0 %v396_v46  ;;  %v527_v45 = vld [vmem:[%s5609_s29 + $0x990] sm:$0xff] }
 0x129   : > { %2574 = vmatprep.mubr.f32.mxu1 %v396_v46  ;;  %v534_v46 = vld [vmem:[%s5609_s29 + $0x9c8] sm:$0xff] }
 0x12b   : > { %1228 = vmatmul.mubr.f32.gmra.mrb[58].mxu0 %v395_v47 }
 0x12c   : > { %2575 = vmatmul.mubr.f32.gmra.mrb[58].mxu1 %v395_v47  ;;  %1233 = vmatprep.mubr.f32.mxu0 %v402_v48  ;;  %v533_v47 = vld [vmem:[%s5609_s29 + $0x9c0] sm:$0xff] }
 0x12d   : > { %2580 = vmatprep.mubr.f32.mxu1 %v402_v48  ;;  %v540_v48 = vld [vmem:[%s5609_s29 + $0x9f8] sm:$0xff] }
 0x12f   : > { %1234 = vmatmul.mubr.f32.gmra.mrb[60].mxu0 %v401_v61 }
 0x130   : > { %2581 = vmatmul.mubr.f32.gmra.mrb[60].mxu1 %v401_v61  ;;  %1239 = vmatprep.mubr.f32.mxu0 %v408_v62  ;;  %v575_v61 = vld [vmem:[%s5609_s29 + $0xb10] sm:$0xff] }
 0x131   : > { %2586 = vmatprep.mubr.f32.mxu1 %v408_v62  ;;  %v582_v62 = vld [vmem:[%s5609_s29 + $0xb48] sm:$0xff] }
 0x133   : > { %1240 = vmatmul.mubr.f32.gmra.mrb[62].mxu0 %v407_v63 }
 0x134   : > { %2587 = vmatmul.mubr.f32.gmra.mrb[62].mxu1 %v407_v63  ;;  %1245 = vmatprep.mubr.f32.mxu0 %v414_v0  ;;  %v581_v63 = vld [vmem:[%s5609_s29 + $0xb40] sm:$0xff] }
 0x135   : > { %2592 = vmatprep.mubr.f32.mxu1 %v414_v0  ;;  %v588_v0 = vld [vmem:[%s5609_s29 + $0xb78] sm:$0xff] }
 0x137   : > { %1246 = vmatmul.mubr.f32.gmra.mrb[64].mxu0 %v413_v1 }
 0x138   : > { %2593 = vmatmul.mubr.f32.gmra.mrb[64].mxu1 %v413_v1  ;;  %1251 = vmatprep.mubr.f32.mxu0 %v420_v2  ;;  %v587_v1 = vld [vmem:[%s5609_s29 + $0xb70] sm:$0xff] }
 0x139   : > { %2598 = vmatprep.mubr.f32.mxu1 %v420_v2  ;;  %v594_v2 = vld [vmem:[%s5609_s29 + $0xba8] sm:$0xff] }
 0x13b   : > { %1252 = vmatmul.mubr.f32.gmra.mrb[66].mxu0 %v419_v5 }
 0x13c   : > { %2599 = vmatmul.mubr.f32.gmra.mrb[66].mxu1 %v419_v5  ;;  %1257 = vmatprep.mubr.f32.mxu0 %v426_v9  ;;  %v599_v5 = vld [vmem:[%s5609_s29 + $0xbd0] sm:$0xff] }
 0x13d   : > { %2604 = vmatprep.mubr.f32.mxu1 %v426_v9  ;;  %v863_v9 = vld [vmem:[%s5616_s7 + $0x810] sm:$0xff] }
 0x13f   : > { %1258 = vmatmul.mubr.f32.gmra.mrb[68].mxu0 %v425_v11 }
 0x140   : > { %2605 = vmatmul.mubr.f32.gmra.mrb[68].mxu1 %v425_v11  ;;  %1263 = vmatprep.mubr.f32.mxu0 %v432_v12  ;;  %v870_v11 = vld [vmem:[%s5616_s7 + $0x848] sm:$0xff] }
 0x141   : > { %2610 = vmatprep.mubr.f32.mxu1 %v432_v12  ;;  %v874_v12 = vld [vmem:[%s5616_s7 + $0x868] sm:$0xff] }
 0x143   : > { %1264 = vmatmul.mubr.f32.gmra.mrb[70].mxu0 %v431_v13 }
 0x144   : > { %2611 = vmatmul.mubr.f32.gmra.mrb[70].mxu1 %v431_v13  ;;  %1269 = vmatprep.mubr.f32.mxu0 %v438_v14  ;;  %v223_v13 = vld [vmem:[%s5609_s29 + $0x10] sm:$0xff] }
 0x145   : > { %2616 = vmatprep.mubr.f32.mxu1 %v438_v14  ;;  %v4216_v14 = vpack.c.bf16 %v865_v8, %v861_v7  ;;  %v908_v7 = vld [vmem:[%s5616_s7 + $0x978] sm:$0xff]  ;;  %v254_v8 = vld [vmem:[%s5609_s29 + $0x108] sm:$0xff] }
 0x147   : > { %1270 = vmatmul.mubr.f32.gmra.mrb[72].mxu0 %v437_v15 }
 0x148   : > { %2617 = vmatmul.mubr.f32.gmra.mrb[72].mxu1 %v437_v15  ;;  %1275 = vmatprep.mubr.f32.mxu0 %v444_v16  ;;  %v872_v15 = vld [vmem:[%s5616_s7 + $0x858] sm:$0xff] }
 0x149   : > { %2622 = vmatprep.mubr.f32.mxu1 %v444_v16  ;;  %v876_v16 = vld [vmem:[%s5616_s7 + $0x878] sm:$0xff] }
 0x14b   : > { %1276 = vmatmul.mubr.f32.gmra.mrb[74].mxu0 %v443_v17 }
 0x14c   : > { %2623 = vmatmul.mubr.f32.gmra.mrb[74].mxu1 %v443_v17  ;;  %1281 = vmatprep.mubr.f32.mxu0 %v450_v18  ;;  %v4408_v17 = vpack.c.bf16 %v867_v10, %v863_v9 }
 0x14d   : > { %2628 = vmatprep.mubr.f32.mxu1 %v450_v18  ;;  %v230_v18 = vld [vmem:[%s5609_s29 + $0x48] sm:$0xff] }
 0x14f   : > { %1282 = vmatmul.mubr.f32.gmra.mrb[76].mxu0 %v449_v19 }
 0x150   : > { %2629 = vmatmul.mubr.f32.gmra.mrb[76].mxu1 %v449_v19  ;;  %1287 = vmatprep.mubr.f32.mxu0 %v456_v20  ;;  %v4218_v19 = vpack.c.bf16 %v874_v12, %v870_v11  ;;  %v901_v12 = vld [vmem:[%s5616_s7 + $0x940] sm:$0xff] }
 0x151   : > { %2634 = vmatprep.mubr.f32.mxu1 %v456_v20  ;;  %v869_v20 = vld [vmem:[%s5616_s7 + $0x840] sm:$0xff] }
 0x153   : > { %1288 = vmatmul.mubr.f32.gmra.mrb[78].mxu0 %v455_v21 }
 0x154   : > { %2635 = vmatmul.mubr.f32.gmra.mrb[78].mxu1 %v455_v21  ;;  %1293 = vmatprep.mubr.f32.mxu0 %v462_v22  ;;  %v873_v21 = vld [vmem:[%s5616_s7 + $0x860] sm:$0xff] }
 0x155   : > { %2640 = vmatprep.mubr.f32.mxu1 %v462_v22  ;;  %v871_v22 = vld [vmem:[%s5616_s7 + $0x850] sm:$0xff] }
 0x157   : > { %1294 = vmatmul.mubr.f32.gmra.mrb[80].mxu0 %v461_v23 }
 0x158   : > { %2641 = vmatmul.mubr.f32.gmra.mrb[80].mxu1 %v461_v23  ;;  %1299 = vmatprep.mubr.f32.mxu0 %v468_v24  ;;  %v4410_v23 = vpack.c.bf16 %v876_v16, %v872_v15  ;;  %v907_v16 = vld [vmem:[%s5616_s7 + $0x970] sm:$0xff] }
 0x159   : > { %2646 = vmatprep.mubr.f32.mxu1 %v468_v24  ;;  %v875_v24 = vld [vmem:[%s5616_s7 + $0x870] sm:$0xff] }
 0x15b   : > { %1300 = vmatmul.mubr.f32.gmra.mrb[82].mxu0 %v467_v25 }
 0x15c   : > { %2647 = vmatmul.mubr.f32.gmra.mrb[82].mxu1 %v467_v25  ;;  %1305 = vmatprep.mubr.f32.mxu0 %v474_v26  ;;  %v878_v25 = vld [vmem:[%s5616_s7 + $0x888] sm:$0xff] }
 0x15d   : > { %2652 = vmatprep.mubr.f32.mxu1 %v474_v26  ;;  %v882_v26 = vld [vmem:[%s5616_s7 + $0x8a8] sm:$0xff] }
 0x15f   : > { %1306 = vmatmul.mubr.f32.gmra.mrb[84].mxu0 %v473_v27 }
 0x160   : > { %2653 = vmatmul.mubr.f32.gmra.mrb[84].mxu1 %v473_v27  ;;  %1311 = vmatprep.mubr.f32.mxu0 %v480_v28  ;;  %v229_v27 = vld [vmem:[%s5609_s29 + $0x40] sm:$0xff] }
 0x161   : > { %2658 = vmatprep.mubr.f32.mxu1 %v480_v28  ;;  %v880_v28 = vld [vmem:[%s5616_s7 + $0x898] sm:$0xff] }
 0x163   : > { %1312 = vmatmul.mubr.f32.gmra.mrb[86].mxu0 %v479_v29 }
 0x164   : > { %2659 = vmatmul.mubr.f32.gmra.mrb[86].mxu1 %v479_v29  ;;  %1317 = vmatprep.mubr.f32.mxu0 %v486_v30  ;;  %v884_v29 = vld [vmem:[%s5616_s7 + $0x8b8] sm:$0xff] }
 0x165   : > { %2664 = vmatprep.mubr.f32.mxu1 %v486_v30  ;;  %v236_v30 = vld [vmem:[%s5609_s29 + $0x78] sm:$0xff] }
 0x167   : > { %1318 = vmatmul.mubr.f32.gmra.mrb[88].mxu0 %v485_v31 }
 0x168   : > { %2665 = vmatmul.mubr.f32.gmra.mrb[88].mxu1 %v485_v31  ;;  %1323 = vmatprep.mubr.f32.mxu0 %v492_v32  ;;  %v4220_v31 = vpack.c.bf16 %v873_v21, %v869_v20  ;;  %v912_v20 = vld [vmem:[%s5616_s7 + $0x998] sm:$0xff] }
 0x169   : > { %2670 = vmatprep.mubr.f32.mxu1 %v492_v32  ;;  %v4412_v32 = vpack.c.bf16 %v875_v24, %v871_v22  ;;  %v916_v21 = vld [vmem:[%s5616_s7 + $0x9b8] sm:$0xff] }
 0x16a   : > { %v260_v22 = vld [vmem:[%s5609_s29 + $0x138] sm:$0xff] }
 0x16b   : > { %1324 = vmatmul.mubr.f32.gmra.mrb[90].mxu0 %v491_v33 }
 0x16c   : > { %2671 = vmatmul.mubr.f32.gmra.mrb[90].mxu1 %v491_v33  ;;  %1329 = vmatprep.mubr.f32.mxu0 %v498_v34  ;;  %v4222_v33 = vpack.c.bf16 %v882_v26, %v878_v25  ;;  %v909_v26 = vld [vmem:[%s5616_s7 + $0x980] sm:$0xff] }
 0x16d   : > { %2676 = vmatprep.mubr.f32.mxu1 %v498_v34  ;;  %v877_v34 = vld [vmem:[%s5616_s7 + $0x880] sm:$0xff] }
 0x16f   : > { %1330 = vmatmul.mubr.f32.gmra.mrb[92].mxu0 %v497_v35 }
 0x170   : > { %2677 = vmatmul.mubr.f32.gmra.mrb[92].mxu1 %v497_v35  ;;  %1335 = vmatprep.mubr.f32.mxu0 %v504_v36  ;;  %v881_v35 = vld [vmem:[%s5616_s7 + $0x8a0] sm:$0xff] }
 0x171   : > { %2682 = vmatprep.mubr.f32.mxu1 %v504_v36  ;;  %v879_v36 = vld [vmem:[%s5616_s7 + $0x890] sm:$0xff] }
 0x173   : > { %1336 = vmatmul.mubr.f32.gmra.mrb[94].mxu0 %v503_v37 }
 0x174   : > { %2683 = vmatmul.mubr.f32.gmra.mrb[94].mxu1 %v503_v37  ;;  %1341 = vmatprep.mubr.f32.mxu0 %v510_v38  ;;  %v4414_v37 = vpack.c.bf16 %v884_v29, %v880_v28  ;;  %v911_v28 = vld [vmem:[%s5616_s7 + $0x990] sm:$0xff]  ;;  %v4430_v29 = vpack.c.bf16 %v916_v21, %v912_v20 }
 0x175   : > { %2688 = vmatprep.mubr.f32.mxu1 %v510_v38  ;;  %v883_v38 = vld [vmem:[%s5616_s7 + $0x8b0] sm:$0xff] }
 0x176   : > { %v943_v21 = vld [vmem:[%s5616_s7 + $0xa90] sm:$0xff] }
 0x177   : > { %1342 = vmatmul.mubr.f32.gmra.mrb[96].mxu0 %v509_v39 }
 0x178   : > { %2689 = vmatmul.mubr.f32.gmra.mrb[96].mxu1 %v509_v39  ;;  %1347 = vmatprep.mubr.f32.mxu0 %v516_v40  ;;  %v886_v39 = vld [vmem:[%s5616_s7 + $0x8c8] sm:$0xff] }
 0x179   : > { %2694 = vmatprep.mubr.f32.mxu1 %v516_v40  ;;  %v890_v40 = vld [vmem:[%s5616_s7 + $0x8e8] sm:$0xff] }
 0x17b   : > { %1348 = vmatmul.mubr.f32.gmra.mrb[98].mxu0 %v515_v41 }
 0x17c   : > { %2695 = vmatmul.mubr.f32.gmra.mrb[98].mxu1 %v515_v41  ;;  %1353 = vmatprep.mubr.f32.mxu0 %v522_v42  ;;  %v235_v41 = vld [vmem:[%s5609_s29 + $0x70] sm:$0xff] }
 0x17d   : > { %2700 = vmatprep.mubr.f32.mxu1 %v522_v42  ;;  %v888_v42 = vld [vmem:[%s5616_s7 + $0x8d8] sm:$0xff] }
 0x17f   : > { %1354 = vmatmul.mubr.f32.gmra.mrb[100].mxu0 %v521_v43 }
 0x180   : > { %2701 = vmatmul.mubr.f32.gmra.mrb[100].mxu1 %v521_v43  ;;  %1359 = vmatprep.mubr.f32.mxu0 %v528_v44  ;;  %v892_v43 = vld [vmem:[%s5616_s7 + $0x8f8] sm:$0xff] }
 0x181   : > { %2706 = vmatprep.mubr.f32.mxu1 %v528_v44  ;;  %v242_v44 = vld [vmem:[%s5609_s29 + $0xa8] sm:$0xff] }
 0x183   : > { %1360 = vmatmul.mubr.f32.gmra.mrb[102].mxu0 %v527_v45 }
 0x184   : > { %2707 = vmatmul.mubr.f32.gmra.mrb[102].mxu1 %v527_v45  ;;  %1365 = vmatprep.mubr.f32.mxu0 %v534_v46  ;;  %v4224_v45 = vpack.c.bf16 %v881_v35, %v877_v34  ;;  %v920_v34 = vld [vmem:[%s5616_s7 + $0x9d8] sm:$0xff] }
 0x185   : > { %2712 = vmatprep.mubr.f32.mxu1 %v534_v46  ;;  %v4416_v46 = vpack.c.bf16 %v883_v38, %v879_v36  ;;  %v924_v35 = vld [vmem:[%s5616_s7 + $0x9f8] sm:$0xff]  ;;  %v266_v36 = vld [vmem:[%s5609_s29 + $0x168] sm:$0xff] }
 0x187   : > { %1366 = vmatmul.mubr.f32.gmra.mrb[104].mxu0 %v533_v47 }
 0x188   : > { %2713 = vmatmul.mubr.f32.gmra.mrb[104].mxu1 %v533_v47  ;;  %1371 = vmatprep.mubr.f32.mxu0 %v540_v48  ;;  %v4226_v47 = vpack.c.bf16 %v890_v40, %v886_v39  ;;  %v917_v40 = vld [vmem:[%s5616_s7 + $0x9c0] sm:$0xff] }
 0x189   : > { %2718 = vmatprep.mubr.f32.mxu1 %v540_v48  ;;  %v885_v48 = vld [vmem:[%s5616_s7 + $0x8c0] sm:$0xff] }
 0x18b   : > { %1372 = vmatmul.mubr.f32.gmra.mrb[106].mxu0 %v539_v49 }
 0x18c   : > { %2719 = vmatmul.mubr.f32.gmra.mrb[106].mxu1 %v539_v49  ;;  %1377 = vmatprep.mubr.f32.mxu0 %v546_v50  ;;  %v889_v49 = vld [vmem:[%s5616_s7 + $0x8e0] sm:$0xff] }
 0x18d   : > { %2724 = vmatprep.mubr.f32.mxu1 %v546_v50  ;;  %v887_v50 = vld [vmem:[%s5616_s7 + $0x8d0] sm:$0xff] }
 0x18f   : > { %1378 = vmatmul.mubr.f32.gmra.mrb[108].mxu0 %v545_v51 }
 0x190   : > { %2725 = vmatmul.mubr.f32.gmra.mrb[108].mxu1 %v545_v51  ;;  %1383 = vmatprep.mubr.f32.mxu0 %v552_v52  ;;  %v4418_v51 = vpack.c.bf16 %v892_v43, %v888_v42  ;;  %v919_v42 = vld [vmem:[%s5616_s7 + $0x9d0] sm:$0xff]  ;;  %v4434_v43 = vpack.c.bf16 %v924_v35, %v920_v34  ;;  %v954_v34 = vld [vmem:[%s5616_s7 + $0xae8] sm:$0xff] }
 0x191   : > { %2730 = vmatprep.mubr.f32.mxu1 %v552_v52  ;;  %v891_v52 = vld [vmem:[%s5616_s7 + $0x8f0] sm:$0xff] }
 0x193   : > { %1384 = vmatmul.mubr.f32.gmra.mrb[110].mxu0 %v551_v53 }
 0x194   : > { %2731 = vmatmul.mubr.f32.gmra.mrb[110].mxu1 %v551_v53  ;;  %1389 = vmatprep.mubr.f32.mxu0 %v558_v54  ;;  %v894_v53 = vld [vmem:[%s5616_s7 + $0x908] sm:$0xff] }
 0x195   : > { %2736 = vmatprep.mubr.f32.mxu1 %v558_v54  ;;  %v898_v54 = vld [vmem:[%s5616_s7 + $0x928] sm:$0xff] }
 0x197   : > { %1390 = vmatmul.mubr.f32.gmra.mrb[112].mxu0 %v557_v55 }
 0x198   : > { %2737 = vmatmul.mubr.f32.gmra.mrb[112].mxu1 %v557_v55  ;;  %1395 = vmatprep.mubr.f32.mxu0 %v564_v56  ;;  %v241_v55 = vld [vmem:[%s5609_s29 + $0xa0] sm:$0xff] }
 0x199   : > { %2742 = vmatprep.mubr.f32.mxu1 %v564_v56  ;;  %v896_v56 = vld [vmem:[%s5616_s7 + $0x918] sm:$0xff] }
 0x19b   : > { %1396 = vmatmul.mubr.f32.gmra.mrb[114].mxu0 %v563_v57 }
 0x19c   : > { %2743 = vmatmul.mubr.f32.gmra.mrb[114].mxu1 %v563_v57  ;;  %1401 = vmatprep.mubr.f32.mxu0 %v570_v58  ;;  %v900_v57 = vld [vmem:[%s5616_s7 + $0x938] sm:$0xff] }
 0x19d   : > { %2748 = vmatprep.mubr.f32.mxu1 %v570_v58  ;;  %v248_v58 = vld [vmem:[%s5609_s29 + $0xd8] sm:$0xff] }
 0x19f   : > { %1402 = vmatmul.mubr.f32.gmra.mrb[116].mxu0 %v569_v59 }
 0x1a0   : > { %2749 = vmatmul.mubr.f32.gmra.mrb[116].mxu1 %v569_v59  ;;  %1407 = vmatprep.mubr.f32.mxu0 %v576_v60  ;;  %v4228_v59 = vpack.c.bf16 %v889_v49, %v885_v48  ;;  %v928_v48 = vld [vmem:[%s5616_s7 + $0xa18] sm:$0xff] }
 0x1a1   : > { %2754 = vmatprep.mubr.f32.mxu1 %v576_v60  ;;  %v4420_v60 = vpack.c.bf16 %v891_v52, %v887_v50  ;;  %v932_v49 = vld [vmem:[%s5616_s7 + $0xa38] sm:$0xff] }
 0x1a2   : > { %v272_v50 = vld [vmem:[%s5609_s29 + $0x198] sm:$0xff] }
 0x1a3   : > { %1408 = vmatmul.mubr.f32.gmra.mrb[118].mxu0 %v575_v61 }
 0x1a4   : > { %2755 = vmatmul.mubr.f32.gmra.mrb[118].mxu1 %v575_v61  ;;  %1413 = vmatprep.mubr.f32.mxu0 %v582_v62  ;;  %v4230_v61 = vpack.c.bf16 %v898_v54, %v894_v53  ;;  %v925_v54 = vld [vmem:[%s5616_s7 + $0xa00] sm:$0xff] }
 0x1a5   : > { %2760 = vmatprep.mubr.f32.mxu1 %v582_v62  ;;  %v893_v62 = vld [vmem:[%s5616_s7 + $0x900] sm:$0xff] }
 0x1a7   : > { %1414 = vmatmul.mubr.f32.gmra.mrb[120].mxu0 %v581_v63 }
 0x1a8   : > { %2761 = vmatmul.mubr.f32.gmra.mrb[120].mxu1 %v581_v63  ;;  %1419 = vmatprep.mubr.f32.mxu0 %v588_v0  ;;  %v897_v63 = vld [vmem:[%s5616_s7 + $0x920] sm:$0xff] }
 0x1a9   : > { %2766 = vmatprep.mubr.f32.mxu1 %v588_v0  ;;  %v895_v0 = vld [vmem:[%s5616_s7 + $0x910] sm:$0xff]  ;;  %v4232_v9 = vpack.c.bf16 %v897_v63, %v893_v62  ;;  %v936_v62 = vld [vmem:[%s5616_s7 + $0xa58] sm:$0xff] }
 0x1aa   : > { %v940_v63 = vld [vmem:[%s5616_s7 + $0xa78] sm:$0xff] }
 0x1ab   : > { %1420 = vmatmul.mubr.f32.gmra.mrb[122].mxu0 %v587_v1 }
 0x1ac   : > { %2767 = vmatmul.mubr.f32.gmra.mrb[122].mxu1 %v587_v1  ;;  %1425 = vmatprep.mubr.f32.mxu0 %v594_v2  ;;  %v4422_v1 = vpack.c.bf16 %v900_v57, %v896_v56  ;;  %v927_v56 = vld [vmem:[%s5616_s7 + $0xa10] sm:$0xff]  ;;  %v4438_v57 = vpack.c.bf16 %v932_v49, %v928_v48  ;;  %v320_v48 = vld [vmem:[%s5609_s29 + $0x318] sm:$0xff] }
 0x1ad   : > { %2772 = vmatprep.mubr.f32.mxu1 %v594_v2  ;;  %v899_v2 = vld [vmem:[%s5616_s7 + $0x930] sm:$0xff] }
 0x1ae   : > { %v4424_v10 = vpack.c.bf16 %v899_v2, %v895_v0  ;;  %v278_v0 = vld [vmem:[%s5609_s29 + $0x1c8] sm:$0xff]  ;;  %v319_v49 = vld [vmem:[%s5609_s29 + $0x310] sm:$0xff] }
 0x1af   : > { %1426 = vmatmul.mubr.f32.gmra.mrb[124].mxu0 %v593_v3 }
 0x1b0   : > { %2773 = vmatmul.mubr.f32.gmra.mrb[124].mxu1 %v593_v3  ;;  %1431 = vmatprep.mubr.f32.mxu0 %v600_v4  ;;  %v902_v3 = vld [vmem:[%s5616_s7 + $0x948] sm:$0xff] }
 0x1b1   : > { %2778 = vmatprep.mubr.f32.mxu1 %v600_v4  ;;  %v906_v4 = vld [vmem:[%s5616_s7 + $0x968] sm:$0xff] }
 0x1b2   : > { %v4234_v11 = vpack.c.bf16 %v906_v4, %v902_v3  ;;  %v933_v4 = vld [vmem:[%s5616_s7 + $0xa40] sm:$0xff] }
 0x1b3   : > { %1432 = vmatmul.mubr.f32.gmra.mrb[126].mxu0 %v599_v5 }
 0x1b4   : > { %2779 = vmatmul.mubr.f32.gmra.mrb[126].mxu1 %v599_v5  ;;  %1502 = vmatprep.mubr.f32.mxu0 %v224_v6  ;;  %v247_v5 = vld [vmem:[%s5609_s29 + $0xd0] sm:$0xff] }
 0x1b5   : > { %2849 = vmatprep.mubr.f32.mxu1 %v224_v6  ;;  %v904_v6 = vld [vmem:[%s5616_s7 + $0x958] sm:$0xff] }
 0x1b6   : > { %v4426_v15 = vpack.c.bf16 %v908_v7, %v904_v6  ;;  %v935_v6 = vld [vmem:[%s5616_s7 + $0xa50] sm:$0xff]  ;;  %v4442_v7 = vpack.c.bf16 %v940_v63, %v936_v62 }
 0x1b7   : > { %1503 = vmatmul.mubr.f32.vlgmr.msra.gmra.mrb[0].mxu0 %v223_v13  ;;  %v963_v62 = vld [vmem:[%s5616_s7 + $0xb30] sm:$0xff] }
 0x1b8   : > { %2850 = vmatmul.mubr.f32.vlgmr.msra.gmra.mrb[0].mxu1 %v223_v13  ;;  %4217 = vmatpush1.bf16.msra.mxu0 %v4216_v14  ;;  %v905_v13 = vld [vmem:[%s5616_s7 + $0x960] sm:$0xff]  ;;  %v903_v14 = vld [vmem:[%s5616_s7 + $0x950] sm:$0xff] }
 0x1b9   : > { %4409 = vmatpush1.bf16.msra.mxu1 %v4408_v17  ;;  %1508 = vmatprep.mubr.f32.mxu0 %v230_v18  ;;  %v910_v17 = vld [vmem:[%s5616_s7 + $0x988] sm:$0xff]  ;;  %v4428_v24 = vpack.c.bf16 %v907_v16, %v903_v14  ;;  %v284_v14 = vld [vmem:[%s5609_s29 + $0x1f8] sm:$0xff] }
 0x1ba   : > { %2855 = vmatprep.mubr.f32.mxu1 %v230_v18  ;;  %4219 = vmatprep.subr.bf16.mxu0 %v4218_v19  ;;  %v914_v18 = vld [vmem:[%s5616_s7 + $0x9a8] sm:$0xff]  ;;  %v253_v19 = vld [vmem:[%s5609_s29 + $0x100] sm:$0xff] }
 0x1bb   : > { %1509 = vmatmul.mubr.f32.gmra.mrb[2].mxu0 %v229_v27  ;;  %4411 = vmatprep.subr.bf16.mxu1 %v4410_v23  ;;  %v4236_v23 = vpack.c.bf16 %v905_v13, %v901_v12  ;;  %v4238_v25 = vpack.c.bf16 %v914_v18, %v910_v17  ;;  %v944_v12 = vld [vmem:[%s5616_s7 + $0xa98] sm:$0xff]  ;;  %v941_v18 = vld [vmem:[%s5616_s7 + $0xa80] sm:$0xff] }
 0x1bc   : > { %2856 = vmatmul.mubr.f32.gmra.mrb[2].mxu1 %v229_v27  ;;  %1514 = vmatprep.mubr.f32.mxu0 %v236_v30  ;;  %v913_v27 = vld [vmem:[%s5616_s7 + $0x9a0] sm:$0xff]  ;;  %v948_v13 = vld [vmem:[%s5616_s7 + $0xab8] sm:$0xff] }
 0x1bd   : > { %2861 = vmatprep.mubr.f32.mxu1 %v236_v30  ;;  %4221 = vmatpush1.bf16.msra.mxu0 %v4220_v31  ;;  %v915_v30 = vld [vmem:[%s5616_s7 + $0x9b0] sm:$0xff]  ;;  %v918_v31 = vld [vmem:[%s5616_s7 + $0x9c8] sm:$0xff]  ;;  %v4446_v20 = vpack.c.bf16 %v948_v13, %v944_v12  ;;  %v968_v12 = vld [vmem:[%s5616_s7 + $0xb58] sm:$0xff] }
 0x1be   : > { %4413 = vmatpush1.bf16.msra.mxu1 %v4412_v32  ;;  %4223 = vmatprep.subr.bf16.mxu0 %v4222_v33  ;;  %v922_v32 = vld [vmem:[%s5616_s7 + $0x9e8] sm:$0xff]  ;;  %v259_v33 = vld [vmem:[%s5609_s29 + $0x130] sm:$0xff]  ;;  %v4432_v38 = vpack.c.bf16 %v915_v30, %v911_v28  ;;  %v296_v28 = vld [vmem:[%s5609_s29 + $0x258] sm:$0xff] }
 0x1bf   : > { %1515 = vmatmul.mubr.f32.gmra.mrb[4].mxu0 %v235_v41  ;;  %4415 = vmatprep.subr.bf16.mxu1 %v4414_v37  ;;  %v4240_v37 = vpack.c.bf16 %v913_v27, %v909_v26  ;;  %v4242_v39 = vpack.c.bf16 %v922_v32, %v918_v31  ;;  %v289_v27 = vld [vmem:[%s5609_s29 + $0x220] sm:$0xff]  ;;  %v302_v30 = vld [vmem:[%s5609_s29 + $0x288] sm:$0xff]  ;;  %v308_v32 = vld [vmem:[%s5609_s29 + $0x2b8] sm:$0xff] }
 0x1c0   : > { %2862 = vmatmul.mubr.f32.gmra.mrb[4].mxu1 %v235_v41  ;;  %1520 = vmatprep.mubr.f32.mxu0 %v242_v44  ;;  %v921_v41 = vld [vmem:[%s5616_s7 + $0x9e0] sm:$0xff]  ;;  %v972_v13 = vld [vmem:[%s5616_s7 + $0xb78] sm:$0xff] }
 0x1c1   : > { %2867 = vmatprep.mubr.f32.mxu1 %v242_v44  ;;  %4225 = vmatpush1.bf16.msra.mxu0 %v4224_v45  ;;  %v923_v44 = vld [vmem:[%s5616_s7 + $0x9f0] sm:$0xff]  ;;  %v926_v45 = vld [vmem:[%s5616_s7 + $0xa08] sm:$0xff]  ;;  %v301_v31 = vld [vmem:[%s5609_s29 + $0x280] sm:$0xff] }
 0x1c2   : > { %4417 = vmatpush1.bf16.msra.mxu1 %v4416_v46  ;;  %4227 = vmatprep.subr.bf16.mxu0 %v4226_v47  ;;  %v930_v46 = vld [vmem:[%s5616_s7 + $0xa28] sm:$0xff]  ;;  %v265_v47 = vld [vmem:[%s5609_s29 + $0x160] sm:$0xff]  ;;  %v4436_v52 = vpack.c.bf16 %v923_v44, %v919_v42  ;;  %v955_v42 = vld [vmem:[%s5616_s7 + $0xaf0] sm:$0xff] }
 0x1c3   : > { %1521 = vmatmul.mubr.f32.gmra.mrb[6].mxu0 %v241_v55  ;;  %4419 = vmatprep.subr.bf16.mxu1 %v4418_v51  ;;  %v4244_v51 = vpack.c.bf16 %v921_v41, %v917_v40  ;;  %v4246_v53 = vpack.c.bf16 %v930_v46, %v926_v45  ;;  %v953_v40 = vld [vmem:[%s5616_s7 + $0xae0] sm:$0xff]  ;;  %v951_v41 = vld [vmem:[%s5616_s7 + $0xad0] sm:$0xff]  ;;  %v314_v46 = vld [vmem:[%s5609_s29 + $0x2e8] sm:$0xff] }
 0x1c4   : > { %2868 = vmatmul.mubr.f32.gmra.mrb[6].mxu1 %v241_v55  ;;  %1526 = vmatprep.mubr.f32.mxu0 %v248_v58  ;;  %v929_v55 = vld [vmem:[%s5616_s7 + $0xa20] sm:$0xff]  ;;  %v4452_v44 = vpack.c.bf16 %v955_v42, %v951_v41  ;;  %v307_v45 = vld [vmem:[%s5609_s29 + $0x2b0] sm:$0xff]  ;;  %v386_v42 = vld [vmem:[%s5609_s29 + $0x528] sm:$0xff] }
 0x1c5   : > { %2873 = vmatprep.mubr.f32.mxu1 %v248_v58  ;;  %4229 = vmatpush1.bf16.msra.mxu0 %v4228_v59  ;;  %v931_v58 = vld [vmem:[%s5616_s7 + $0xa30] sm:$0xff]  ;;  %v934_v59 = vld [vmem:[%s5616_s7 + $0xa48] sm:$0xff] }
 0x1c6   : > { %4421 = vmatpush1.bf16.msra.mxu1 %v4420_v60  ;;  %4231 = vmatprep.subr.bf16.mxu0 %v4230_v61  ;;  %v938_v60 = vld [vmem:[%s5616_s7 + $0xa68] sm:$0xff]  ;;  %v271_v61 = vld [vmem:[%s5609_s29 + $0x190] sm:$0xff]  ;;  %v4440_v2 = vpack.c.bf16 %v931_v58, %v927_v56  ;;  %v960_v56 = vld [vmem:[%s5616_s7 + $0xb18] sm:$0xff] }
 0x1c7   : > { %1527 = vmatmul.mubr.f32.gmra.mrb[8].mxu0 %v247_v5  ;;  %4423 = vmatprep.subr.bf16.mxu1 %v4422_v1  ;;  %v4248_v1 = vpack.c.bf16 %v929_v55, %v925_v54  ;;  %v4250_v3 = vpack.c.bf16 %v938_v60, %v934_v59  ;;  %v962_v54 = vld [vmem:[%s5616_s7 + $0xb28] sm:$0xff]  ;;  %v957_v58 = vld [vmem:[%s5616_s7 + $0xb00] sm:$0xff]  ;;  %v379_v41 = vld [vmem:[%s5609_s29 + $0x4f0] sm:$0xff] }
 0x1c8   : > { %2874 = vmatmul.mubr.f32.gmra.mrb[8].mxu1 %v247_v5  ;;  %1532 = vmatprep.mubr.f32.mxu0 %v254_v8  ;;  %v937_v5 = vld [vmem:[%s5616_s7 + $0xa60] sm:$0xff] }
 0x1c9   : > { %2879 = vmatprep.mubr.f32.mxu1 %v254_v8  ;;  %4233 = vmatpush1.bf16.msra.mxu0 %v4232_v9  ;;  %v939_v8 = vld [vmem:[%s5616_s7 + $0xa70] sm:$0xff]  ;;  %v942_v9 = vld [vmem:[%s5616_s7 + $0xa88] sm:$0xff]  ;;  %v961_v60 = vld [vmem:[%s5616_s7 + $0xb20] sm:$0xff] }
 0x1ca   : > { %4425 = vmatpush1.bf16.msra.mxu1 %v4424_v10  ;;  %4235 = vmatprep.subr.bf16.mxu0 %v4234_v11  ;;  %v946_v10 = vld [vmem:[%s5616_s7 + $0xaa8] sm:$0xff]  ;;  %v277_v11 = vld [vmem:[%s5609_s29 + $0x1c0] sm:$0xff]  ;;  %v4444_v16 = vpack.c.bf16 %v939_v8, %v935_v6  ;;  %v4264_v63 = vpack.c.bf16 %v961_v60, %v957_v58  ;;  %v356_v8 = vld [vmem:[%s5609_s29 + $0x438] sm:$0xff] }
 0x1cb   : > { %1533 = vmatmul.mubr.f32.gmra.mrb[10].mxu0 %v253_v19  ;;  %4427 = vmatprep.subr.bf16.mxu1 %v4426_v15  ;;  %v4252_v15 = vpack.c.bf16 %v937_v5, %v933_v4  ;;  %v4254_v17 = vpack.c.bf16 %v946_v10, %v942_v9  ;;  %v344_v4 = vld [vmem:[%s5609_s29 + $0x3d8] sm:$0xff]  ;;  %v343_v5 = vld [vmem:[%s5609_s29 + $0x3d0] sm:$0xff]  ;;  %v350_v6 = vld [vmem:[%s5609_s29 + $0x408] sm:$0xff] }
 0x1cc   : > { %2880 = vmatmul.mubr.f32.gmra.mrb[10].mxu1 %v253_v19  ;;  %1538 = vmatprep.mubr.f32.mxu0 %v260_v22  ;;  %v945_v19 = vld [vmem:[%s5616_s7 + $0xaa0] sm:$0xff]  ;;  %v966_v9 = vld [vmem:[%s5616_s7 + $0xb48] sm:$0xff]  ;;  %v987_v58 = vld [vmem:[%s5616_s7 + $0xbf0] sm:$0xff] }
 0x1cd   : > { %2885 = vmatprep.mubr.f32.mxu1 %v260_v22  ;;  %4237 = vmatpush1.bf16.msra.mxu0 %v4236_v23  ;;  %v947_v22 = vld [vmem:[%s5616_s7 + $0xab0] sm:$0xff]  ;;  %v970_v10 = vld [vmem:[%s5616_s7 + $0xb68] sm:$0xff] }
 0x1ce   : > { %4429 = vmatpush1.bf16.msra.mxu1 %v4428_v24  ;;  %4239 = vmatprep.subr.bf16.mxu0 %v4238_v25  ;;  %v283_v23 = vld [vmem:[%s5609_s29 + $0x1f0] sm:$0xff]  ;;  %v290_v24 = vld [vmem:[%s5609_s29 + $0x228] sm:$0xff]  ;;  %v4256_v25 = vpack.c.bf16 %v945_v19, %v941_v18  ;;  %v4448_v26 = vpack.c.bf16 %v947_v22, %v943_v21 }
 0x1cf   : > { %1539 = vmatmul.mubr.f32.gmra.mrb[12].mxu0 %v259_v33  ;;  %4431 = vmatprep.subr.bf16.mxu1 %v4430_v29  ;;  %v295_v29 = vld [vmem:[%s5609_s29 + $0x250] sm:$0xff]  ;;  %v362_v22 = vld [vmem:[%s5609_s29 + $0x468] sm:$0xff] }
 0x1d0   : > { %2886 = vmatmul.mubr.f32.gmra.mrb[12].mxu1 %v259_v33  ;;  %1544 = vmatprep.mubr.f32.mxu0 %v266_v36  ;;  %v950_v33 = vld [vmem:[%s5616_s7 + $0xac8] sm:$0xff]  ;;  %v971_v18 = vld [vmem:[%s5616_s7 + $0xb70] sm:$0xff] }
 0x1d1   : > { %2891 = vmatprep.mubr.f32.mxu1 %v266_v36  ;;  %4241 = vmatpush1.bf16.msra.mxu0 %v4240_v37  ;;  %v4258_v35 = vpack.c.bf16 %v954_v34, %v950_v33  ;;  %v952_v36 = vld [vmem:[%s5616_s7 + $0xad8] sm:$0xff]  ;;  %v355_v21 = vld [vmem:[%s5609_s29 + $0x430] sm:$0xff]  ;;  %v973_v34 = vld [vmem:[%s5616_s7 + $0xb80] sm:$0xff] }
 0x1d2   : > { %4433 = vmatpush1.bf16.msra.mxu1 %v4432_v38  ;;  %4243 = vmatprep.subr.bf16.mxu0 %v4242_v39  ;;  %v956_v37 = vld [vmem:[%s5616_s7 + $0xaf8] sm:$0xff]  ;;  %v949_v38 = vld [vmem:[%s5616_s7 + $0xac0] sm:$0xff] }
 0x1d3   : > { %1545 = vmatmul.mubr.f32.gmra.mrb[14].mxu0 %v265_v47  ;;  %4435 = vmatprep.subr.bf16.mxu1 %v4434_v43  ;;  %v4450_v39 = vpack.c.bf16 %v956_v37, %v952_v36  ;;  %v4260_v43 = vpack.c.bf16 %v953_v40, %v949_v38  ;;  %v980_v33 = vld [vmem:[%s5616_s7 + $0xbb8] sm:$0xff]  ;;  %v977_v36 = vld [vmem:[%s5616_s7 + $0xba0] sm:$0xff]  ;;  %v975_v37 = vld [vmem:[%s5616_s7 + $0xb90] sm:$0xff] }
 0x1d4   : > { %2892 = vmatmul.mubr.f32.gmra.mrb[14].mxu1 %v265_v47  ;;  %1550 = vmatprep.mubr.f32.mxu0 %v272_v50  ;;  %v313_v47 = vld [vmem:[%s5609_s29 + $0x2e0] sm:$0xff]  ;;  %v979_v38 = vld [vmem:[%s5616_s7 + $0xbb0] sm:$0xff] }
 0x1d5   : > { %2897 = vmatprep.mubr.f32.mxu1 %v272_v50  ;;  %4245 = vmatpush1.bf16.msra.mxu0 %v4244_v51  ;;  %v326_v50 = vld [vmem:[%s5609_s29 + $0x348] sm:$0xff]  ;;  %v325_v51 = vld [vmem:[%s5609_s29 + $0x340] sm:$0xff]  ;;  %v4464_v40 = vpack.c.bf16 %v979_v38, %v975_v37  ;;  %v523_v37 = vld [vmem:[%s5609_s29 + $0x970] sm:$0xff] }
 0x1d6   : > { %4437 = vmatpush1.bf16.msra.mxu1 %v4436_v52  ;;  %4247 = vmatprep.subr.bf16.mxu0 %v4246_v53  ;;  %v332_v52 = vld [vmem:[%s5609_s29 + $0x378] sm:$0xff]  ;;  %v958_v53 = vld [vmem:[%s5616_s7 + $0xb08] sm:$0xff] }
 0x1d7   : > { %1551 = vmatmul.mubr.f32.gmra.mrb[16].mxu0 %v271_v61  ;;  %4439 = vmatprep.subr.bf16.mxu1 %v4438_v57  ;;  %v4262_v55 = vpack.c.bf16 %v962_v54, %v958_v53  ;;  %v964_v57 = vld [vmem:[%s5616_s7 + $0xb38] sm:$0xff]  ;;  %v981_v54 = vld [vmem:[%s5616_s7 + $0xbc0] sm:$0xff]  ;;  %v530_v38 = vld [vmem:[%s5609_s29 + $0x9a8] sm:$0xff] }
 0x1d8   : > { %2898 = vmatmul.mubr.f32.gmra.mrb[16].mxu1 %v271_v61  ;;  %1556 = vmatprep.mubr.f32.mxu0 %v278_v0  ;;  %v4454_v59 = vpack.c.bf16 %v964_v57, %v960_v56  ;;  %v959_v61 = vld [vmem:[%s5616_s7 + $0xb10] sm:$0xff]  ;;  %v988_v53 = vld [vmem:[%s5616_s7 + $0xbf8] sm:$0xff]  ;;  %v985_v56 = vld [vmem:[%s5616_s7 + $0xbe0] sm:$0xff] }
 0x1d9   : > { %2903 = vmatprep.mubr.f32.mxu1 %v278_v0  ;;  %4249 = vmatpush1.bf16.msra.mxu0 %v4248_v1  ;;  %v4456_v0 = vpack.c.bf16 %v963_v62, %v959_v61  ;;  %v331_v1 = vld [vmem:[%s5609_s29 + $0x370] sm:$0xff]  ;;  %v410_v62 = vld [vmem:[%s5609_s29 + $0x5e8] sm:$0xff] }
 0x1da   : > { %4441 = vmatpush1.bf16.msra.mxu1 %v4440_v2  ;;  %4251 = vmatprep.subr.bf16.mxu0 %v4250_v3  ;;  %v338_v2 = vld [vmem:[%s5609_s29 + $0x3a8] sm:$0xff]  ;;  %v337_v3 = vld [vmem:[%s5609_s29 + $0x3a0] sm:$0xff]  ;;  %v983_v57 = vld [vmem:[%s5616_s7 + $0xbd0] sm:$0xff] }
 0x1db   : > { %1557 = vmatmul.mubr.f32.gmra.mrb[18].mxu0 %v277_v11  ;;  %4443 = vmatprep.subr.bf16.mxu1 %v4442_v7  ;;  %v349_v7 = vld [vmem:[%s5609_s29 + $0x400] sm:$0xff]  ;;  %v4468_v60 = vpack.c.bf16 %v987_v58, %v983_v57  ;;  %v403_v61 = vld [vmem:[%s5609_s29 + $0x5b0] sm:$0xff]  ;;  %v590_v58 = vld [vmem:[%s5609_s29 + $0xb88] sm:$0xff] }
 0x1dc   : > { %2904 = vmatmul.mubr.f32.gmra.mrb[18].mxu1 %v277_v11  ;;  %1562 = vmatprep.mubr.f32.mxu0 %v284_v14  ;;  %v4266_v11 = vpack.c.bf16 %v970_v10, %v966_v9  ;;  %v439_v9 = vld [vmem:[%s5609_s29 + $0x6d0] sm:$0xff]  ;;  %v446_v10 = vld [vmem:[%s5609_s29 + $0x708] sm:$0xff] }
 0x1dd   : > { %2909 = vmatprep.mubr.f32.mxu1 %v284_v14  ;;  %4253 = vmatpush1.bf16.msra.mxu0 %v4252_v15  ;;  %v965_v14 = vld [vmem:[%s5616_s7 + $0xb40] sm:$0xff]  ;;  %v4458_v15 = vpack.c.bf16 %v972_v13, %v968_v12  ;;  %v452_v12 = vld [vmem:[%s5609_s29 + $0x738] sm:$0xff]  ;;  %v451_v13 = vld [vmem:[%s5609_s29 + $0x730] sm:$0xff] }
 0x1de   : > { %4445 = vmatpush1.bf16.msra.mxu1 %v4444_v16  ;;  %4255 = vmatprep.subr.bf16.mxu0 %v4254_v17  ;;  %v969_v16 = vld [vmem:[%s5616_s7 + $0xb60] sm:$0xff]  ;;  %v967_v17 = vld [vmem:[%s5616_s7 + $0xb50] sm:$0xff] }
 0x1df   : > { %1563 = vmatmul.mubr.f32.gmra.mrb[20].mxu0 %v283_v23  ;;  %4447 = vmatprep.subr.bf16.mxu1 %v4446_v20  ;;  %v4268_v19 = vpack.c.bf16 %v969_v16, %v965_v14  ;;  %v4460_v20 = vpack.c.bf16 %v971_v18, %v967_v17  ;;  %v458_v14 = vld [vmem:[%s5609_s29 + $0x768] sm:$0xff]  ;;  %v464_v16 = vld [vmem:[%s5609_s29 + $0x798] sm:$0xff]  ;;  %v463_v17 = vld [vmem:[%s5609_s29 + $0x790] sm:$0xff] }
 0x1e0   : > { %2910 = vmatmul.mubr.f32.gmra.mrb[20].mxu1 %v283_v23  ;;  %1568 = vmatprep.mubr.f32.mxu0 %v290_v24  ;;  %v361_v23 = vld [vmem:[%s5609_s29 + $0x460] sm:$0xff]  ;;  %v470_v18 = vld [vmem:[%s5609_s29 + $0x7c8] sm:$0xff]  ;;  %v583_v57 = vld [vmem:[%s5609_s29 + $0xb50] sm:$0xff] }
 0x1e1   : > { %2915 = vmatprep.mubr.f32.mxu1 %v290_v24  ;;  %4257 = vmatpush1.bf16.msra.mxu0 %v4256_v25  ;;  %v368_v24 = vld [vmem:[%s5609_s29 + $0x498] sm:$0xff]  ;;  %v367_v25 = vld [vmem:[%s5609_s29 + $0x490] sm:$0xff] }
 0x1e2   : > { %4449 = vmatpush1.bf16.msra.mxu1 %v4448_v26  ;;  %4259 = vmatprep.subr.bf16.mxu0 %v4258_v35  ;;  %v374_v26 = vld [vmem:[%s5609_s29 + $0x4c8] sm:$0xff] }
 0x1e3   : > { %1569 = vmatmul.mubr.f32.gmra.mrb[22].mxu0 %v289_v27  ;;  %4451 = vmatprep.subr.bf16.mxu1 %v4450_v39  ;;  %v4272_v39 = vpack.c.bf16 %v977_v36, %v973_v34  ;;  %v518_v34 = vld [vmem:[%s5609_s29 + $0x948] sm:$0xff]  ;;  %v524_v36 = vld [vmem:[%s5609_s29 + $0x978] sm:$0xff] }
 0x1e4   : > { %2916 = vmatmul.mubr.f32.gmra.mrb[22].mxu1 %v289_v27  ;;  %1574 = vmatprep.mubr.f32.mxu0 %v296_v28  ;;  %v373_v27 = vld [vmem:[%s5609_s29 + $0x4c0] sm:$0xff] }
 0x1e5   : > { %2921 = vmatprep.mubr.f32.mxu1 %v296_v28  ;;  %4261 = vmatpush1.bf16.msra.mxu0 %v4260_v43  ;;  %v380_v28 = vld [vmem:[%s5609_s29 + $0x4f8] sm:$0xff]  ;;  %v385_v43 = vld [vmem:[%s5609_s29 + $0x520] sm:$0xff] }
 0x1e6   : > { %4453 = vmatpush1.bf16.msra.mxu1 %v4452_v44  ;;  %4263 = vmatprep.subr.bf16.mxu0 %v4262_v55  ;;  %v392_v44 = vld [vmem:[%s5609_s29 + $0x558] sm:$0xff] }
 0x1e7   : > { %1575 = vmatmul.mubr.f32.gmra.mrb[24].mxu0 %v295_v29  ;;  %4455 = vmatprep.subr.bf16.mxu1 %v4454_v59  ;;  %v4276_v59 = vpack.c.bf16 %v985_v56, %v981_v54  ;;  %v578_v54 = vld [vmem:[%s5609_s29 + $0xb28] sm:$0xff]  ;;  %v584_v56 = vld [vmem:[%s5609_s29 + $0xb58] sm:$0xff] }
 0x1e8   : > { %2922 = vmatmul.mubr.f32.gmra.mrb[24].mxu1 %v295_v29  ;;  %1580 = vmatprep.mubr.f32.mxu0 %v302_v30  ;;  %v974_v29 = vld [vmem:[%s5616_s7 + $0xb88] sm:$0xff] }
 0x1e9   : > { %2927 = vmatprep.mubr.f32.mxu1 %v302_v30  ;;  %4265 = vmatpush1.bf16.msra.mxu0 %v4264_v63  ;;  %v978_v30 = vld [vmem:[%s5616_s7 + $0xba8] sm:$0xff]  ;;  %v409_v63 = vld [vmem:[%s5609_s29 + $0x5e0] sm:$0xff] }
 0x1ea   : > { %4457 = vmatpush1.bf16.msra.mxu1 %v4456_v0  ;;  %4267 = vmatprep.subr.bf16.mxu0 %v4266_v11  ;;  %v416_v0 = vld [vmem:[%s5609_s29 + $0x618] sm:$0xff]  ;;  %v445_v11 = vld [vmem:[%s5609_s29 + $0x700] sm:$0xff] }
 0x1eb   : > { %1581 = vmatmul.mubr.f32.gmra.mrb[26].mxu0 %v301_v31  ;;  %4459 = vmatprep.subr.bf16.mxu1 %v4458_v15  ;;  %v457_v15 = vld [vmem:[%s5609_s29 + $0x760] sm:$0xff] }
 0x1ec   : > { %2928 = vmatmul.mubr.f32.gmra.mrb[26].mxu1 %v301_v31  ;;  %1586 = vmatprep.mubr.f32.mxu0 %v308_v32  ;;  %v4270_v31 = vpack.c.bf16 %v978_v30, %v974_v29  ;;  %v499_v29 = vld [vmem:[%s5609_s29 + $0x8b0] sm:$0xff]  ;;  %v506_v30 = vld [vmem:[%s5609_s29 + $0x8e8] sm:$0xff] }
 0x1ed   : > { %2933 = vmatprep.mubr.f32.mxu1 %v308_v32  ;;  %4269 = vmatpush1.bf16.msra.mxu0 %v4268_v19  ;;  %v976_v32 = vld [vmem:[%s5616_s7 + $0xb98] sm:$0xff]  ;;  %v469_v19 = vld [vmem:[%s5609_s29 + $0x7c0] sm:$0xff] }
 0x1ee   : > { %4461 = vmatpush1.bf16.msra.mxu1 %v4460_v20  ;;  %v4462_v35 = vpack.c.bf16 %v980_v33, %v976_v32  ;;  %4271 = vmatprep.subr.bf16.mxu0 %v4270_v31  ;;  %v476_v20 = vld [vmem:[%s5609_s29 + $0x7f8] sm:$0xff]  ;;  %v505_v31 = vld [vmem:[%s5609_s29 + $0x8e0] sm:$0xff]  ;;  %v511_v33 = vld [vmem:[%s5609_s29 + $0x910] sm:$0xff] }
 0x1ef   : > { %1587 = vmatmul.mubr.f32.gmra.mrb[28].mxu0 %v307_v45  ;;  %v512_v32 = vld [vmem:[%s5609_s29 + $0x918] sm:$0xff] }
 0x1f0   : > { %2934 = vmatmul.mubr.f32.gmra.mrb[28].mxu1 %v307_v45  ;;  %1592 = vmatprep.mubr.f32.mxu0 %v314_v46  ;;  %v391_v45 = vld [vmem:[%s5609_s29 + $0x550] sm:$0xff] }
 0x1f1   : > { %2939 = vmatprep.mubr.f32.mxu1 %v314_v46  ;;  %4463 = vmatprep.subr.bf16.mxu1 %v4462_v35  ;;  %v398_v46 = vld [vmem:[%s5609_s29 + $0x588] sm:$0xff]  ;;  %v517_v35 = vld [vmem:[%s5609_s29 + $0x940] sm:$0xff] }
 0x1f2   : > { %4273 = vmatpush1.bf16.msra.mxu0 %v4272_v39  ;;  %4465 = vmatpush1.bf16.msra.mxu1 %v4464_v40  ;;  %v529_v39 = vld [vmem:[%s5609_s29 + $0x9a0] sm:$0xff]  ;;  %v536_v40 = vld [vmem:[%s5609_s29 + $0x9d8] sm:$0xff] }
 0x1f3   : > { %1593 = vmatmul.mubr.f32.gmra.mrb[30].mxu0 %v313_v47 }
 0x1f4   : > { %2940 = vmatmul.mubr.f32.gmra.mrb[30].mxu1 %v313_v47  ;;  %1598 = vmatprep.mubr.f32.mxu0 %v320_v48  ;;  %v397_v47 = vld [vmem:[%s5609_s29 + $0x580] sm:$0xff] }
 0x1f5   : > { %2945 = vmatprep.mubr.f32.mxu1 %v320_v48  ;;  %v404_v48 = vld [vmem:[%s5609_s29 + $0x5b8] sm:$0xff] }
 0x1f7   : > { %1599 = vmatmul.mubr.f32.gmra.mrb[32].mxu0 %v319_v49 }
 0x1f8   : > { %2946 = vmatmul.mubr.f32.gmra.mrb[32].mxu1 %v319_v49  ;;  %1604 = vmatprep.mubr.f32.mxu0 %v326_v50  ;;  %v982_v49 = vld [vmem:[%s5616_s7 + $0xbc8] sm:$0xff] }
 0x1f9   : > { %2951 = vmatprep.mubr.f32.mxu1 %v326_v50  ;;  %v986_v50 = vld [vmem:[%s5616_s7 + $0xbe8] sm:$0xff] }
 0x1fb   : > { %1605 = vmatmul.mubr.f32.gmra.mrb[34].mxu0 %v325_v51 }
 0x1fc   : > { %2952 = vmatmul.mubr.f32.gmra.mrb[34].mxu1 %v325_v51  ;;  %1610 = vmatprep.mubr.f32.mxu0 %v332_v52  ;;  %v4274_v51 = vpack.c.bf16 %v986_v50, %v982_v49  ;;  %v559_v49 = vld [vmem:[%s5609_s29 + $0xa90] sm:$0xff]  ;;  %v566_v50 = vld [vmem:[%s5609_s29 + $0xac8] sm:$0xff] }
 0x1fd   : > { %2957 = vmatprep.mubr.f32.mxu1 %v332_v52  ;;  %v984_v52 = vld [vmem:[%s5616_s7 + $0xbd8] sm:$0xff]  ;;  %s5192_s7 = scalar_lea.vmem %s5191_s2, 65536 }
 0x1fe   : > { %v4466_v55 = vpack.c.bf16 %v988_v53, %v984_v52  ;;  %4275 = vmatprep.subr.bf16.mxu0 %v4274_v51  ;;  %v565_v51 = vld [vmem:[%s5609_s29 + $0xac0] sm:$0xff]  ;;  %v572_v52 = vld [vmem:[%s5609_s29 + $0xaf8] sm:$0xff]  ;;  %v571_v53 = vld [vmem:[%s5609_s29 + $0xaf0] sm:$0xff]  ;;  %p5194_p10 = scmp.lt.s32.totalorder %s5192_s7, %s5186_s15 }
 0x1ff   : > { %1611 = vmatmul.mubr.f32.gmra.mrb[36].mxu0 %v331_v1 }
 0x200   : > { %2958 = vmatmul.mubr.f32.gmra.mrb[36].mxu1 %v331_v1  ;;  %1616 = vmatprep.mubr.f32.mxu0 %v338_v2  ;;  %v415_v1 = vld [vmem:[%s5609_s29 + $0x610] sm:$0xff]  ;;  %p5195_p8 = por %p5194_p10, %p5193_p4 }
 0x201   : > { %2963 = vmatprep.mubr.f32.mxu1 %v338_v2  ;;  %4467 = vmatprep.subr.bf16.mxu1 %v4466_v55  ;;  %v422_v2 = vld [vmem:[%s5609_s29 + $0x648] sm:$0xff]  ;;  %v577_v55 = vld [vmem:[%s5609_s29 + $0xb20] sm:$0xff] }
 0x202   : > { %4277 = vmatpush1.bf16.msra.mxu0 %v4276_v59  ;;  %4469 = vmatpush1.bf16.msra.mxu1 %v4468_v60  ;;  %v589_v59 = vld [vmem:[%s5609_s29 + $0xb80] sm:$0xff]  ;;  %v596_v60 = vld [vmem:[%s5609_s29 + $0xbb8] sm:$0xff]  ;;  %p5196_p11 = pnand %p5195_p8, %p5189_p0 }
 0x203   : > { %1617 = vmatmul.mubr.f32.gmra.mrb[38].mxu0 %v337_v3 }
 0x204   : > { %2964 = vmatmul.mubr.f32.gmra.mrb[38].mxu1 %v337_v3  ;;  %1622 = vmatprep.mubr.f32.mxu0 %v344_v4  ;;  %v421_v3 = vld [vmem:[%s5609_s29 + $0x640] sm:$0xff] }
 0x205   : > { %2969 = vmatprep.mubr.f32.mxu1 %v344_v4  ;;  %v428_v4 = vld [vmem:[%s5609_s29 + $0x678] sm:$0xff] }
 0x207   : > { %1623 = vmatmul.mubr.f32.gmra.mrb[40].mxu0 %v343_v5 }
 0x208   : > { %2970 = vmatmul.mubr.f32.gmra.mrb[40].mxu1 %v343_v5  ;;  %1628 = vmatprep.mubr.f32.mxu0 %v350_v6  ;;  %v427_v5 = vld [vmem:[%s5609_s29 + $0x670] sm:$0xff] }
 0x209   : > { %2975 = vmatprep.mubr.f32.mxu1 %v350_v6  ;;  %v434_v6 = vld [vmem:[%s5609_s29 + $0x6a8] sm:$0xff] }
 0x20b   : > { %1629 = vmatmul.mubr.f32.gmra.mrb[42].mxu0 %v349_v7 }
 0x20c   : > { %2976 = vmatmul.mubr.f32.gmra.mrb[42].mxu1 %v349_v7  ;;  %1634 = vmatprep.mubr.f32.mxu0 %v356_v8  ;;  %v433_v7 = vld [vmem:[%s5609_s29 + $0x6a0] sm:$0xff] }
 0x20d   : > { %2981 = vmatprep.mubr.f32.mxu1 %v356_v8  ;;  %v440_v8 = vld [vmem:[%s5609_s29 + $0x6d8] sm:$0xff] }
 0x20f   : > { %1635 = vmatmul.mubr.f32.gmra.mrb[44].mxu0 %v355_v21 }
 0x210   : > { %2982 = vmatmul.mubr.f32.gmra.mrb[44].mxu1 %v355_v21  ;;  %1640 = vmatprep.mubr.f32.mxu0 %v362_v22  ;;  %v475_v21 = vld [vmem:[%s5609_s29 + $0x7f0] sm:$0xff] }
 0x211   : > { %2987 = vmatprep.mubr.f32.mxu1 %v362_v22  ;;  %v482_v22 = vld [vmem:[%s5609_s29 + $0x828] sm:$0xff] }
 0x213   : > { %1641 = vmatmul.mubr.f32.gmra.mrb[46].mxu0 %v361_v23 }
 0x214   : > { %2988 = vmatmul.mubr.f32.gmra.mrb[46].mxu1 %v361_v23  ;;  %1646 = vmatprep.mubr.f32.mxu0 %v368_v24  ;;  %v481_v23 = vld [vmem:[%s5609_s29 + $0x820] sm:$0xff] }
 0x215   : > { %2993 = vmatprep.mubr.f32.mxu1 %v368_v24  ;;  %v488_v24 = vld [vmem:[%s5609_s29 + $0x858] sm:$0xff] }
 0x217   : > { %1647 = vmatmul.mubr.f32.gmra.mrb[48].mxu0 %v367_v25 }
 0x218   : > { %2994 = vmatmul.mubr.f32.gmra.mrb[48].mxu1 %v367_v25  ;;  %1652 = vmatprep.mubr.f32.mxu0 %v374_v26  ;;  %v487_v25 = vld [vmem:[%s5609_s29 + $0x850] sm:$0xff] }
 0x219   : > { %2999 = vmatprep.mubr.f32.mxu1 %v374_v26  ;;  %v494_v26 = vld [vmem:[%s5609_s29 + $0x888] sm:$0xff] }
 0x21b   : > { %1653 = vmatmul.mubr.f32.gmra.mrb[50].mxu0 %v373_v27 }
 0x21c   : > { %3000 = vmatmul.mubr.f32.gmra.mrb[50].mxu1 %v373_v27  ;;  %1658 = vmatprep.mubr.f32.mxu0 %v380_v28  ;;  %v493_v27 = vld [vmem:[%s5609_s29 + $0x880] sm:$0xff] }
 0x21d   : > { %3005 = vmatprep.mubr.f32.mxu1 %v380_v28  ;;  %v500_v28 = vld [vmem:[%s5609_s29 + $0x8b8] sm:$0xff] }
 0x21f   : > { %1659 = vmatmul.mubr.f32.gmra.mrb[52].mxu0 %v379_v41 }
 0x220   : > { %3006 = vmatmul.mubr.f32.gmra.mrb[52].mxu1 %v379_v41  ;;  %1664 = vmatprep.mubr.f32.mxu0 %v386_v42  ;;  %v535_v41 = vld [vmem:[%s5609_s29 + $0x9d0] sm:$0xff] }
 0x221   : > { %3011 = vmatprep.mubr.f32.mxu1 %v386_v42  ;;  %v542_v42 = vld [vmem:[%s5609_s29 + $0xa08] sm:$0xff] }
 0x223   : > { %1665 = vmatmul.mubr.f32.gmra.mrb[54].mxu0 %v385_v43 }
 0x224   : > { %3012 = vmatmul.mubr.f32.gmra.mrb[54].mxu1 %v385_v43  ;;  %1670 = vmatprep.mubr.f32.mxu0 %v392_v44  ;;  %v541_v43 = vld [vmem:[%s5609_s29 + $0xa00] sm:$0xff] }
 0x225   : > { %3017 = vmatprep.mubr.f32.mxu1 %v392_v44  ;;  %v548_v44 = vld [vmem:[%s5609_s29 + $0xa38] sm:$0xff] }
 0x227   : > { %1671 = vmatmul.mubr.f32.gmra.mrb[56].mxu0 %v391_v45 }
 0x228   : > { %3018 = vmatmul.mubr.f32.gmra.mrb[56].mxu1 %v391_v45  ;;  %1676 = vmatprep.mubr.f32.mxu0 %v398_v46  ;;  %v547_v45 = vld [vmem:[%s5609_s29 + $0xa30] sm:$0xff] }
 0x229   : > { %3023 = vmatprep.mubr.f32.mxu1 %v398_v46  ;;  %v554_v46 = vld [vmem:[%s5609_s29 + $0xa68] sm:$0xff] }
 0x22b   : > { %1677 = vmatmul.mubr.f32.gmra.mrb[58].mxu0 %v397_v47 }
 0x22c   : > { %3024 = vmatmul.mubr.f32.gmra.mrb[58].mxu1 %v397_v47  ;;  %1682 = vmatprep.mubr.f32.mxu0 %v404_v48  ;;  %v553_v47 = vld [vmem:[%s5609_s29 + $0xa60] sm:$0xff] }
 0x22d   : > { %3029 = vmatprep.mubr.f32.mxu1 %v404_v48  ;;  %v560_v48 = vld [vmem:[%s5609_s29 + $0xa98] sm:$0xff] }
 0x22f   : > { %1683 = vmatmul.mubr.f32.gmra.mrb[60].mxu0 %v403_v61 }
 0x230   : > { %3030 = vmatmul.mubr.f32.gmra.mrb[60].mxu1 %v403_v61  ;;  %1688 = vmatprep.mubr.f32.mxu0 %v410_v62  ;;  %v595_v61 = vld [vmem:[%s5609_s29 + $0xbb0] sm:$0xff] }
 0x231   : > { %3035 = vmatprep.mubr.f32.mxu1 %v410_v62  ;;  %v602_v62 = vld [vmem:[%s5609_s29 + $0xbe8] sm:$0xff] }
 0x233   : > { %1689 = vmatmul.mubr.f32.gmra.mrb[62].mxu0 %v409_v63 }
 0x234   : > { %3036 = vmatmul.mubr.f32.gmra.mrb[62].mxu1 %v409_v63  ;;  %1694 = vmatprep.mubr.f32.mxu0 %v416_v0  ;;  %v601_v63 = vld [vmem:[%s5609_s29 + $0xbe0] sm:$0xff] }
 0x235   : > { %3041 = vmatprep.mubr.f32.mxu1 %v416_v0  ;;  %v226_v0 = vld [vmem:[%s5609_s29 + $0x28] sm:$0xff] }
 0x237   : > { %1695 = vmatmul.mubr.f32.gmra.mrb[64].mxu0 %v415_v1 }
 0x238   : > { %3042 = vmatmul.mubr.f32.gmra.mrb[64].mxu1 %v415_v1  ;;  %1700 = vmatprep.mubr.f32.mxu0 %v422_v2  ;;  %v225_v1 = vld [vmem:[%s5609_s29 + $0x20] sm:$0xff] }
 0x239   : > { %3047 = vmatprep.mubr.f32.mxu1 %v422_v2  ;;  %v232_v2 = vld [vmem:[%s5609_s29 + $0x58] sm:$0xff] }
 0x23b   : > { %1701 = vmatmul.mubr.f32.gmra.mrb[66].mxu0 %v421_v3 }
 0x23c   : > { %3048 = vmatmul.mubr.f32.gmra.mrb[66].mxu1 %v421_v3  ;;  %1706 = vmatprep.mubr.f32.mxu0 %v428_v4  ;;  %v231_v3 = vld [vmem:[%s5609_s29 + $0x50] sm:$0xff] }
 0x23d   : > { %3053 = vmatprep.mubr.f32.mxu1 %v428_v4  ;;  %v238_v4 = vld [vmem:[%s5609_s29 + $0x88] sm:$0xff] }
 0x23f   : > { %1707 = vmatmul.mubr.f32.gmra.mrb[68].mxu0 %v427_v5 }
 0x240   : > { %3054 = vmatmul.mubr.f32.gmra.mrb[68].mxu1 %v427_v5  ;;  %1712 = vmatprep.mubr.f32.mxu0 %v434_v6  ;;  %v237_v5 = vld [vmem:[%s5609_s29 + $0x80] sm:$0xff] }
 0x241   : > { %3059 = vmatprep.mubr.f32.mxu1 %v434_v6  ;;  %v244_v6 = vld [vmem:[%s5609_s29 + $0xb8] sm:$0xff] }
 0x243   : > { %1713 = vmatmul.mubr.f32.gmra.mrb[70].mxu0 %v433_v7 }
 0x244   : > { %3060 = vmatmul.mubr.f32.gmra.mrb[70].mxu1 %v433_v7  ;;  %1718 = vmatprep.mubr.f32.mxu0 %v440_v8  ;;  %v243_v7 = vld [vmem:[%s5609_s29 + $0xb0] sm:$0xff] }
 0x245   : > { %3065 = vmatprep.mubr.f32.mxu1 %v440_v8  ;;  %v250_v8 = vld [vmem:[%s5609_s29 + $0xe8] sm:$0xff] }
 0x247   : > { %1719 = vmatmul.mubr.f32.gmra.mrb[72].mxu0 %v439_v9 }
 0x248   : > { %3066 = vmatmul.mubr.f32.gmra.mrb[72].mxu1 %v439_v9  ;;  %1724 = vmatprep.mubr.f32.mxu0 %v446_v10  ;;  %v249_v9 = vld [vmem:[%s5609_s29 + $0xe0] sm:$0xff] }
 0x249   : > { %3071 = vmatprep.mubr.f32.mxu1 %v446_v10  ;;  %v256_v10 = vld [vmem:[%s5609_s29 + $0x118] sm:$0xff] }
 0x24b   : > { %1725 = vmatmul.mubr.f32.gmra.mrb[74].mxu0 %v445_v11 }
 0x24c   : > { %3072 = vmatmul.mubr.f32.gmra.mrb[74].mxu1 %v445_v11  ;;  %1730 = vmatprep.mubr.f32.mxu0 %v452_v12  ;;  %v255_v11 = vld [vmem:[%s5609_s29 + $0x110] sm:$0xff] }
 0x24d   : > { %3077 = vmatprep.mubr.f32.mxu1 %v452_v12  ;;  %v262_v12 = vld [vmem:[%s5609_s29 + $0x148] sm:$0xff] }
 0x24f   : > { %1731 = vmatmul.mubr.f32.gmra.mrb[76].mxu0 %v451_v13 }
 0x250   : > { %3078 = vmatmul.mubr.f32.gmra.mrb[76].mxu1 %v451_v13  ;;  %1736 = vmatprep.mubr.f32.mxu0 %v458_v14  ;;  %v261_v13 = vld [vmem:[%s5609_s29 + $0x140] sm:$0xff] }
 0x251   : > { %3083 = vmatprep.mubr.f32.mxu1 %v458_v14  ;;  %v268_v14 = vld [vmem:[%s5609_s29 + $0x178] sm:$0xff] }
 0x253   : > { %1737 = vmatmul.mubr.f32.gmra.mrb[78].mxu0 %v457_v15 }
 0x254   : > { %3084 = vmatmul.mubr.f32.gmra.mrb[78].mxu1 %v457_v15  ;;  %1742 = vmatprep.mubr.f32.mxu0 %v464_v16  ;;  %v267_v15 = vld [vmem:[%s5609_s29 + $0x170] sm:$0xff] }
 0x255   : > { %3089 = vmatprep.mubr.f32.mxu1 %v464_v16  ;;  %v274_v16 = vld [vmem:[%s5609_s29 + $0x1a8] sm:$0xff] }
 0x257   : > { %1743 = vmatmul.mubr.f32.gmra.mrb[80].mxu0 %v463_v17 }
 0x258   : > { %3090 = vmatmul.mubr.f32.gmra.mrb[80].mxu1 %v463_v17  ;;  %1748 = vmatprep.mubr.f32.mxu0 %v470_v18  ;;  %v273_v17 = vld [vmem:[%s5609_s29 + $0x1a0] sm:$0xff] }
 0x259   : > { %3095 = vmatprep.mubr.f32.mxu1 %v470_v18  ;;  %v280_v18 = vld [vmem:[%s5609_s29 + $0x1d8] sm:$0xff] }
 0x25b   : > { %1749 = vmatmul.mubr.f32.gmra.mrb[82].mxu0 %v469_v19 }
 0x25c   : > { %3096 = vmatmul.mubr.f32.gmra.mrb[82].mxu1 %v469_v19  ;;  %1754 = vmatprep.mubr.f32.mxu0 %v476_v20  ;;  %v279_v19 = vld [vmem:[%s5609_s29 + $0x1d0] sm:$0xff] }
 0x25d   : > { %3101 = vmatprep.mubr.f32.mxu1 %v476_v20  ;;  %v286_v20 = vld [vmem:[%s5609_s29 + $0x208] sm:$0xff] }
 0x25f   : > { %1755 = vmatmul.mubr.f32.gmra.mrb[84].mxu0 %v475_v21 }
 0x260   : > { %3102 = vmatmul.mubr.f32.gmra.mrb[84].mxu1 %v475_v21  ;;  %1760 = vmatprep.mubr.f32.mxu0 %v482_v22  ;;  %v285_v21 = vld [vmem:[%s5609_s29 + $0x200] sm:$0xff] }
 0x261   : > { %3107 = vmatprep.mubr.f32.mxu1 %v482_v22  ;;  %v292_v22 = vld [vmem:[%s5609_s29 + $0x238] sm:$0xff] }
 0x263   : > { %1761 = vmatmul.mubr.f32.gmra.mrb[86].mxu0 %v481_v23 }
 0x264   : > { %3108 = vmatmul.mubr.f32.gmra.mrb[86].mxu1 %v481_v23  ;;  %1766 = vmatprep.mubr.f32.mxu0 %v488_v24  ;;  %v291_v23 = vld [vmem:[%s5609_s29 + $0x230] sm:$0xff] }
 0x265   : > { %3113 = vmatprep.mubr.f32.mxu1 %v488_v24  ;;  %v298_v24 = vld [vmem:[%s5609_s29 + $0x268] sm:$0xff] }
 0x267   : > { %1767 = vmatmul.mubr.f32.gmra.mrb[88].mxu0 %v487_v25 }
 0x268   : > { %3114 = vmatmul.mubr.f32.gmra.mrb[88].mxu1 %v487_v25  ;;  %1772 = vmatprep.mubr.f32.mxu0 %v494_v26  ;;  %v297_v25 = vld [vmem:[%s5609_s29 + $0x260] sm:$0xff] }
 0x269   : > { %3119 = vmatprep.mubr.f32.mxu1 %v494_v26  ;;  %v304_v26 = vld [vmem:[%s5609_s29 + $0x298] sm:$0xff] }
 0x26b   : > { %1773 = vmatmul.mubr.f32.gmra.mrb[90].mxu0 %v493_v27 }
 0x26c   : > { %3120 = vmatmul.mubr.f32.gmra.mrb[90].mxu1 %v493_v27  ;;  %1778 = vmatprep.mubr.f32.mxu0 %v500_v28  ;;  %v303_v27 = vld [vmem:[%s5609_s29 + $0x290] sm:$0xff] }
 0x26d   : > { %3125 = vmatprep.mubr.f32.mxu1 %v500_v28  ;;  %v310_v28 = vld [vmem:[%s5609_s29 + $0x2c8] sm:$0xff] }
 0x26f   : > { %1779 = vmatmul.mubr.f32.gmra.mrb[92].mxu0 %v499_v29 }
 0x270   : > { %3126 = vmatmul.mubr.f32.gmra.mrb[92].mxu1 %v499_v29  ;;  %1784 = vmatprep.mubr.f32.mxu0 %v506_v30  ;;  %v309_v29 = vld [vmem:[%s5609_s29 + $0x2c0] sm:$0xff] }
 0x271   : > { %3131 = vmatprep.mubr.f32.mxu1 %v506_v30  ;;  %v316_v30 = vld [vmem:[%s5609_s29 + $0x2f8] sm:$0xff] }
 0x273   : > { %1785 = vmatmul.mubr.f32.gmra.mrb[94].mxu0 %v505_v31 }
 0x274   : > { %3132 = vmatmul.mubr.f32.gmra.mrb[94].mxu1 %v505_v31  ;;  %1790 = vmatprep.mubr.f32.mxu0 %v512_v32  ;;  %v315_v31 = vld [vmem:[%s5609_s29 + $0x2f0] sm:$0xff] }
 0x275   : > { %3137 = vmatprep.mubr.f32.mxu1 %v512_v32  ;;  %v322_v32 = vld [vmem:[%s5609_s29 + $0x328] sm:$0xff] }
 0x277   : > { %1791 = vmatmul.mubr.f32.gmra.mrb[96].mxu0 %v511_v33 }
 0x278   : > { %3138 = vmatmul.mubr.f32.gmra.mrb[96].mxu1 %v511_v33  ;;  %1796 = vmatprep.mubr.f32.mxu0 %v518_v34  ;;  %v321_v33 = vld [vmem:[%s5609_s29 + $0x320] sm:$0xff] }
 0x279   : > { %3143 = vmatprep.mubr.f32.mxu1 %v518_v34  ;;  %v328_v34 = vld [vmem:[%s5609_s29 + $0x358] sm:$0xff] }
 0x27b   : > { %1797 = vmatmul.mubr.f32.gmra.mrb[98].mxu0 %v517_v35 }
 0x27c   : > { %3144 = vmatmul.mubr.f32.gmra.mrb[98].mxu1 %v517_v35  ;;  %1802 = vmatprep.mubr.f32.mxu0 %v524_v36  ;;  %v327_v35 = vld [vmem:[%s5609_s29 + $0x350] sm:$0xff] }
 0x27d   : > { %3149 = vmatprep.mubr.f32.mxu1 %v524_v36  ;;  %v334_v36 = vld [vmem:[%s5609_s29 + $0x388] sm:$0xff] }
 0x27f   : > { %1803 = vmatmul.mubr.f32.gmra.mrb[100].mxu0 %v523_v37 }
 0x280   : > { %3150 = vmatmul.mubr.f32.gmra.mrb[100].mxu1 %v523_v37  ;;  %1808 = vmatprep.mubr.f32.mxu0 %v530_v38  ;;  %v333_v37 = vld [vmem:[%s5609_s29 + $0x380] sm:$0xff] }
 0x281   : > { %3155 = vmatprep.mubr.f32.mxu1 %v530_v38  ;;  %v340_v38 = vld [vmem:[%s5609_s29 + $0x3b8] sm:$0xff] }
 0x283   : > { %1809 = vmatmul.mubr.f32.gmra.mrb[102].mxu0 %v529_v39 }
 0x284   : > { %3156 = vmatmul.mubr.f32.gmra.mrb[102].mxu1 %v529_v39  ;;  %1814 = vmatprep.mubr.f32.mxu0 %v536_v40  ;;  %v339_v39 = vld [vmem:[%s5609_s29 + $0x3b0] sm:$0xff] }
 0x285   : > { %3161 = vmatprep.mubr.f32.mxu1 %v536_v40  ;;  %v346_v40 = vld [vmem:[%s5609_s29 + $0x3e8] sm:$0xff] }
 0x287   : > { %1815 = vmatmul.mubr.f32.gmra.mrb[104].mxu0 %v535_v41 }
 0x288   : > { %3162 = vmatmul.mubr.f32.gmra.mrb[104].mxu1 %v535_v41  ;;  %1820 = vmatprep.mubr.f32.mxu0 %v542_v42  ;;  %v345_v41 = vld [vmem:[%s5609_s29 + $0x3e0] sm:$0xff] }
 0x289   : > { %3167 = vmatprep.mubr.f32.mxu1 %v542_v42  ;;  %v352_v42 = vld [vmem:[%s5609_s29 + $0x418] sm:$0xff] }
 0x28b   : > { %1821 = vmatmul.mubr.f32.gmra.mrb[106].mxu0 %v541_v43 }
 0x28c   : > { %3168 = vmatmul.mubr.f32.gmra.mrb[106].mxu1 %v541_v43  ;;  %1826 = vmatprep.mubr.f32.mxu0 %v548_v44  ;;  %v351_v43 = vld [vmem:[%s5609_s29 + $0x410] sm:$0xff] }
 0x28d   : > { %3173 = vmatprep.mubr.f32.mxu1 %v548_v44  ;;  %v358_v44 = vld [vmem:[%s5609_s29 + $0x448] sm:$0xff] }
 0x28f   : > { %1827 = vmatmul.mubr.f32.gmra.mrb[108].mxu0 %v547_v45 }
 0x290   : > { %3174 = vmatmul.mubr.f32.gmra.mrb[108].mxu1 %v547_v45  ;;  %1832 = vmatprep.mubr.f32.mxu0 %v554_v46  ;;  %v357_v45 = vld [vmem:[%s5609_s29 + $0x440] sm:$0xff] }
 0x291   : > { %3179 = vmatprep.mubr.f32.mxu1 %v554_v46  ;;  %v364_v46 = vld [vmem:[%s5609_s29 + $0x478] sm:$0xff] }
 0x293   : > { %1833 = vmatmul.mubr.f32.gmra.mrb[110].mxu0 %v553_v47 }
 0x294   : > { %3180 = vmatmul.mubr.f32.gmra.mrb[110].mxu1 %v553_v47  ;;  %1838 = vmatprep.mubr.f32.mxu0 %v560_v48  ;;  %v363_v47 = vld [vmem:[%s5609_s29 + $0x470] sm:$0xff] }
 0x295   : > { %3185 = vmatprep.mubr.f32.mxu1 %v560_v48  ;;  %v370_v48 = vld [vmem:[%s5609_s29 + $0x4a8] sm:$0xff] }
 0x297   : > { %1839 = vmatmul.mubr.f32.gmra.mrb[112].mxu0 %v559_v49 }
 0x298   : > { %3186 = vmatmul.mubr.f32.gmra.mrb[112].mxu1 %v559_v49  ;;  %1844 = vmatprep.mubr.f32.mxu0 %v566_v50  ;;  %v369_v49 = vld [vmem:[%s5609_s29 + $0x4a0] sm:$0xff] }
 0x299   : > { %3191 = vmatprep.mubr.f32.mxu1 %v566_v50  ;;  %v376_v50 = vld [vmem:[%s5609_s29 + $0x4d8] sm:$0xff] }
 0x29b   : > { %1845 = vmatmul.mubr.f32.gmra.mrb[114].mxu0 %v565_v51 }
 0x29c   : > { %3192 = vmatmul.mubr.f32.gmra.mrb[114].mxu1 %v565_v51  ;;  %1850 = vmatprep.mubr.f32.mxu0 %v572_v52  ;;  %v375_v51 = vld [vmem:[%s5609_s29 + $0x4d0] sm:$0xff] }
 0x29d   : > { %3197 = vmatprep.mubr.f32.mxu1 %v572_v52  ;;  %v382_v52 = vld [vmem:[%s5609_s29 + $0x508] sm:$0xff] }
 0x29f   : > { %1851 = vmatmul.mubr.f32.gmra.mrb[116].mxu0 %v571_v53 }
 0x2a0   : > { %3198 = vmatmul.mubr.f32.gmra.mrb[116].mxu1 %v571_v53  ;;  %1856 = vmatprep.mubr.f32.mxu0 %v578_v54  ;;  %v381_v53 = vld [vmem:[%s5609_s29 + $0x500] sm:$0xff] }
 0x2a1   : > { %3203 = vmatprep.mubr.f32.mxu1 %v578_v54  ;;  %v388_v54 = vld [vmem:[%s5609_s29 + $0x538] sm:$0xff] }
 0x2a3   : > { %1857 = vmatmul.mubr.f32.gmra.mrb[118].mxu0 %v577_v55 }
 0x2a4   : > { %3204 = vmatmul.mubr.f32.gmra.mrb[118].mxu1 %v577_v55  ;;  %1862 = vmatprep.mubr.f32.mxu0 %v584_v56  ;;  %v387_v55 = vld [vmem:[%s5609_s29 + $0x530] sm:$0xff] }
 0x2a5   : > { %3209 = vmatprep.mubr.f32.mxu1 %v584_v56  ;;  %v394_v56 = vld [vmem:[%s5609_s29 + $0x568] sm:$0xff] }
 0x2a7   : > { %1863 = vmatmul.mubr.f32.gmra.mrb[120].mxu0 %v583_v57 }
 0x2a8   : > { %3210 = vmatmul.mubr.f32.gmra.mrb[120].mxu1 %v583_v57  ;;  %1868 = vmatprep.mubr.f32.mxu0 %v590_v58  ;;  %v393_v57 = vld [vmem:[%s5609_s29 + $0x560] sm:$0xff] }
 0x2a9   : > { %3215 = vmatprep.mubr.f32.mxu1 %v590_v58  ;;  %v400_v58 = vld [vmem:[%s5609_s29 + $0x598] sm:$0xff] }
 0x2ab   : > { %1869 = vmatmul.mubr.f32.gmra.mrb[122].mxu0 %v589_v59 }
 0x2ac   : > { %3216 = vmatmul.mubr.f32.gmra.mrb[122].mxu1 %v589_v59  ;;  %1874 = vmatprep.mubr.f32.mxu0 %v596_v60  ;;  %v399_v59 = vld [vmem:[%s5609_s29 + $0x590] sm:$0xff] }
 0x2ad   : > { %3221 = vmatprep.mubr.f32.mxu1 %v596_v60  ;;  %v406_v60 = vld [vmem:[%s5609_s29 + $0x5c8] sm:$0xff] }
 0x2af   : > { %1875 = vmatmul.mubr.f32.gmra.mrb[124].mxu0 %v595_v61 }
 0x2b0   : > { %3222 = vmatmul.mubr.f32.gmra.mrb[124].mxu1 %v595_v61  ;;  %1880 = vmatprep.mubr.f32.mxu0 %v602_v62  ;;  %v405_v61 = vld [vmem:[%s5609_s29 + $0x5c0] sm:$0xff] }
 0x2b1   : > { %3227 = vmatprep.mubr.f32.mxu1 %v602_v62  ;;  %v412_v62 = vld [vmem:[%s5609_s29 + $0x5f8] sm:$0xff] }
 0x2b3   : > { %1881 = vmatmul.mubr.f32.gmra.mrb[126].mxu0 %v601_v63 }
 0x2b4   : > { %3228 = vmatmul.mubr.f32.gmra.mrb[126].mxu1 %v601_v63  ;;  %1951 = vmatprep.mubr.f32.mxu0 %v226_v0  ;;  %v411_v63 = vld [vmem:[%s5609_s29 + $0x5f0] sm:$0xff] }
 0x2b5   : > { %3298 = vmatprep.mubr.f32.mxu1 %v226_v0  ;;  %v418_v0 = vld [vmem:[%s5609_s29 + $0x628] sm:$0xff] }
 0x2b7   : > { %1952 = vmatmul.mubr.f32.vlgmr.msra.gmra.mrb[0].mxu0 %v225_v1 }
 0x2b8   : > { %3299 = vmatmul.mubr.f32.vlgmr.msra.gmra.mrb[0].mxu1 %v225_v1  ;;  %1957 = vmatprep.mubr.f32.mxu0 %v232_v2  ;;  %v417_v1 = vld [vmem:[%s5609_s29 + $0x620] sm:$0xff] }
 0x2b9   : > { %3304 = vmatprep.mubr.f32.mxu1 %v232_v2  ;;  %v424_v2 = vld [vmem:[%s5609_s29 + $0x658] sm:$0xff] }
 0x2bb   : > { %1958 = vmatmul.mubr.f32.gmra.mrb[2].mxu0 %v231_v3 }
 0x2bc   : > { %3305 = vmatmul.mubr.f32.gmra.mrb[2].mxu1 %v231_v3  ;;  %1963 = vmatprep.mubr.f32.mxu0 %v238_v4  ;;  %v423_v3 = vld [vmem:[%s5609_s29 + $0x650] sm:$0xff] }
 0x2bd   : > { %3310 = vmatprep.mubr.f32.mxu1 %v238_v4  ;;  %v430_v4 = vld [vmem:[%s5609_s29 + $0x688] sm:$0xff] }
 0x2bf   : > { %1964 = vmatmul.mubr.f32.gmra.mrb[4].mxu0 %v237_v5 }
 0x2c0   : > { %3311 = vmatmul.mubr.f32.gmra.mrb[4].mxu1 %v237_v5  ;;  %1969 = vmatprep.mubr.f32.mxu0 %v244_v6  ;;  %v429_v5 = vld [vmem:[%s5609_s29 + $0x680] sm:$0xff] }
 0x2c1   : > { %3316 = vmatprep.mubr.f32.mxu1 %v244_v6  ;;  %v436_v6 = vld [vmem:[%s5609_s29 + $0x6b8] sm:$0xff] }
 0x2c3   : > { %1970 = vmatmul.mubr.f32.gmra.mrb[6].mxu0 %v243_v7 }
 0x2c4   : > { %3317 = vmatmul.mubr.f32.gmra.mrb[6].mxu1 %v243_v7  ;;  %1975 = vmatprep.mubr.f32.mxu0 %v250_v8  ;;  %v435_v7 = vld [vmem:[%s5609_s29 + $0x6b0] sm:$0xff] }
 0x2c5   : > { %3322 = vmatprep.mubr.f32.mxu1 %v250_v8  ;;  %v442_v8 = vld [vmem:[%s5609_s29 + $0x6e8] sm:$0xff] }
 0x2c7   : > { %1976 = vmatmul.mubr.f32.gmra.mrb[8].mxu0 %v249_v9 }
 0x2c8   : > { %3323 = vmatmul.mubr.f32.gmra.mrb[8].mxu1 %v249_v9  ;;  %1981 = vmatprep.mubr.f32.mxu0 %v256_v10  ;;  %v441_v9 = vld [vmem:[%s5609_s29 + $0x6e0] sm:$0xff] }
 0x2c9   : > { %3328 = vmatprep.mubr.f32.mxu1 %v256_v10  ;;  %v448_v10 = vld [vmem:[%s5609_s29 + $0x718] sm:$0xff] }
 0x2cb   : > { %1982 = vmatmul.mubr.f32.gmra.mrb[10].mxu0 %v255_v11 }
 0x2cc   : > { %3329 = vmatmul.mubr.f32.gmra.mrb[10].mxu1 %v255_v11  ;;  %1987 = vmatprep.mubr.f32.mxu0 %v262_v12  ;;  %v447_v11 = vld [vmem:[%s5609_s29 + $0x710] sm:$0xff] }
 0x2cd   : > { %3334 = vmatprep.mubr.f32.mxu1 %v262_v12  ;;  %v454_v12 = vld [vmem:[%s5609_s29 + $0x748] sm:$0xff] }
 0x2cf   : > { %1988 = vmatmul.mubr.f32.gmra.mrb[12].mxu0 %v261_v13 }
 0x2d0   : > { %3335 = vmatmul.mubr.f32.gmra.mrb[12].mxu1 %v261_v13  ;;  %1993 = vmatprep.mubr.f32.mxu0 %v268_v14  ;;  %v453_v13 = vld [vmem:[%s5609_s29 + $0x740] sm:$0xff] }
 0x2d1   : > { %3340 = vmatprep.mubr.f32.mxu1 %v268_v14  ;;  %v460_v14 = vld [vmem:[%s5609_s29 + $0x778] sm:$0xff] }
 0x2d3   : > { %1994 = vmatmul.mubr.f32.gmra.mrb[14].mxu0 %v267_v15 }
 0x2d4   : > { %3341 = vmatmul.mubr.f32.gmra.mrb[14].mxu1 %v267_v15  ;;  %1999 = vmatprep.mubr.f32.mxu0 %v274_v16  ;;  %v459_v15 = vld [vmem:[%s5609_s29 + $0x770] sm:$0xff] }
 0x2d5   : > { %3346 = vmatprep.mubr.f32.mxu1 %v274_v16  ;;  %v466_v16 = vld [vmem:[%s5609_s29 + $0x7a8] sm:$0xff] }
 0x2d7   : > { %2000 = vmatmul.mubr.f32.gmra.mrb[16].mxu0 %v273_v17 }
 0x2d8   : > { %3347 = vmatmul.mubr.f32.gmra.mrb[16].mxu1 %v273_v17  ;;  %2005 = vmatprep.mubr.f32.mxu0 %v280_v18  ;;  %v465_v17 = vld [vmem:[%s5609_s29 + $0x7a0] sm:$0xff] }
 0x2d9   : > { %3352 = vmatprep.mubr.f32.mxu1 %v280_v18  ;;  %v472_v18 = vld [vmem:[%s5609_s29 + $0x7d8] sm:$0xff] }
 0x2db   : > { %2006 = vmatmul.mubr.f32.gmra.mrb[18].mxu0 %v279_v19 }
 0x2dc   : > { %3353 = vmatmul.mubr.f32.gmra.mrb[18].mxu1 %v279_v19  ;;  %2011 = vmatprep.mubr.f32.mxu0 %v286_v20  ;;  %v471_v19 = vld [vmem:[%s5609_s29 + $0x7d0] sm:$0xff] }
 0x2dd   : > { %3358 = vmatprep.mubr.f32.mxu1 %v286_v20  ;;  %v478_v20 = vld [vmem:[%s5609_s29 + $0x808] sm:$0xff] }
 0x2df   : > { %2012 = vmatmul.mubr.f32.gmra.mrb[20].mxu0 %v285_v21 }
 0x2e0   : > { %3359 = vmatmul.mubr.f32.gmra.mrb[20].mxu1 %v285_v21  ;;  %2017 = vmatprep.mubr.f32.mxu0 %v292_v22  ;;  %v477_v21 = vld [vmem:[%s5609_s29 + $0x800] sm:$0xff] }
 0x2e1   : > { %3364 = vmatprep.mubr.f32.mxu1 %v292_v22  ;;  %v484_v22 = vld [vmem:[%s5609_s29 + $0x838] sm:$0xff] }
 0x2e3   : > { %2018 = vmatmul.mubr.f32.gmra.mrb[22].mxu0 %v291_v23 }
 0x2e4   : > { %3365 = vmatmul.mubr.f32.gmra.mrb[22].mxu1 %v291_v23  ;;  %2023 = vmatprep.mubr.f32.mxu0 %v298_v24  ;;  %v483_v23 = vld [vmem:[%s5609_s29 + $0x830] sm:$0xff] }
 0x2e5   : > { %3370 = vmatprep.mubr.f32.mxu1 %v298_v24  ;;  %v490_v24 = vld [vmem:[%s5609_s29 + $0x868] sm:$0xff] }
 0x2e7   : > { %2024 = vmatmul.mubr.f32.gmra.mrb[24].mxu0 %v297_v25 }
 0x2e8   : > { %3371 = vmatmul.mubr.f32.gmra.mrb[24].mxu1 %v297_v25  ;;  %2029 = vmatprep.mubr.f32.mxu0 %v304_v26  ;;  %v489_v25 = vld [vmem:[%s5609_s29 + $0x860] sm:$0xff] }
 0x2e9   : > { %3376 = vmatprep.mubr.f32.mxu1 %v304_v26  ;;  %v496_v26 = vld [vmem:[%s5609_s29 + $0x898] sm:$0xff] }
 0x2eb   : > { %2030 = vmatmul.mubr.f32.gmra.mrb[26].mxu0 %v303_v27 }
 0x2ec   : > { %3377 = vmatmul.mubr.f32.gmra.mrb[26].mxu1 %v303_v27  ;;  %2035 = vmatprep.mubr.f32.mxu0 %v310_v28  ;;  %v495_v27 = vld [vmem:[%s5609_s29 + $0x890] sm:$0xff] }
 0x2ed   : > { %3382 = vmatprep.mubr.f32.mxu1 %v310_v28  ;;  %v502_v28 = vld [vmem:[%s5609_s29 + $0x8c8] sm:$0xff] }
 0x2ef   : > { %2036 = vmatmul.mubr.f32.gmra.mrb[28].mxu0 %v309_v29 }
 0x2f0   : > { %3383 = vmatmul.mubr.f32.gmra.mrb[28].mxu1 %v309_v29  ;;  %2041 = vmatprep.mubr.f32.mxu0 %v316_v30  ;;  %v501_v29 = vld [vmem:[%s5609_s29 + $0x8c0] sm:$0xff] }
 0x2f1   : > { %3388 = vmatprep.mubr.f32.mxu1 %v316_v30  ;;  %v508_v30 = vld [vmem:[%s5609_s29 + $0x8f8] sm:$0xff] }
 0x2f3   : > { %2042 = vmatmul.mubr.f32.gmra.mrb[30].mxu0 %v315_v31 }
 0x2f4   : > { %3389 = vmatmul.mubr.f32.gmra.mrb[30].mxu1 %v315_v31  ;;  %2047 = vmatprep.mubr.f32.mxu0 %v322_v32  ;;  %v507_v31 = vld [vmem:[%s5609_s29 + $0x8f0] sm:$0xff] }
 0x2f5   : > { %3394 = vmatprep.mubr.f32.mxu1 %v322_v32  ;;  %v514_v32 = vld [vmem:[%s5609_s29 + $0x928] sm:$0xff] }
 0x2f7   : > { %2048 = vmatmul.mubr.f32.gmra.mrb[32].mxu0 %v321_v33 }
 0x2f8   : > { %3395 = vmatmul.mubr.f32.gmra.mrb[32].mxu1 %v321_v33  ;;  %2053 = vmatprep.mubr.f32.mxu0 %v328_v34  ;;  %v513_v33 = vld [vmem:[%s5609_s29 + $0x920] sm:$0xff] }
 0x2f9   : > { %3400 = vmatprep.mubr.f32.mxu1 %v328_v34  ;;  %v520_v34 = vld [vmem:[%s5609_s29 + $0x958] sm:$0xff] }
 0x2fb   : > { %2054 = vmatmul.mubr.f32.gmra.mrb[34].mxu0 %v327_v35 }
 0x2fc   : > { %3401 = vmatmul.mubr.f32.gmra.mrb[34].mxu1 %v327_v35  ;;  %2059 = vmatprep.mubr.f32.mxu0 %v334_v36  ;;  %v519_v35 = vld [vmem:[%s5609_s29 + $0x950] sm:$0xff] }
 0x2fd   : > { %3406 = vmatprep.mubr.f32.mxu1 %v334_v36  ;;  %v526_v36 = vld [vmem:[%s5609_s29 + $0x988] sm:$0xff] }
 0x2ff   : > { %2060 = vmatmul.mubr.f32.gmra.mrb[36].mxu0 %v333_v37 }
 0x300   : > { %3407 = vmatmul.mubr.f32.gmra.mrb[36].mxu1 %v333_v37  ;;  %2065 = vmatprep.mubr.f32.mxu0 %v340_v38  ;;  %v525_v37 = vld [vmem:[%s5609_s29 + $0x980] sm:$0xff] }
 0x301   : > { %3412 = vmatprep.mubr.f32.mxu1 %v340_v38  ;;  %v532_v38 = vld [vmem:[%s5609_s29 + $0x9b8] sm:$0xff] }
 0x303   : > { %2066 = vmatmul.mubr.f32.gmra.mrb[38].mxu0 %v339_v39 }
 0x304   : > { %3413 = vmatmul.mubr.f32.gmra.mrb[38].mxu1 %v339_v39  ;;  %2071 = vmatprep.mubr.f32.mxu0 %v346_v40  ;;  %v531_v39 = vld [vmem:[%s5609_s29 + $0x9b0] sm:$0xff] }
 0x305   : > { %3418 = vmatprep.mubr.f32.mxu1 %v346_v40  ;;  %v538_v40 = vld [vmem:[%s5609_s29 + $0x9e8] sm:$0xff] }
 0x307   : > { %2072 = vmatmul.mubr.f32.gmra.mrb[40].mxu0 %v345_v41 }
 0x308   : > { %3419 = vmatmul.mubr.f32.gmra.mrb[40].mxu1 %v345_v41  ;;  %2077 = vmatprep.mubr.f32.mxu0 %v352_v42  ;;  %v537_v41 = vld [vmem:[%s5609_s29 + $0x9e0] sm:$0xff] }
 0x309   : > { %3424 = vmatprep.mubr.f32.mxu1 %v352_v42  ;;  %v544_v42 = vld [vmem:[%s5609_s29 + $0xa18] sm:$0xff] }
 0x30b   : > { %2078 = vmatmul.mubr.f32.gmra.mrb[42].mxu0 %v351_v43 }
 0x30c   : > { %3425 = vmatmul.mubr.f32.gmra.mrb[42].mxu1 %v351_v43  ;;  %2083 = vmatprep.mubr.f32.mxu0 %v358_v44  ;;  %v543_v43 = vld [vmem:[%s5609_s29 + $0xa10] sm:$0xff] }
 0x30d   : > { %3430 = vmatprep.mubr.f32.mxu1 %v358_v44  ;;  %v550_v44 = vld [vmem:[%s5609_s29 + $0xa48] sm:$0xff] }
 0x30f   : > { %2084 = vmatmul.mubr.f32.gmra.mrb[44].mxu0 %v357_v45 }
 0x310   : > { %3431 = vmatmul.mubr.f32.gmra.mrb[44].mxu1 %v357_v45  ;;  %2089 = vmatprep.mubr.f32.mxu0 %v364_v46 }
 0x311   : > { %3436 = vmatprep.mubr.f32.mxu1 %v364_v46 }
 0x313   : > { %2090 = vmatmul.mubr.f32.gmra.mrb[46].mxu0 %v363_v47 }
 0x314   : > { %3437 = vmatmul.mubr.f32.gmra.mrb[46].mxu1 %v363_v47  ;;  %2095 = vmatprep.mubr.f32.mxu0 %v370_v48 }
 0x315   : > { %3442 = vmatprep.mubr.f32.mxu1 %v370_v48 }
 0x317   : > { %2096 = vmatmul.mubr.f32.gmra.mrb[48].mxu0 %v369_v49 }
 0x318   : > { %3443 = vmatmul.mubr.f32.gmra.mrb[48].mxu1 %v369_v49  ;;  %2101 = vmatprep.mubr.f32.mxu0 %v376_v50  ;;  %v549_v49 = vld [vmem:[%s5609_s29 + $0xa40] sm:$0xff] }
 0x319   : > { %3448 = vmatprep.mubr.f32.mxu1 %v376_v50  ;;  %v556_v50 = vld [vmem:[%s5609_s29 + $0xa78] sm:$0xff] }
 0x31b   : > { %2102 = vmatmul.mubr.f32.gmra.mrb[50].mxu0 %v375_v51 }
 0x31c   : > { %3449 = vmatmul.mubr.f32.gmra.mrb[50].mxu1 %v375_v51  ;;  %2107 = vmatprep.mubr.f32.mxu0 %v382_v52 }
 0x31d   : > { %3454 = vmatprep.mubr.f32.mxu1 %v382_v52 }
 0x31f   : > { %2108 = vmatmul.mubr.f32.gmra.mrb[52].mxu0 %v381_v53 }
 0x320   : > { %3455 = vmatmul.mubr.f32.gmra.mrb[52].mxu1 %v381_v53  ;;  %2113 = vmatprep.mubr.f32.mxu0 %v388_v54 }
 0x321   : > { %3460 = vmatprep.mubr.f32.mxu1 %v388_v54 }
 0x323   : > { %2114 = vmatmul.mubr.f32.gmra.mrb[54].mxu0 %v387_v55 }
 0x324   : > { %3461 = vmatmul.mubr.f32.gmra.mrb[54].mxu1 %v387_v55  ;;  %2119 = vmatprep.mubr.f32.mxu0 %v394_v56  ;;  %v555_v55 = vld [vmem:[%s5609_s29 + $0xa70] sm:$0xff] }
 0x325   : > { %3466 = vmatprep.mubr.f32.mxu1 %v394_v56  ;;  %v562_v56 = vld [vmem:[%s5609_s29 + $0xaa8] sm:$0xff] }
 0x327   : > { %2120 = vmatmul.mubr.f32.gmra.mrb[56].mxu0 %v393_v57 }
 0x328   : > { %3467 = vmatmul.mubr.f32.gmra.mrb[56].mxu1 %v393_v57  ;;  %2125 = vmatprep.mubr.f32.mxu0 %v400_v58 }
 0x329   : > { %3472 = vmatprep.mubr.f32.mxu1 %v400_v58 }
 0x32b   : > { %2126 = vmatmul.mubr.f32.gmra.mrb[58].mxu0 %v399_v59 }
 0x32c   : > { %3473 = vmatmul.mubr.f32.gmra.mrb[58].mxu1 %v399_v59  ;;  %2131 = vmatprep.mubr.f32.mxu0 %v406_v60 }
 0x32d   : > { %3478 = vmatprep.mubr.f32.mxu1 %v406_v60 }
 0x32f   : > { %2132 = vmatmul.mubr.f32.gmra.mrb[60].mxu0 %v405_v61 }
 0x330   : > { %3479 = vmatmul.mubr.f32.gmra.mrb[60].mxu1 %v405_v61  ;;  %2137 = vmatprep.mubr.f32.mxu0 %v412_v62  ;;  %v561_v61 = vld [vmem:[%s5609_s29 + $0xaa0] sm:$0xff] }
 0x331   : > { %3484 = vmatprep.mubr.f32.mxu1 %v412_v62  ;;  %v568_v62 = vld [vmem:[%s5609_s29 + $0xad8] sm:$0xff] }
 0x333   : > { %2138 = vmatmul.mubr.f32.gmra.mrb[62].mxu0 %v411_v63 }
 0x334   : > { %3485 = vmatmul.mubr.f32.gmra.mrb[62].mxu1 %v411_v63  ;;  %2143 = vmatprep.mubr.f32.mxu0 %v418_v0 }
 0x335   : > { %3490 = vmatprep.mubr.f32.mxu1 %v418_v0 }
 0x337   : > { %2144 = vmatmul.mubr.f32.gmra.mrb[64].mxu0 %v417_v1 }
 0x338   : > { %3491 = vmatmul.mubr.f32.gmra.mrb[64].mxu1 %v417_v1  ;;  %2149 = vmatprep.mubr.f32.mxu0 %v424_v2 }
 0x339   : > { %3496 = vmatprep.mubr.f32.mxu1 %v424_v2 }
 0x33b   : > { %2150 = vmatmul.mubr.f32.gmra.mrb[66].mxu0 %v423_v3 }
 0x33c   : > { %3497 = vmatmul.mubr.f32.gmra.mrb[66].mxu1 %v423_v3  ;;  %2155 = vmatprep.mubr.f32.mxu0 %v430_v4  ;;  %v567_v3 = vld [vmem:[%s5609_s29 + $0xad0] sm:$0xff] }
 0x33d   : > { %3502 = vmatprep.mubr.f32.mxu1 %v430_v4  ;;  %v574_v4 = vld [vmem:[%s5609_s29 + $0xb08] sm:$0xff] }
 0x33f   : > { %2156 = vmatmul.mubr.f32.gmra.mrb[68].mxu0 %v429_v5 }
 0x340   : > { %3503 = vmatmul.mubr.f32.gmra.mrb[68].mxu1 %v429_v5  ;;  %2161 = vmatprep.mubr.f32.mxu0 %v436_v6 }
 0x341   : > { %3508 = vmatprep.mubr.f32.mxu1 %v436_v6 }
 0x343   : > { %2162 = vmatmul.mubr.f32.gmra.mrb[70].mxu0 %v435_v7 }
 0x344   : > { %3509 = vmatmul.mubr.f32.gmra.mrb[70].mxu1 %v435_v7  ;;  %2167 = vmatprep.mubr.f32.mxu0 %v442_v8 }
 0x345   : > { %3514 = vmatprep.mubr.f32.mxu1 %v442_v8 }
 0x347   : > { %2168 = vmatmul.mubr.f32.gmra.mrb[72].mxu0 %v441_v9 }
 0x348   : > { %3515 = vmatmul.mubr.f32.gmra.mrb[72].mxu1 %v441_v9  ;;  %2173 = vmatprep.mubr.f32.mxu0 %v448_v10  ;;  %v573_v9 = vld [vmem:[%s5609_s29 + $0xb00] sm:$0xff] }
 0x349   : > { %3520 = vmatprep.mubr.f32.mxu1 %v448_v10  ;;  %v580_v10 = vld [vmem:[%s5609_s29 + $0xb38] sm:$0xff] }
 0x34b   : > { %2174 = vmatmul.mubr.f32.gmra.mrb[74].mxu0 %v447_v11 }
 0x34c   : > { %3521 = vmatmul.mubr.f32.gmra.mrb[74].mxu1 %v447_v11  ;;  %2179 = vmatprep.mubr.f32.mxu0 %v454_v12 }
 0x34d   : > { %3526 = vmatprep.mubr.f32.mxu1 %v454_v12 }
 0x34f   : > { %2180 = vmatmul.mubr.f32.gmra.mrb[76].mxu0 %v453_v13 }
 0x350   : > { %3527 = vmatmul.mubr.f32.gmra.mrb[76].mxu1 %v453_v13  ;;  %2185 = vmatprep.mubr.f32.mxu0 %v460_v14 }
 0x351   : > { %3532 = vmatprep.mubr.f32.mxu1 %v460_v14 }
 0x353   : > { %2186 = vmatmul.mubr.f32.gmra.mrb[78].mxu0 %v459_v15 }
 0x354   : > { %3533 = vmatmul.mubr.f32.gmra.mrb[78].mxu1 %v459_v15  ;;  %2191 = vmatprep.mubr.f32.mxu0 %v466_v16  ;;  %v579_v15 = vld [vmem:[%s5609_s29 + $0xb30] sm:$0xff] }
 0x355   : > { %3538 = vmatprep.mubr.f32.mxu1 %v466_v16  ;;  %v586_v16 = vld [vmem:[%s5609_s29 + $0xb68] sm:$0xff] }
 0x357   : > { %2192 = vmatmul.mubr.f32.gmra.mrb[80].mxu0 %v465_v17 }
 0x358   : > { %3539 = vmatmul.mubr.f32.gmra.mrb[80].mxu1 %v465_v17  ;;  %2197 = vmatprep.mubr.f32.mxu0 %v472_v18 }
 0x359   : > { %3544 = vmatprep.mubr.f32.mxu1 %v472_v18 }
 0x35b   : > { %2198 = vmatmul.mubr.f32.gmra.mrb[82].mxu0 %v471_v19 }
 0x35c   : > { %3545 = vmatmul.mubr.f32.gmra.mrb[82].mxu1 %v471_v19  ;;  %2203 = vmatprep.mubr.f32.mxu0 %v478_v20 }
 0x35d   : > { %3550 = vmatprep.mubr.f32.mxu1 %v478_v20 }
 0x35f   : > { %2204 = vmatmul.mubr.f32.gmra.mrb[84].mxu0 %v477_v21 }
 0x360   : > { %3551 = vmatmul.mubr.f32.gmra.mrb[84].mxu1 %v477_v21  ;;  %2209 = vmatprep.mubr.f32.mxu0 %v484_v22  ;;  %v585_v21 = vld [vmem:[%s5609_s29 + $0xb60] sm:$0xff] }
 0x361   : > { %3556 = vmatprep.mubr.f32.mxu1 %v484_v22  ;;  %v592_v22 = vld [vmem:[%s5609_s29 + $0xb98] sm:$0xff] }
 0x363   : > { %2210 = vmatmul.mubr.f32.gmra.mrb[86].mxu0 %v483_v23 }
 0x364   : > { %3557 = vmatmul.mubr.f32.gmra.mrb[86].mxu1 %v483_v23  ;;  %2215 = vmatprep.mubr.f32.mxu0 %v490_v24 }
 0x365   : > { %3562 = vmatprep.mubr.f32.mxu1 %v490_v24 }
 0x367   : > { %2216 = vmatmul.mubr.f32.gmra.mrb[88].mxu0 %v489_v25 }
 0x368   : > { %3563 = vmatmul.mubr.f32.gmra.mrb[88].mxu1 %v489_v25  ;;  %2221 = vmatprep.mubr.f32.mxu0 %v496_v26 }
 0x369   : > { %3568 = vmatprep.mubr.f32.mxu1 %v496_v26 }
 0x36b   : > { %2222 = vmatmul.mubr.f32.gmra.mrb[90].mxu0 %v495_v27 }
 0x36c   : > { %3569 = vmatmul.mubr.f32.gmra.mrb[90].mxu1 %v495_v27  ;;  %2227 = vmatprep.mubr.f32.mxu0 %v502_v28  ;;  %v591_v27 = vld [vmem:[%s5609_s29 + $0xb90] sm:$0xff] }
 0x36d   : > { %3574 = vmatprep.mubr.f32.mxu1 %v502_v28  ;;  %v598_v28 = vld [vmem:[%s5609_s29 + $0xbc8] sm:$0xff] }
 0x36f   : > { %2228 = vmatmul.mubr.f32.gmra.mrb[92].mxu0 %v501_v29 }
 0x370   : > { %3575 = vmatmul.mubr.f32.gmra.mrb[92].mxu1 %v501_v29  ;;  %2233 = vmatprep.mubr.f32.mxu0 %v508_v30 }
 0x371   : > { %3580 = vmatprep.mubr.f32.mxu1 %v508_v30 }
 0x373   : > { %2234 = vmatmul.mubr.f32.gmra.mrb[94].mxu0 %v507_v31 }
 0x374   : > { %3581 = vmatmul.mubr.f32.gmra.mrb[94].mxu1 %v507_v31  ;;  %2239 = vmatprep.mubr.f32.mxu0 %v514_v32 }
 0x375   : > { %3586 = vmatprep.mubr.f32.mxu1 %v514_v32 }
 0x377   : > { %2240 = vmatmul.mubr.f32.gmra.mrb[96].mxu0 %v513_v33 }
 0x378   : > { %3587 = vmatmul.mubr.f32.gmra.mrb[96].mxu1 %v513_v33  ;;  %2245 = vmatprep.mubr.f32.mxu0 %v520_v34  ;;  %v597_v33 = vld [vmem:[%s5609_s29 + $0xbc0] sm:$0xff] }
 0x379   : > { %3592 = vmatprep.mubr.f32.mxu1 %v520_v34  ;;  %v604_v34 = vld [vmem:[%s5609_s29 + $0xbf8] sm:$0xff] }
 0x37b   : > { %2246 = vmatmul.mubr.f32.gmra.mrb[98].mxu0 %v519_v35 }
 0x37c   : > { %3593 = vmatmul.mubr.f32.gmra.mrb[98].mxu1 %v519_v35  ;;  %2251 = vmatprep.mubr.f32.mxu0 %v526_v36 }
 0x37d   : > { %3598 = vmatprep.mubr.f32.mxu1 %v526_v36 }
 0x37f   : > { %2252 = vmatmul.mubr.f32.gmra.mrb[100].mxu0 %v525_v37 }
 0x380   : > { %3599 = vmatmul.mubr.f32.gmra.mrb[100].mxu1 %v525_v37  ;;  %2257 = vmatprep.mubr.f32.mxu0 %v532_v38 }
 0x381   : > { %3604 = vmatprep.mubr.f32.mxu1 %v532_v38 }
 0x383   : > { %2258 = vmatmul.mubr.f32.gmra.mrb[102].mxu0 %v531_v39 }
 0x384   : > { %3605 = vmatmul.mubr.f32.gmra.mrb[102].mxu1 %v531_v39  ;;  %2263 = vmatprep.mubr.f32.mxu0 %v538_v40  ;;  %v603_v39 = vld [vmem:[%s5609_s29 + $0xbf0] sm:$0xff]  ;;  %s6663_s29 = scalar_lea.sflag [#allocation4], %s214_s28 }
 0x385   : > { %3610 = vmatprep.mubr.f32.mxu1 %v538_v40 }
 0x387   : > { %2264 = vmatmul.mubr.f32.gmra.mrb[104].mxu0 %v537_v41 }
 0x388   : > { %3611 = vmatmul.mubr.f32.gmra.mrb[104].mxu1 %v537_v41  ;;  %2269 = vmatprep.mubr.f32.mxu0 %v544_v42 }
 0x389   : > { %3616 = vmatprep.mubr.f32.mxu1 %v544_v42 }
 0x38a   : > { %v1953_v45 = vpop.f32.mrb[0].mxu0 }
 0x38b   : > { %3683 = vst [vmem:[%s6374_s12] sm:$0xff] %v1953_v45  ;;  %v3300_v46 = vpop.f32.mrb[0].mxu1  ;;  %v1955_v47 = vpop.f32.mrb[1].mxu0  ;;  %2270 = vmatmul.mubr.f32.gmra.mrb[106].mxu0 %v543_v43 }
 0x38c   : > { %3685 = vst [vmem:[%s6374_s12 + $0x10] sm:$0xff] %v3300_v46  ;;  %3684 = vst [vmem:[%s6374_s12 + $0x8] sm:$0xff] %v1955_v47  ;;  %v3302_v48 = vpop.f32.mrb[1].mxu1  ;;  %3617 = vmatmul.mubr.f32.gmra.mrb[106].mxu1 %v543_v43  ;;  %2275 = vmatprep.mubr.f32.mxu0 %v550_v44 }
 0x38d   : > { %3686 = vst [vmem:[%s6374_s12 + $0x18] sm:$0xff] %v3302_v48  ;;  %3622 = vmatprep.mubr.f32.mxu1 %v550_v44 }
 0x38e   : > { %v1959_v51 = vpop.f32.mrb[2].mxu0 }
 0x38f   : > { %3687 = vst [vmem:[%s6374_s12 + $0x20] sm:$0xff] %v1959_v51  ;;  %v3306_v52 = vpop.f32.mrb[2].mxu1  ;;  %v1961_v53 = vpop.f32.mrb[3].mxu0  ;;  %2276 = vmatmul.mubr.f32.gmra.mrb[108].mxu0 %v549_v49 }
 0x390   : > { %3689 = vst [vmem:[%s6374_s12 + $0x30] sm:$0xff] %v3306_v52  ;;  %3688 = vst [vmem:[%s6374_s12 + $0x28] sm:$0xff] %v1961_v53  ;;  %v3308_v54 = vpop.f32.mrb[3].mxu1  ;;  %3623 = vmatmul.mubr.f32.gmra.mrb[108].mxu1 %v549_v49  ;;  %2281 = vmatprep.mubr.f32.mxu0 %v556_v50 }
 0x391   : > { %3690 = vst [vmem:[%s6374_s12 + $0x38] sm:$0xff] %v3308_v54  ;;  %3628 = vmatprep.mubr.f32.mxu1 %v556_v50 }
 0x392   : > { %v1965_v57 = vpop.f32.mrb[4].mxu0 }
 0x393   : > { %3691 = vst [vmem:[%s6374_s12 + $0x40] sm:$0xff] %v1965_v57  ;;  %v3312_v58 = vpop.f32.mrb[4].mxu1  ;;  %v1967_v59 = vpop.f32.mrb[5].mxu0  ;;  %2282 = vmatmul.mubr.f32.gmra.mrb[110].mxu0 %v555_v55 }
 0x394   : > { %3693 = vst [vmem:[%s6374_s12 + $0x50] sm:$0xff] %v3312_v58  ;;  %3692 = vst [vmem:[%s6374_s12 + $0x48] sm:$0xff] %v1967_v59  ;;  %v3314_v60 = vpop.f32.mrb[5].mxu1  ;;  %3629 = vmatmul.mubr.f32.gmra.mrb[110].mxu1 %v555_v55  ;;  %2287 = vmatprep.mubr.f32.mxu0 %v562_v56 }
 0x395   : > { %3694 = vst [vmem:[%s6374_s12 + $0x58] sm:$0xff] %v3314_v60  ;;  %3634 = vmatprep.mubr.f32.mxu1 %v562_v56 }
 0x396   : > { %v1971_v63 = vpop.f32.mrb[6].mxu0 }
 0x397   : > { %3695 = vst [vmem:[%s6374_s12 + $0x60] sm:$0xff] %v1971_v63  ;;  %v3318_v0 = vpop.f32.mrb[6].mxu1  ;;  %v1973_v1 = vpop.f32.mrb[7].mxu0  ;;  %2288 = vmatmul.mubr.f32.gmra.mrb[112].mxu0 %v561_v61 }
 0x398   : > { %3697 = vst [vmem:[%s6374_s12 + $0x70] sm:$0xff] %v3318_v0  ;;  %3696 = vst [vmem:[%s6374_s12 + $0x68] sm:$0xff] %v1973_v1  ;;  %v3320_v2 = vpop.f32.mrb[7].mxu1  ;;  %3635 = vmatmul.mubr.f32.gmra.mrb[112].mxu1 %v561_v61  ;;  %2293 = vmatprep.mubr.f32.mxu0 %v568_v62 }
 0x399   : > { %3698 = vst [vmem:[%s6374_s12 + $0x78] sm:$0xff] %v3320_v2  ;;  %3640 = vmatprep.mubr.f32.mxu1 %v568_v62 }
 0x39a   : > { %v1977_v5 = vpop.f32.mrb[8].mxu0 }
 0x39b   : > { %3699 = vst [vmem:[%s6374_s12 + $0x80] sm:$0xff] %v1977_v5  ;;  %v3324_v6 = vpop.f32.mrb[8].mxu1  ;;  %v1979_v7 = vpop.f32.mrb[9].mxu0  ;;  %2294 = vmatmul.mubr.f32.gmra.mrb[114].mxu0 %v567_v3 }
 0x39c   : > { %3701 = vst [vmem:[%s6374_s12 + $0x90] sm:$0xff] %v3324_v6  ;;  %3700 = vst [vmem:[%s6374_s12 + $0x88] sm:$0xff] %v1979_v7  ;;  %v3326_v8 = vpop.f32.mrb[9].mxu1  ;;  %3641 = vmatmul.mubr.f32.gmra.mrb[114].mxu1 %v567_v3  ;;  %2299 = vmatprep.mubr.f32.mxu0 %v574_v4 }
 0x39d   : > { %3702 = vst [vmem:[%s6374_s12 + $0x98] sm:$0xff] %v3326_v8  ;;  %3646 = vmatprep.mubr.f32.mxu1 %v574_v4 }
 0x39e   : > { %v1983_v11 = vpop.f32.mrb[10].mxu0 }
 0x39f   : > { %3703 = vst [vmem:[%s6374_s12 + $0xa0] sm:$0xff] %v1983_v11  ;;  %v3330_v12 = vpop.f32.mrb[10].mxu1  ;;  %v1985_v13 = vpop.f32.mrb[11].mxu0  ;;  %2300 = vmatmul.mubr.f32.gmra.mrb[116].mxu0 %v573_v9 }
 0x3a0   : > { %3705 = vst [vmem:[%s6374_s12 + $0xb0] sm:$0xff] %v3330_v12  ;;  %3704 = vst [vmem:[%s6374_s12 + $0xa8] sm:$0xff] %v1985_v13  ;;  %v3332_v14 = vpop.f32.mrb[11].mxu1  ;;  %3647 = vmatmul.mubr.f32.gmra.mrb[116].mxu1 %v573_v9  ;;  %2305 = vmatprep.mubr.f32.mxu0 %v580_v10 }
 0x3a1   : > { %3706 = vst [vmem:[%s6374_s12 + $0xb8] sm:$0xff] %v3332_v14  ;;  %3652 = vmatprep.mubr.f32.mxu1 %v580_v10 }
 0x3a2   : > { %v1989_v17 = vpop.f32.mrb[12].mxu0 }
 0x3a3   : > { %3707 = vst [vmem:[%s6374_s12 + $0xc0] sm:$0xff] %v1989_v17  ;;  %v3336_v18 = vpop.f32.mrb[12].mxu1  ;;  %v1991_v19 = vpop.f32.mrb[13].mxu0  ;;  %2306 = vmatmul.mubr.f32.gmra.mrb[118].mxu0 %v579_v15 }
 0x3a4   : > { %3709 = vst [vmem:[%s6374_s12 + $0xd0] sm:$0xff] %v3336_v18  ;;  %3708 = vst [vmem:[%s6374_s12 + $0xc8] sm:$0xff] %v1991_v19  ;;  %v3338_v20 = vpop.f32.mrb[13].mxu1  ;;  %3653 = vmatmul.mubr.f32.gmra.mrb[118].mxu1 %v579_v15  ;;  %2311 = vmatprep.mubr.f32.mxu0 %v586_v16 }
 0x3a5   : > { %3710 = vst [vmem:[%s6374_s12 + $0xd8] sm:$0xff] %v3338_v20  ;;  %3658 = vmatprep.mubr.f32.mxu1 %v586_v16 }
 0x3a6   : > { %v1995_v23 = vpop.f32.mrb[14].mxu0 }
 0x3a7   : > { %3711 = vst [vmem:[%s6374_s12 + $0xe0] sm:$0xff] %v1995_v23  ;;  %v3342_v24 = vpop.f32.mrb[14].mxu1  ;;  %v1997_v25 = vpop.f32.mrb[15].mxu0  ;;  %2312 = vmatmul.mubr.f32.gmra.mrb[120].mxu0 %v585_v21 }
 0x3a8   : > { %3713 = vst [vmem:[%s6374_s12 + $0xf0] sm:$0xff] %v3342_v24  ;;  %3712 = vst [vmem:[%s6374_s12 + $0xe8] sm:$0xff] %v1997_v25  ;;  %v3344_v26 = vpop.f32.mrb[15].mxu1  ;;  %3659 = vmatmul.mubr.f32.gmra.mrb[120].mxu1 %v585_v21  ;;  %2317 = vmatprep.mubr.f32.mxu0 %v592_v22 }
 0x3a9   : > { %3714 = vst [vmem:[%s6374_s12 + $0xf8] sm:$0xff] %v3344_v26  ;;  %3664 = vmatprep.mubr.f32.mxu1 %v592_v22 }
 0x3aa   : > { %v2001_v29 = vpop.f32.mrb[16].mxu0 }
 0x3ab   : > { %3715 = vst [vmem:[%s6374_s12 + $0x100] sm:$0xff] %v2001_v29  ;;  %v3348_v30 = vpop.f32.mrb[16].mxu1  ;;  %v2003_v31 = vpop.f32.mrb[17].mxu0  ;;  %2318 = vmatmul.mubr.f32.gmra.mrb[122].mxu0 %v591_v27 }
 0x3ac   : > { %3717 = vst [vmem:[%s6374_s12 + $0x110] sm:$0xff] %v3348_v30  ;;  %3716 = vst [vmem:[%s6374_s12 + $0x108] sm:$0xff] %v2003_v31  ;;  %v3350_v32 = vpop.f32.mrb[17].mxu1  ;;  %3665 = vmatmul.mubr.f32.gmra.mrb[122].mxu1 %v591_v27  ;;  %2323 = vmatprep.mubr.f32.mxu0 %v598_v28 }
 0x3ad   : > { %3718 = vst [vmem:[%s6374_s12 + $0x118] sm:$0xff] %v3350_v32  ;;  %3670 = vmatprep.mubr.f32.mxu1 %v598_v28 }
 0x3ae   : > { %v2007_v35 = vpop.f32.mrb[18].mxu0 }
 0x3af   : > { %3719 = vst [vmem:[%s6374_s12 + $0x120] sm:$0xff] %v2007_v35  ;;  %v3354_v36 = vpop.f32.mrb[18].mxu1  ;;  %v2009_v37 = vpop.f32.mrb[19].mxu0  ;;  %2324 = vmatmul.mubr.f32.gmra.mrb[124].mxu0 %v597_v33 }
 0x3b0   : > { %3721 = vst [vmem:[%s6374_s12 + $0x130] sm:$0xff] %v3354_v36  ;;  %3720 = vst [vmem:[%s6374_s12 + $0x128] sm:$0xff] %v2009_v37  ;;  %v3356_v38 = vpop.f32.mrb[19].mxu1  ;;  %3671 = vmatmul.mubr.f32.gmra.mrb[124].mxu1 %v597_v33  ;;  %2329 = vmatprep.mubr.f32.mxu0 %v604_v34 }
 0x3b1   : > { %3722 = vst [vmem:[%s6374_s12 + $0x138] sm:$0xff] %v3356_v38  ;;  %3676 = vmatprep.mubr.f32.mxu1 %v604_v34 }
 0x3b2   : > { %v2013_v40 = vpop.f32.mrb[20].mxu0 }
 0x3b3   : > { %3723 = vst [vmem:[%s6374_s12 + $0x140] sm:$0xff] %v2013_v40  ;;  %v3360_v41 = vpop.f32.mrb[20].mxu1  ;;  %v2015_v42 = vpop.f32.mrb[21].mxu0  ;;  %2330 = vmatmul.mubr.f32.gmra.mrb[126].mxu0 %v603_v39 }
 0x3b4   : > { %3725 = vst [vmem:[%s6374_s12 + $0x150] sm:$0xff] %v3360_v41  ;;  %3724 = vst [vmem:[%s6374_s12 + $0x148] sm:$0xff] %v2015_v42  ;;  %v3362_v43 = vpop.f32.mrb[21].mxu1  ;;  %3677 = vmatmul.mubr.f32.gmra.mrb[126].mxu1 %v603_v39 }
 0x3b5   : > { %3726 = vst [vmem:[%s6374_s12 + $0x158] sm:$0xff] %v3362_v43 }
 0x3b6   : > { %v2019_v44 = vpop.f32.mrb[22].mxu0 }
 0x3b7   : > { %3727 = vst [vmem:[%s6374_s12 + $0x160] sm:$0xff] %v2019_v44  ;;  %v3366_v45 = vpop.f32.mrb[22].mxu1  ;;  %v2021_v46 = vpop.f32.mrb[23].mxu0 }
 0x3b8   : > { %3729 = vst [vmem:[%s6374_s12 + $0x170] sm:$0xff] %v3366_v45  ;;  %3728 = vst [vmem:[%s6374_s12 + $0x168] sm:$0xff] %v2021_v46  ;;  %v3368_v47 = vpop.f32.mrb[23].mxu1 }
 0x3b9   : > { %3730 = vst [vmem:[%s6374_s12 + $0x178] sm:$0xff] %v3368_v47 }
 0x3ba   : > { %v2025_v48 = vpop.f32.mrb[24].mxu0 }
 0x3bb   : > { %3731 = vst [vmem:[%s6374_s12 + $0x180] sm:$0xff] %v2025_v48  ;;  %v3372_v49 = vpop.f32.mrb[24].mxu1  ;;  %v2027_v50 = vpop.f32.mrb[25].mxu0 }
 0x3bc   : > { %3733 = vst [vmem:[%s6374_s12 + $0x190] sm:$0xff] %v3372_v49  ;;  %3732 = vst [vmem:[%s6374_s12 + $0x188] sm:$0xff] %v2027_v50  ;;  %v3374_v51 = vpop.f32.mrb[25].mxu1 }
 0x3bd   : > { %3734 = vst [vmem:[%s6374_s12 + $0x198] sm:$0xff] %v3374_v51 }
 0x3be   : > { %v2031_v52 = vpop.f32.mrb[26].mxu0 }
 0x3bf   : > { %3735 = vst [vmem:[%s6374_s12 + $0x1a0] sm:$0xff] %v2031_v52  ;;  %v3378_v53 = vpop.f32.mrb[26].mxu1  ;;  %v2033_v54 = vpop.f32.mrb[27].mxu0 }
 0x3c0   : > { %3737 = vst [vmem:[%s6374_s12 + $0x1b0] sm:$0xff] %v3378_v53  ;;  %3736 = vst [vmem:[%s6374_s12 + $0x1a8] sm:$0xff] %v2033_v54  ;;  %v3380_v55 = vpop.f32.mrb[27].mxu1 }
 0x3c1   : > { %3738 = vst [vmem:[%s6374_s12 + $0x1b8] sm:$0xff] %v3380_v55 }
 0x3c2   : > { %v2037_v56 = vpop.f32.mrb[28].mxu0 }
 0x3c3   : > { %3739 = vst [vmem:[%s6374_s12 + $0x1c0] sm:$0xff] %v2037_v56  ;;  %v3384_v57 = vpop.f32.mrb[28].mxu1  ;;  %v2039_v58 = vpop.f32.mrb[29].mxu0 }
 0x3c4   : > { %3741 = vst [vmem:[%s6374_s12 + $0x1d0] sm:$0xff] %v3384_v57  ;;  %3740 = vst [vmem:[%s6374_s12 + $0x1c8] sm:$0xff] %v2039_v58  ;;  %v3386_v59 = vpop.f32.mrb[29].mxu1 }
 0x3c5   : > { %3742 = vst [vmem:[%s6374_s12 + $0x1d8] sm:$0xff] %v3386_v59 }
 0x3c6   : > { %v2043_v60 = vpop.f32.mrb[30].mxu0 }
 0x3c7   : > { %3743 = vst [vmem:[%s6374_s12 + $0x1e0] sm:$0xff] %v2043_v60  ;;  %v3390_v61 = vpop.f32.mrb[30].mxu1  ;;  %v2045_v62 = vpop.f32.mrb[31].mxu0 }
 0x3c8   : > { %3745 = vst [vmem:[%s6374_s12 + $0x1f0] sm:$0xff] %v3390_v61  ;;  %3744 = vst [vmem:[%s6374_s12 + $0x1e8] sm:$0xff] %v2045_v62  ;;  %v3392_v63 = vpop.f32.mrb[31].mxu1 }
 0x3c9   : > { %3746 = vst [vmem:[%s6374_s12 + $0x1f8] sm:$0xff] %v3392_v63 }
 0x3ca   : > { %v2049_v0 = vpop.f32.mrb[32].mxu0 }
 0x3cb   : > { %3747 = vst [vmem:[%s6374_s12 + $0x200] sm:$0xff] %v2049_v0  ;;  %v3396_v1 = vpop.f32.mrb[32].mxu1  ;;  %v2051_v2 = vpop.f32.mrb[33].mxu0 }
 0x3cc   : > { %3749 = vst [vmem:[%s6374_s12 + $0x210] sm:$0xff] %v3396_v1  ;;  %3748 = vst [vmem:[%s6374_s12 + $0x208] sm:$0xff] %v2051_v2  ;;  %v3398_v3 = vpop.f32.mrb[33].mxu1 }
 0x3cd   : > { %3750 = vst [vmem:[%s6374_s12 + $0x218] sm:$0xff] %v3398_v3 }
 0x3ce   : > { %v2055_v4 = vpop.f32.mrb[34].mxu0 }
 0x3cf   : > { %3751 = vst [vmem:[%s6374_s12 + $0x220] sm:$0xff] %v2055_v4  ;;  %v3402_v5 = vpop.f32.mrb[34].mxu1  ;;  %v2057_v6 = vpop.f32.mrb[35].mxu0 }
 0x3d0   : > { %3753 = vst [vmem:[%s6374_s12 + $0x230] sm:$0xff] %v3402_v5  ;;  %3752 = vst [vmem:[%s6374_s12 + $0x228] sm:$0xff] %v2057_v6  ;;  %v3404_v7 = vpop.f32.mrb[35].mxu1 }
 0x3d1   : > { %3754 = vst [vmem:[%s6374_s12 + $0x238] sm:$0xff] %v3404_v7 }
 0x3d2   : > { %v2061_v8 = vpop.f32.mrb[36].mxu0 }
 0x3d3   : > { %3755 = vst [vmem:[%s6374_s12 + $0x240] sm:$0xff] %v2061_v8  ;;  %v3408_v9 = vpop.f32.mrb[36].mxu1  ;;  %v2063_v10 = vpop.f32.mrb[37].mxu0 }
 0x3d4   : > { %3757 = vst [vmem:[%s6374_s12 + $0x250] sm:$0xff] %v3408_v9  ;;  %3756 = vst [vmem:[%s6374_s12 + $0x248] sm:$0xff] %v2063_v10  ;;  %v3410_v11 = vpop.f32.mrb[37].mxu1 }
 0x3d5   : > { %3758 = vst [vmem:[%s6374_s12 + $0x258] sm:$0xff] %v3410_v11 }
 0x3d6   : > { %v2067_v12 = vpop.f32.mrb[38].mxu0 }
 0x3d7   : > { %3759 = vst [vmem:[%s6374_s12 + $0x260] sm:$0xff] %v2067_v12  ;;  %v3414_v13 = vpop.f32.mrb[38].mxu1  ;;  %v2069_v14 = vpop.f32.mrb[39].mxu0 }
 0x3d8   : > { %3761 = vst [vmem:[%s6374_s12 + $0x270] sm:$0xff] %v3414_v13  ;;  %3760 = vst [vmem:[%s6374_s12 + $0x268] sm:$0xff] %v2069_v14  ;;  %v3416_v15 = vpop.f32.mrb[39].mxu1 }
 0x3d9   : > { %3762 = vst [vmem:[%s6374_s12 + $0x278] sm:$0xff] %v3416_v15 }
 0x3da   : > { %v2073_v16 = vpop.f32.mrb[40].mxu0 }
 0x3db   : > { %3763 = vst [vmem:[%s6374_s12 + $0x280] sm:$0xff] %v2073_v16  ;;  %v3420_v17 = vpop.f32.mrb[40].mxu1  ;;  %v2075_v18 = vpop.f32.mrb[41].mxu0 }
 0x3dc   : > { %3765 = vst [vmem:[%s6374_s12 + $0x290] sm:$0xff] %v3420_v17  ;;  %3764 = vst [vmem:[%s6374_s12 + $0x288] sm:$0xff] %v2075_v18  ;;  %v3422_v19 = vpop.f32.mrb[41].mxu1 }
 0x3dd   : > { %3766 = vst [vmem:[%s6374_s12 + $0x298] sm:$0xff] %v3422_v19 }
 0x3de   : > { %v2079_v20 = vpop.f32.mrb[42].mxu0 }
 0x3df   : > { %3767 = vst [vmem:[%s6374_s12 + $0x2a0] sm:$0xff] %v2079_v20  ;;  %v3426_v21 = vpop.f32.mrb[42].mxu1  ;;  %v2081_v22 = vpop.f32.mrb[43].mxu0 }
 0x3e0   : > { %3769 = vst [vmem:[%s6374_s12 + $0x2b0] sm:$0xff] %v3426_v21  ;;  %3768 = vst [vmem:[%s6374_s12 + $0x2a8] sm:$0xff] %v2081_v22  ;;  %v3428_v23 = vpop.f32.mrb[43].mxu1 }
 0x3e1   : > { %3770 = vst [vmem:[%s6374_s12 + $0x2b8] sm:$0xff] %v3428_v23 }
 0x3e2   : > { %v2085_v24 = vpop.f32.mrb[44].mxu0 }
 0x3e3   : > { %3771 = vst [vmem:[%s6374_s12 + $0x2c0] sm:$0xff] %v2085_v24  ;;  %v3432_v25 = vpop.f32.mrb[44].mxu1  ;;  %v2087_v26 = vpop.f32.mrb[45].mxu0 }
 0x3e4   : > { %3773 = vst [vmem:[%s6374_s12 + $0x2d0] sm:$0xff] %v3432_v25  ;;  %3772 = vst [vmem:[%s6374_s12 + $0x2c8] sm:$0xff] %v2087_v26  ;;  %v3434_v27 = vpop.f32.mrb[45].mxu1 }
 0x3e5   : > { %3774 = vst [vmem:[%s6374_s12 + $0x2d8] sm:$0xff] %v3434_v27 }
 0x3e6   : > { %v2091_v28 = vpop.f32.mrb[46].mxu0 }
 0x3e7   : > { %3775 = vst [vmem:[%s6374_s12 + $0x2e0] sm:$0xff] %v2091_v28  ;;  %v3438_v29 = vpop.f32.mrb[46].mxu1  ;;  %v2093_v30 = vpop.f32.mrb[47].mxu0 }
 0x3e8   : > { %3777 = vst [vmem:[%s6374_s12 + $0x2f0] sm:$0xff] %v3438_v29  ;;  %3776 = vst [vmem:[%s6374_s12 + $0x2e8] sm:$0xff] %v2093_v30  ;;  %v3440_v31 = vpop.f32.mrb[47].mxu1 }
 0x3e9   : > { %3778 = vst [vmem:[%s6374_s12 + $0x2f8] sm:$0xff] %v3440_v31 }
 0x3ea   : > { %v2097_v32 = vpop.f32.mrb[48].mxu0 }
 0x3eb   : > { %3779 = vst [vmem:[%s6374_s12 + $0x300] sm:$0xff] %v2097_v32  ;;  %v3444_v33 = vpop.f32.mrb[48].mxu1  ;;  %v2099_v34 = vpop.f32.mrb[49].mxu0 }
 0x3ec   : > { %3781 = vst [vmem:[%s6374_s12 + $0x310] sm:$0xff] %v3444_v33  ;;  %3780 = vst [vmem:[%s6374_s12 + $0x308] sm:$0xff] %v2099_v34  ;;  %v3446_v35 = vpop.f32.mrb[49].mxu1 }
 0x3ed   : > { %3782 = vst [vmem:[%s6374_s12 + $0x318] sm:$0xff] %v3446_v35 }
 0x3ee   : > { %v2103_v36 = vpop.f32.mrb[50].mxu0 }
 0x3ef   : > { %3783 = vst [vmem:[%s6374_s12 + $0x320] sm:$0xff] %v2103_v36  ;;  %v3450_v37 = vpop.f32.mrb[50].mxu1  ;;  %v2105_v38 = vpop.f32.mrb[51].mxu0 }
 0x3f0   : > { %3785 = vst [vmem:[%s6374_s12 + $0x330] sm:$0xff] %v3450_v37  ;;  %3784 = vst [vmem:[%s6374_s12 + $0x328] sm:$0xff] %v2105_v38  ;;  %v3452_v39 = vpop.f32.mrb[51].mxu1 }
 0x3f1   : > { %3786 = vst [vmem:[%s6374_s12 + $0x338] sm:$0xff] %v3452_v39 }
 0x3f2   : > { %v2109_v40 = vpop.f32.mrb[52].mxu0 }
 0x3f3   : > { %3787 = vst [vmem:[%s6374_s12 + $0x340] sm:$0xff] %v2109_v40  ;;  %v3456_v41 = vpop.f32.mrb[52].mxu1  ;;  %v2111_v42 = vpop.f32.mrb[53].mxu0 }
 0x3f4   : > { %3789 = vst [vmem:[%s6374_s12 + $0x350] sm:$0xff] %v3456_v41  ;;  %3788 = vst [vmem:[%s6374_s12 + $0x348] sm:$0xff] %v2111_v42  ;;  %v3458_v43 = vpop.f32.mrb[53].mxu1 }
 0x3f5   : > { %3790 = vst [vmem:[%s6374_s12 + $0x358] sm:$0xff] %v3458_v43 }
 0x3f6   : > { %v2115_v44 = vpop.f32.mrb[54].mxu0 }
 0x3f7   : > { %3791 = vst [vmem:[%s6374_s12 + $0x360] sm:$0xff] %v2115_v44  ;;  %v3462_v45 = vpop.f32.mrb[54].mxu1  ;;  %v2117_v46 = vpop.f32.mrb[55].mxu0 }
 0x3f8   : > { %3793 = vst [vmem:[%s6374_s12 + $0x370] sm:$0xff] %v3462_v45  ;;  %3792 = vst [vmem:[%s6374_s12 + $0x368] sm:$0xff] %v2117_v46  ;;  %v3464_v47 = vpop.f32.mrb[55].mxu1 }
 0x3f9   : > { %3794 = vst [vmem:[%s6374_s12 + $0x378] sm:$0xff] %v3464_v47 }
 0x3fa   : > { %v2121_v48 = vpop.f32.mrb[56].mxu0 }
 0x3fb   : > { %3795 = vst [vmem:[%s6374_s12 + $0x380] sm:$0xff] %v2121_v48  ;;  %v3468_v49 = vpop.f32.mrb[56].mxu1  ;;  %v2123_v50 = vpop.f32.mrb[57].mxu0 }
 0x3fc   : > { %3797 = vst [vmem:[%s6374_s12 + $0x390] sm:$0xff] %v3468_v49  ;;  %3796 = vst [vmem:[%s6374_s12 + $0x388] sm:$0xff] %v2123_v50  ;;  %v3470_v51 = vpop.f32.mrb[57].mxu1 }
 0x3fd   : > { %3798 = vst [vmem:[%s6374_s12 + $0x398] sm:$0xff] %v3470_v51 }
 0x3fe   : > { %v2127_v52 = vpop.f32.mrb[58].mxu0 }
 0x3ff   : > { %3799 = vst [vmem:[%s6374_s12 + $0x3a0] sm:$0xff] %v2127_v52  ;;  %v3474_v53 = vpop.f32.mrb[58].mxu1  ;;  %v2129_v54 = vpop.f32.mrb[59].mxu0 }
 0x400   : > { %3801 = vst [vmem:[%s6374_s12 + $0x3b0] sm:$0xff] %v3474_v53  ;;  %3800 = vst [vmem:[%s6374_s12 + $0x3a8] sm:$0xff] %v2129_v54  ;;  %v3476_v55 = vpop.f32.mrb[59].mxu1 }
 0x401   : > { %3802 = vst [vmem:[%s6374_s12 + $0x3b8] sm:$0xff] %v3476_v55 }
 0x402   : > { %v2133_v56 = vpop.f32.mrb[60].mxu0 }
 0x403   : > { %3803 = vst [vmem:[%s6374_s12 + $0x3c0] sm:$0xff] %v2133_v56  ;;  %v3480_v57 = vpop.f32.mrb[60].mxu1  ;;  %v2135_v58 = vpop.f32.mrb[61].mxu0 }
 0x404   : > { %3805 = vst [vmem:[%s6374_s12 + $0x3d0] sm:$0xff] %v3480_v57  ;;  %3804 = vst [vmem:[%s6374_s12 + $0x3c8] sm:$0xff] %v2135_v58  ;;  %v3482_v59 = vpop.f32.mrb[61].mxu1 }
 0x405   : > { %3806 = vst [vmem:[%s6374_s12 + $0x3d8] sm:$0xff] %v3482_v59 }
 0x406   : > { %v2139_v60 = vpop.f32.mrb[62].mxu0 }
 0x407   : > { %3807 = vst [vmem:[%s6374_s12 + $0x3e0] sm:$0xff] %v2139_v60  ;;  %v3486_v61 = vpop.f32.mrb[62].mxu1  ;;  %v2141_v62 = vpop.f32.mrb[63].mxu0 }
 0x408   : > { %3809 = vst [vmem:[%s6374_s12 + $0x3f0] sm:$0xff] %v3486_v61  ;;  %3808 = vst [vmem:[%s6374_s12 + $0x3e8] sm:$0xff] %v2141_v62  ;;  %v3488_v63 = vpop.f32.mrb[63].mxu1 }
 0x409   : > { %3810 = vst [vmem:[%s6374_s12 + $0x3f8] sm:$0xff] %v3488_v63 }
 0x40a   : > { %v2145_v0 = vpop.f32.mrb[64].mxu0 }
 0x40b   : > { %3811 = vst [vmem:[%s6374_s12 + $0x400] sm:$0xff] %v2145_v0  ;;  %v3492_v1 = vpop.f32.mrb[64].mxu1  ;;  %v2147_v2 = vpop.f32.mrb[65].mxu0 }
 0x40c   : > { %3813 = vst [vmem:[%s6374_s12 + $0x410] sm:$0xff] %v3492_v1  ;;  %3812 = vst [vmem:[%s6374_s12 + $0x408] sm:$0xff] %v2147_v2  ;;  %v3494_v3 = vpop.f32.mrb[65].mxu1 }
 0x40d   : > { %3814 = vst [vmem:[%s6374_s12 + $0x418] sm:$0xff] %v3494_v3 }
 0x40e   : > { %v2151_v4 = vpop.f32.mrb[66].mxu0 }
 0x40f   : > { %3815 = vst [vmem:[%s6374_s12 + $0x420] sm:$0xff] %v2151_v4  ;;  %v3498_v5 = vpop.f32.mrb[66].mxu1  ;;  %v2153_v6 = vpop.f32.mrb[67].mxu0 }
 0x410   : > { %3817 = vst [vmem:[%s6374_s12 + $0x430] sm:$0xff] %v3498_v5  ;;  %3816 = vst [vmem:[%s6374_s12 + $0x428] sm:$0xff] %v2153_v6  ;;  %v3500_v7 = vpop.f32.mrb[67].mxu1 }
 0x411   : > { %3818 = vst [vmem:[%s6374_s12 + $0x438] sm:$0xff] %v3500_v7 }
 0x412   : > { %v2157_v8 = vpop.f32.mrb[68].mxu0 }
 0x413   : > { %3819 = vst [vmem:[%s6374_s12 + $0x440] sm:$0xff] %v2157_v8  ;;  %v3504_v9 = vpop.f32.mrb[68].mxu1  ;;  %v2159_v10 = vpop.f32.mrb[69].mxu0 }
 0x414   : > { %3821 = vst [vmem:[%s6374_s12 + $0x450] sm:$0xff] %v3504_v9  ;;  %3820 = vst [vmem:[%s6374_s12 + $0x448] sm:$0xff] %v2159_v10  ;;  %v3506_v11 = vpop.f32.mrb[69].mxu1 }
 0x415   : > { %3822 = vst [vmem:[%s6374_s12 + $0x458] sm:$0xff] %v3506_v11 }
 0x416   : > { %v2163_v12 = vpop.f32.mrb[70].mxu0 }
 0x417   : > { %3823 = vst [vmem:[%s6374_s12 + $0x460] sm:$0xff] %v2163_v12  ;;  %v3510_v13 = vpop.f32.mrb[70].mxu1  ;;  %v2165_v14 = vpop.f32.mrb[71].mxu0 }
 0x418   : > { %3825 = vst [vmem:[%s6374_s12 + $0x470] sm:$0xff] %v3510_v13  ;;  %3824 = vst [vmem:[%s6374_s12 + $0x468] sm:$0xff] %v2165_v14  ;;  %v3512_v15 = vpop.f32.mrb[71].mxu1 }
 0x419   : > { %3826 = vst [vmem:[%s6374_s12 + $0x478] sm:$0xff] %v3512_v15 }
 0x41a   : > { %v2169_v16 = vpop.f32.mrb[72].mxu0 }
 0x41b   : > { %3827 = vst [vmem:[%s6374_s12 + $0x480] sm:$0xff] %v2169_v16  ;;  %v3516_v17 = vpop.f32.mrb[72].mxu1  ;;  %v2171_v18 = vpop.f32.mrb[73].mxu0 }
 0x41c   : > { %3829 = vst [vmem:[%s6374_s12 + $0x490] sm:$0xff] %v3516_v17  ;;  %3828 = vst [vmem:[%s6374_s12 + $0x488] sm:$0xff] %v2171_v18  ;;  %v3518_v19 = vpop.f32.mrb[73].mxu1 }
 0x41d   : > { %3830 = vst [vmem:[%s6374_s12 + $0x498] sm:$0xff] %v3518_v19 }
 0x41e   : > { %v2175_v20 = vpop.f32.mrb[74].mxu0 }
 0x41f   : > { %3831 = vst [vmem:[%s6374_s12 + $0x4a0] sm:$0xff] %v2175_v20  ;;  %v3522_v21 = vpop.f32.mrb[74].mxu1  ;;  %v2177_v22 = vpop.f32.mrb[75].mxu0 }
 0x420   : > { %3833 = vst [vmem:[%s6374_s12 + $0x4b0] sm:$0xff] %v3522_v21  ;;  %3832 = vst [vmem:[%s6374_s12 + $0x4a8] sm:$0xff] %v2177_v22  ;;  %v3524_v23 = vpop.f32.mrb[75].mxu1 }
 0x421   : > { %3834 = vst [vmem:[%s6374_s12 + $0x4b8] sm:$0xff] %v3524_v23 }
 0x422   : > { %v2181_v24 = vpop.f32.mrb[76].mxu0 }
 0x423   : > { %3835 = vst [vmem:[%s6374_s12 + $0x4c0] sm:$0xff] %v2181_v24  ;;  %v3528_v25 = vpop.f32.mrb[76].mxu1  ;;  %v2183_v26 = vpop.f32.mrb[77].mxu0 }
 0x424   : > { %3837 = vst [vmem:[%s6374_s12 + $0x4d0] sm:$0xff] %v3528_v25  ;;  %3836 = vst [vmem:[%s6374_s12 + $0x4c8] sm:$0xff] %v2183_v26  ;;  %v3530_v27 = vpop.f32.mrb[77].mxu1 }
 0x425   : > { %3838 = vst [vmem:[%s6374_s12 + $0x4d8] sm:$0xff] %v3530_v27 }
 0x426   : > { %v2187_v28 = vpop.f32.mrb[78].mxu0 }
 0x427   : > { %3839 = vst [vmem:[%s6374_s12 + $0x4e0] sm:$0xff] %v2187_v28  ;;  %v3534_v29 = vpop.f32.mrb[78].mxu1  ;;  %v2189_v30 = vpop.f32.mrb[79].mxu0 }
 0x428   : > { %3841 = vst [vmem:[%s6374_s12 + $0x4f0] sm:$0xff] %v3534_v29  ;;  %3840 = vst [vmem:[%s6374_s12 + $0x4e8] sm:$0xff] %v2189_v30  ;;  %v3536_v31 = vpop.f32.mrb[79].mxu1 }
 0x429   : > { %3842 = vst [vmem:[%s6374_s12 + $0x4f8] sm:$0xff] %v3536_v31 }
 0x42a   : > { %v2193_v32 = vpop.f32.mrb[80].mxu0 }
 0x42b   : > { %3843 = vst [vmem:[%s6374_s12 + $0x500] sm:$0xff] %v2193_v32  ;;  %v3540_v33 = vpop.f32.mrb[80].mxu1  ;;  %v2195_v34 = vpop.f32.mrb[81].mxu0 }
 0x42c   : > { %3845 = vst [vmem:[%s6374_s12 + $0x510] sm:$0xff] %v3540_v33  ;;  %3844 = vst [vmem:[%s6374_s12 + $0x508] sm:$0xff] %v2195_v34  ;;  %v3542_v35 = vpop.f32.mrb[81].mxu1 }
 0x42d   : > { %3846 = vst [vmem:[%s6374_s12 + $0x518] sm:$0xff] %v3542_v35 }
 0x42e   : > { %v2199_v36 = vpop.f32.mrb[82].mxu0 }
 0x42f   : > { %3847 = vst [vmem:[%s6374_s12 + $0x520] sm:$0xff] %v2199_v36  ;;  %v3546_v37 = vpop.f32.mrb[82].mxu1  ;;  %v2201_v38 = vpop.f32.mrb[83].mxu0 }
 0x430   : > { %3849 = vst [vmem:[%s6374_s12 + $0x530] sm:$0xff] %v3546_v37  ;;  %3848 = vst [vmem:[%s6374_s12 + $0x528] sm:$0xff] %v2201_v38  ;;  %v3548_v39 = vpop.f32.mrb[83].mxu1 }
 0x431   : > { %3850 = vst [vmem:[%s6374_s12 + $0x538] sm:$0xff] %v3548_v39 }
 0x432   : > { %v2205_v40 = vpop.f32.mrb[84].mxu0 }
 0x433   : > { %3851 = vst [vmem:[%s6374_s12 + $0x540] sm:$0xff] %v2205_v40  ;;  %v3552_v41 = vpop.f32.mrb[84].mxu1  ;;  %v2207_v42 = vpop.f32.mrb[85].mxu0 }
 0x434   : > { %3853 = vst [vmem:[%s6374_s12 + $0x550] sm:$0xff] %v3552_v41  ;;  %3852 = vst [vmem:[%s6374_s12 + $0x548] sm:$0xff] %v2207_v42  ;;  %v3554_v43 = vpop.f32.mrb[85].mxu1 }
 0x435   : > { %3854 = vst [vmem:[%s6374_s12 + $0x558] sm:$0xff] %v3554_v43 }
 0x436   : > { %v2211_v44 = vpop.f32.mrb[86].mxu0 }
 0x437   : > { %3855 = vst [vmem:[%s6374_s12 + $0x560] sm:$0xff] %v2211_v44  ;;  %v3558_v45 = vpop.f32.mrb[86].mxu1  ;;  %v2213_v46 = vpop.f32.mrb[87].mxu0 }
 0x438   : > { %3857 = vst [vmem:[%s6374_s12 + $0x570] sm:$0xff] %v3558_v45  ;;  %3856 = vst [vmem:[%s6374_s12 + $0x568] sm:$0xff] %v2213_v46  ;;  %v3560_v47 = vpop.f32.mrb[87].mxu1 }
 0x439   : > { %3858 = vst [vmem:[%s6374_s12 + $0x578] sm:$0xff] %v3560_v47 }
 0x43a   : > { %v2217_v48 = vpop.f32.mrb[88].mxu0 }
 0x43b   : > { %3859 = vst [vmem:[%s6374_s12 + $0x580] sm:$0xff] %v2217_v48  ;;  %v3564_v49 = vpop.f32.mrb[88].mxu1  ;;  %v2219_v50 = vpop.f32.mrb[89].mxu0 }
 0x43c   : > { %3861 = vst [vmem:[%s6374_s12 + $0x590] sm:$0xff] %v3564_v49  ;;  %3860 = vst [vmem:[%s6374_s12 + $0x588] sm:$0xff] %v2219_v50  ;;  %v3566_v51 = vpop.f32.mrb[89].mxu1 }
 0x43d   : > { %3862 = vst [vmem:[%s6374_s12 + $0x598] sm:$0xff] %v3566_v51 }
 0x43e   : > { %v2223_v52 = vpop.f32.mrb[90].mxu0 }
 0x43f   : > { %3863 = vst [vmem:[%s6374_s12 + $0x5a0] sm:$0xff] %v2223_v52  ;;  %v3570_v53 = vpop.f32.mrb[90].mxu1  ;;  %v2225_v54 = vpop.f32.mrb[91].mxu0 }
 0x440   : > { %3865 = vst [vmem:[%s6374_s12 + $0x5b0] sm:$0xff] %v3570_v53  ;;  %3864 = vst [vmem:[%s6374_s12 + $0x5a8] sm:$0xff] %v2225_v54  ;;  %v3572_v55 = vpop.f32.mrb[91].mxu1 }
 0x441   : > { %3866 = vst [vmem:[%s6374_s12 + $0x5b8] sm:$0xff] %v3572_v55 }
 0x442   : > { %v2229_v56 = vpop.f32.mrb[92].mxu0 }
 0x443   : > { %3867 = vst [vmem:[%s6374_s12 + $0x5c0] sm:$0xff] %v2229_v56  ;;  %v3576_v57 = vpop.f32.mrb[92].mxu1  ;;  %v2231_v58 = vpop.f32.mrb[93].mxu0 }
 0x444   : > { %3869 = vst [vmem:[%s6374_s12 + $0x5d0] sm:$0xff] %v3576_v57  ;;  %3868 = vst [vmem:[%s6374_s12 + $0x5c8] sm:$0xff] %v2231_v58  ;;  %v3578_v59 = vpop.f32.mrb[93].mxu1 }
 0x445   : > { %3870 = vst [vmem:[%s6374_s12 + $0x5d8] sm:$0xff] %v3578_v59 }
 0x446   : > { %v2235_v60 = vpop.f32.mrb[94].mxu0 }
 0x447   : > { %3871 = vst [vmem:[%s6374_s12 + $0x5e0] sm:$0xff] %v2235_v60  ;;  %v3582_v61 = vpop.f32.mrb[94].mxu1  ;;  %v2237_v62 = vpop.f32.mrb[95].mxu0 }
 0x448   : > { %3873 = vst [vmem:[%s6374_s12 + $0x5f0] sm:$0xff] %v3582_v61  ;;  %3872 = vst [vmem:[%s6374_s12 + $0x5e8] sm:$0xff] %v2237_v62  ;;  %v3584_v63 = vpop.f32.mrb[95].mxu1 }
 0x449   : > { %3874 = vst [vmem:[%s6374_s12 + $0x5f8] sm:$0xff] %v3584_v63 }
 0x44a   : > { %v2241_v0 = vpop.f32.mrb[96].mxu0 }
 0x44b   : > { %3875 = vst [vmem:[%s6374_s12 + $0x600] sm:$0xff] %v2241_v0  ;;  %v3588_v1 = vpop.f32.mrb[96].mxu1  ;;  %v2243_v2 = vpop.f32.mrb[97].mxu0 }
 0x44c   : > { %3877 = vst [vmem:[%s6374_s12 + $0x610] sm:$0xff] %v3588_v1  ;;  %3876 = vst [vmem:[%s6374_s12 + $0x608] sm:$0xff] %v2243_v2  ;;  %v3590_v3 = vpop.f32.mrb[97].mxu1 }
 0x44d   : > { %3878 = vst [vmem:[%s6374_s12 + $0x618] sm:$0xff] %v3590_v3 }
 0x44e   : > { %v2247_v4 = vpop.f32.mrb[98].mxu0 }
 0x44f   : > { %3879 = vst [vmem:[%s6374_s12 + $0x620] sm:$0xff] %v2247_v4  ;;  %v3594_v5 = vpop.f32.mrb[98].mxu1  ;;  %v2249_v6 = vpop.f32.mrb[99].mxu0 }
 0x450   : > { %3881 = vst [vmem:[%s6374_s12 + $0x630] sm:$0xff] %v3594_v5  ;;  %3880 = vst [vmem:[%s6374_s12 + $0x628] sm:$0xff] %v2249_v6  ;;  %v3596_v7 = vpop.f32.mrb[99].mxu1 }
 0x451   : > { %3882 = vst [vmem:[%s6374_s12 + $0x638] sm:$0xff] %v3596_v7 }
 0x452   : > { %v2253_v8 = vpop.f32.mrb[100].mxu0 }
 0x453   : > { %3883 = vst [vmem:[%s6374_s12 + $0x640] sm:$0xff] %v2253_v8  ;;  %v3600_v9 = vpop.f32.mrb[100].mxu1  ;;  %v2255_v10 = vpop.f32.mrb[101].mxu0 }
 0x454   : > { %3885 = vst [vmem:[%s6374_s12 + $0x650] sm:$0xff] %v3600_v9  ;;  %3884 = vst [vmem:[%s6374_s12 + $0x648] sm:$0xff] %v2255_v10  ;;  %v3602_v11 = vpop.f32.mrb[101].mxu1 }
 0x455   : > { %3886 = vst [vmem:[%s6374_s12 + $0x658] sm:$0xff] %v3602_v11 }
 0x456   : > { %v2259_v12 = vpop.f32.mrb[102].mxu0 }
 0x457   : > { %3887 = vst [vmem:[%s6374_s12 + $0x660] sm:$0xff] %v2259_v12  ;;  %v3606_v13 = vpop.f32.mrb[102].mxu1  ;;  %v2261_v14 = vpop.f32.mrb[103].mxu0 }
 0x458   : > { %3889 = vst [vmem:[%s6374_s12 + $0x670] sm:$0xff] %v3606_v13  ;;  %3888 = vst [vmem:[%s6374_s12 + $0x668] sm:$0xff] %v2261_v14  ;;  %v3608_v15 = vpop.f32.mrb[103].mxu1 }
 0x459   : > { %3890 = vst [vmem:[%s6374_s12 + $0x678] sm:$0xff] %v3608_v15 }
 0x45a   : > { %v2265_v16 = vpop.f32.mrb[104].mxu0 }
 0x45b   : > { %3891 = vst [vmem:[%s6374_s12 + $0x680] sm:$0xff] %v2265_v16  ;;  %v3612_v17 = vpop.f32.mrb[104].mxu1  ;;  %v2267_v18 = vpop.f32.mrb[105].mxu0 }
 0x45c   : > { %3893 = vst [vmem:[%s6374_s12 + $0x690] sm:$0xff] %v3612_v17  ;;  %3892 = vst [vmem:[%s6374_s12 + $0x688] sm:$0xff] %v2267_v18  ;;  %v3614_v19 = vpop.f32.mrb[105].mxu1 }
 0x45d   : > { %3894 = vst [vmem:[%s6374_s12 + $0x698] sm:$0xff] %v3614_v19 }
 0x45e   : > { %v2271_v20 = vpop.f32.mrb[106].mxu0 }
 0x45f   : > { %3895 = vst [vmem:[%s6374_s12 + $0x6a0] sm:$0xff] %v2271_v20  ;;  %v3618_v21 = vpop.f32.mrb[106].mxu1  ;;  %v2273_v22 = vpop.f32.mrb[107].mxu0 }
 0x460   : > { %3897 = vst [vmem:[%s6374_s12 + $0x6b0] sm:$0xff] %v3618_v21  ;;  %3896 = vst [vmem:[%s6374_s12 + $0x6a8] sm:$0xff] %v2273_v22  ;;  %v3620_v23 = vpop.f32.mrb[107].mxu1 }
 0x461   : > { %3898 = vst [vmem:[%s6374_s12 + $0x6b8] sm:$0xff] %v3620_v23 }
 0x462   : > { %v2277_v24 = vpop.f32.mrb[108].mxu0 }
 0x463   : > { %3899 = vst [vmem:[%s6374_s12 + $0x6c0] sm:$0xff] %v2277_v24  ;;  %v3624_v25 = vpop.f32.mrb[108].mxu1  ;;  %v2279_v26 = vpop.f32.mrb[109].mxu0 }
 0x464   : > { %3901 = vst [vmem:[%s6374_s12 + $0x6d0] sm:$0xff] %v3624_v25  ;;  %3900 = vst [vmem:[%s6374_s12 + $0x6c8] sm:$0xff] %v2279_v26  ;;  %v3626_v27 = vpop.f32.mrb[109].mxu1 }
 0x465   : > { %3902 = vst [vmem:[%s6374_s12 + $0x6d8] sm:$0xff] %v3626_v27 }
 0x466   : > { %v2283_v28 = vpop.f32.mrb[110].mxu0 }
 0x467   : > { %3903 = vst [vmem:[%s6374_s12 + $0x6e0] sm:$0xff] %v2283_v28  ;;  %v3630_v29 = vpop.f32.mrb[110].mxu1  ;;  %v2285_v30 = vpop.f32.mrb[111].mxu0 }
 0x468   : > { %3905 = vst [vmem:[%s6374_s12 + $0x6f0] sm:$0xff] %v3630_v29  ;;  %3904 = vst [vmem:[%s6374_s12 + $0x6e8] sm:$0xff] %v2285_v30  ;;  %v3632_v31 = vpop.f32.mrb[111].mxu1 }
 0x469   : > { %3906 = vst [vmem:[%s6374_s12 + $0x6f8] sm:$0xff] %v3632_v31 }
 0x46a   : > { %v2289_v32 = vpop.f32.mrb[112].mxu0 }
 0x46b   : > { %3907 = vst [vmem:[%s6374_s12 + $0x700] sm:$0xff] %v2289_v32  ;;  %v3636_v33 = vpop.f32.mrb[112].mxu1  ;;  %v2291_v34 = vpop.f32.mrb[113].mxu0 }
 0x46c   : > { %3909 = vst [vmem:[%s6374_s12 + $0x710] sm:$0xff] %v3636_v33  ;;  %3908 = vst [vmem:[%s6374_s12 + $0x708] sm:$0xff] %v2291_v34  ;;  %v3638_v35 = vpop.f32.mrb[113].mxu1 }
 0x46d   : > { %3910 = vst [vmem:[%s6374_s12 + $0x718] sm:$0xff] %v3638_v35 }
 0x46e   : > { %v2295_v36 = vpop.f32.mrb[114].mxu0 }
 0x46f   : > { %3911 = vst [vmem:[%s6374_s12 + $0x720] sm:$0xff] %v2295_v36  ;;  %v3642_v37 = vpop.f32.mrb[114].mxu1  ;;  %v2297_v38 = vpop.f32.mrb[115].mxu0 }
 0x470   : > { %3913 = vst [vmem:[%s6374_s12 + $0x730] sm:$0xff] %v3642_v37  ;;  %3912 = vst [vmem:[%s6374_s12 + $0x728] sm:$0xff] %v2297_v38  ;;  %v3644_v39 = vpop.f32.mrb[115].mxu1 }
 0x471   : > { %3914 = vst [vmem:[%s6374_s12 + $0x738] sm:$0xff] %v3644_v39 }
 0x472   : > { %v2301_v40 = vpop.f32.mrb[116].mxu0 }
 0x473   : > { %3915 = vst [vmem:[%s6374_s12 + $0x740] sm:$0xff] %v2301_v40  ;;  %v3648_v41 = vpop.f32.mrb[116].mxu1  ;;  %v2303_v42 = vpop.f32.mrb[117].mxu0 }
 0x474   : > { %3917 = vst [vmem:[%s6374_s12 + $0x750] sm:$0xff] %v3648_v41  ;;  %3916 = vst [vmem:[%s6374_s12 + $0x748] sm:$0xff] %v2303_v42  ;;  %v3650_v43 = vpop.f32.mrb[117].mxu1 }
 0x475   : > { %3918 = vst [vmem:[%s6374_s12 + $0x758] sm:$0xff] %v3650_v43 }
 0x476   : > { %v2307_v44 = vpop.f32.mrb[118].mxu0 }
 0x477   : > { %3919 = vst [vmem:[%s6374_s12 + $0x760] sm:$0xff] %v2307_v44  ;;  %v3654_v45 = vpop.f32.mrb[118].mxu1  ;;  %v2309_v46 = vpop.f32.mrb[119].mxu0 }
 0x478   : > { %3921 = vst [vmem:[%s6374_s12 + $0x770] sm:$0xff] %v3654_v45  ;;  %3920 = vst [vmem:[%s6374_s12 + $0x768] sm:$0xff] %v2309_v46  ;;  %v3656_v47 = vpop.f32.mrb[119].mxu1 }
 0x479   : > { %3922 = vst [vmem:[%s6374_s12 + $0x778] sm:$0xff] %v3656_v47 }
 0x47a   : > { %v2313_v48 = vpop.f32.mrb[120].mxu0 }
 0x47b   : > { %3923 = vst [vmem:[%s6374_s12 + $0x780] sm:$0xff] %v2313_v48  ;;  %v3660_v49 = vpop.f32.mrb[120].mxu1  ;;  %v2315_v50 = vpop.f32.mrb[121].mxu0 }
 0x47c   : > { %3925 = vst [vmem:[%s6374_s12 + $0x790] sm:$0xff] %v3660_v49  ;;  %3924 = vst [vmem:[%s6374_s12 + $0x788] sm:$0xff] %v2315_v50  ;;  %v3662_v51 = vpop.f32.mrb[121].mxu1 }
 0x47d   : > { %3926 = vst [vmem:[%s6374_s12 + $0x798] sm:$0xff] %v3662_v51 }
 0x47e   : > { %v2319_v52 = vpop.f32.mrb[122].mxu0 }
 0x47f   : > { %3927 = vst [vmem:[%s6374_s12 + $0x7a0] sm:$0xff] %v2319_v52  ;;  %v3666_v53 = vpop.f32.mrb[122].mxu1  ;;  %v2321_v54 = vpop.f32.mrb[123].mxu0 }
 0x480   : > { %3929 = vst [vmem:[%s6374_s12 + $0x7b0] sm:$0xff] %v3666_v53  ;;  %3928 = vst [vmem:[%s6374_s12 + $0x7a8] sm:$0xff] %v2321_v54  ;;  %v3668_v55 = vpop.f32.mrb[123].mxu1 }
 0x481   : > { %3930 = vst [vmem:[%s6374_s12 + $0x7b8] sm:$0xff] %v3668_v55 }
 0x482   : > { %v2325_v56 = vpop.f32.mrb[124].mxu0 }
 0x483   : > { %3931 = vst [vmem:[%s6374_s12 + $0x7c0] sm:$0xff] %v2325_v56  ;;  %v3672_v57 = vpop.f32.mrb[124].mxu1  ;;  %v2327_v58 = vpop.f32.mrb[125].mxu0 }
 0x484   : > { %3933 = vst [vmem:[%s6374_s12 + $0x7d0] sm:$0xff] %v3672_v57  ;;  %3932 = vst [vmem:[%s6374_s12 + $0x7c8] sm:$0xff] %v2327_v58  ;;  %v3674_v59 = vpop.f32.mrb[125].mxu1 }
 0x485   : > { %3934 = vst [vmem:[%s6374_s12 + $0x7d8] sm:$0xff] %v3674_v59 }
 0x486   : > { %v2331_v60 = vpop.f32.mrb[126].mxu0 }
 0x487   : > { %3935 = vst [vmem:[%s6374_s12 + $0x7e0] sm:$0xff] %v2331_v60  ;;  %v3678_v61 = vpop.f32.mrb[126].mxu1  ;;  %v2333_v62 = vpop.f32.mrb[127].mxu0 }
 0x488   : > { %3937 = vst [vmem:[%s6374_s12 + $0x7f0] sm:$0xff] %v3678_v61  ;;  %3936 = vst [vmem:[%s6374_s12 + $0x7e8] sm:$0xff] %v2333_v62  ;;  %v3680_v63 = vpop.f32.mrb[127].mxu1 }
 0x489   : > { %3938 = vst [vmem:[%s6374_s12 + $0x7f8] sm:$0xff] %v3680_v63 }
 0x48a   : > { %5199 = shalt.err (!%p5196_p11)
}
 0x48b   : > { %s5200_s28 = scalar_lea.hbm %s6653_s24, 32768  ;;  %s5204_s8 = scalar_lea.hbm %s6779_s26, 131072 }
 0x48c   : > { %p5201_p2 = scmp.ne.s32.totalorder %s6653_s24, %s5200_s28  ;;  %p5205_p7 = scmp.lt.u32.totalorder %s6653_s24, %s6779_s26 }
 0x48d   : > { %p5206_p13 = scmp.lt.u32.totalorder %s5204_s8, %s5200_s28  ;;  %p5208_p1 = scmp.lt.u32.totalorder %s5200_s28, %s6653_s24 }
 0x48e   : > { %p5202_p5 = pnand %p5201_p2, %p6780_p12 }
 0x48f   : > { %p5207_p6 = por %p5206_p13, %p5205_p7 }
 0x490   : > { %p5203_p3 = pneg %p5202_p5 }
 0x491   : > { %p5209_p9 = por %p5208_p1, %p5207_p6 }
 0x493   : > { %p5210_p0 = pnand %p5209_p9, %p5203_p3 }
 0x495   : > { %5213 = shalt.err (!%p5210_p0)
}
 0x496   : > { %s5346_s6 = smov 512   ;;  %s5347_s23 = smov 1024  }
 0x497   : > { %s5348_s3 = smov 32  }
 0x498   : > { %4991 = dma.vmem_to_hbm [thread:$0]  (%p6780_p12), %s6655_s18, 32768, %s6653_s24, %s6663_s29, %s5346_s6, %s5347_s23, %s5348_s3  }
 0x499 PF: > { %p5005_p4 = scmp.ge.s32.totalorder %s5336_s22, 2  ;;  %s3971_s15 = sand.u32 1, %s5284_s9  }
 0x49a   : > { %p6781_p10 = scmp.ne.s32.totalorder %s6773_s27, 0  ;;  %s3972_s30 = scalar_lea.sflag [#allocation4], %s3971_s15 }
 0x49c   : > { %p5001_p8 = pnand %p5005_p4, %p6781_p10 }
 0x49e   : > { %5279 = dma.done.wait (!%p5001_p8), %s3972_s30, 32768  }
 0x49f   : > { %5281 = vsyncadd (!%p5001_p8), %s3972_s30, 4294934528  ;;  %s21_s22 = sadd.s32 1, %s5336_s22   ;;  %s6783_s18 = sld [smem:[#allocation14_spill]] }
 0x4a0   : > { %p6692_p11 = scmp.ge.s32.totalorder %s21_s22, 6   ;;  %s6784_s19 = sld [smem:[#allocation11_spill]] }
 0x4a1   : > { %s6785_s27 = sld [smem:[#allocation12_spill]]  ;;  %s6786_s21 = sld [smem:[#allocation13_spill]] }
 0x4a2   : > { %s6787_s9 = smov %s5288_s10  ;;  %s6788_s10 = smov %s5292_s11 }
 0x4a3   : > { %s6789_s11 = smov %s5555_s0  ;;  %s6790_s12 = smov %s5300_s13 }
 0x4a4   : > { %s6791_s13 = smov %s5304_s14  ;;  %s6793_s15 = smov %s5312_s16 }
 0x4a5   : > { %s6792_s14 = smov %s6783_s18  ;;  %s6794_s16 = smov %s5316_s17 }
 0x4a6   : > { %s6795_s17 = smov %s5552_s25  ;;  %s6796_s18 = smov %s5328_s20 }
 0x4a7   : > { %s6797_s20 = smov %s6785_s27  ;;  %20 = sbr.rel (!%p6692_p11) target bundleno = 15 (0xf), region = 86 }
 0x4ae   :  { %3977 = vsyncpa [#allocation3], 1 }
 0x4af   :  { %3979 = vsyncpa [#allocation3 + $0x1], 1 }
 0x4b0   :  { %3980 = vsyncpa [#allocation6], 1 }
 0x4b1   :  { %3982 = vsyncpa [#allocation6 + $0x1], 1 }
 0x4b2   :  { %3983 = vsyncpa [#allocation4], 1 }
 0x4b3   :  { %3985 = vsyncpa [#allocation4 + $0x1], 1 }

</bundles_post_ra>
